<compile_context>
chip_gen: v7x
topology: tpu7x:2x2x1
jax: 0.10.0
libtpu: 0.0.40
codegen_flags: <defaults>
</compile_context>

<pallas_src>
import jax
import jax.numpy as jnp
from jax import lax
from jax.experimental import pallas as pl
from jax.experimental.pallas import tpu as pltpu

LANE = 128
SUBLANE = 8


def _round_up(x, m):
    return (x + m - 1) // m * m


def _bilstm_kernel(x_ref, wih_ref, bg_ref, whh_f_ref, whh_b_ref, wemb_ref,
                   be_ref, out_ref, gx_ref, rec_ref, h_f, c_f, h_b, c_b):
    """Bidirectional LSTM + Linear embedding, one grid-less kernel.

    Inputs (all VMEM, padded & pre-transposed by the wrapper):
      x_ref   : (T*Bp, nIn)          time-major, batch padded to Bp
      wih_ref : (nIn, 8*Hp)          [fwd i,f,g,o | bwd i,f,g,o] input weights
      bg_ref  : (1, 8*Hp)            combined b_ih + b_hh, both directions
      whh_*   : (Hp, 4*Hp)           recurrent weights per direction
      wemb_ref: (2*Hp, Np)           Linear weight, rows = [h_fwd ; h_bwd]
      be_ref  : (1, Np)              Linear bias
    Scratch:
      gx_ref  : (T*Bp, 8*Hp)   precomputed x@W_ih + b for both directions
      rec_ref : (T*Bp, 2*Hp)   concatenated [h_fwd, h_bwd] per (t, b)
      h_f/c_f/h_b/c_b : (Bp, Hp) recurrent state
    """
    Bp, Hp = h_f.shape
    TB = gx_ref.shape[0]
    T = TB // Bp
    G = 4 * Hp

    # (1) Batched input-to-hidden gates for both directions (bias folded in).
    gx_ref[...] = (
        jnp.dot(x_ref[...], wih_ref[...], preferred_element_type=jnp.float32)
        + bg_ref[...])

    # (2) Zero initial (h, c) for both directions.
    h_f[...] = jnp.zeros_like(h_f)
    c_f[...] = jnp.zeros_like(c_f)
    h_b[...] = jnp.zeros_like(h_b)
    c_b[...] = jnp.zeros_like(c_b)

    def gates_to_hc(gates, c_prev):
        # PyTorch gate order: i, f, g, o — each Hp wide (lane-aligned slices).
        i = jax.nn.sigmoid(gates[:, 0:Hp])
        f = jax.nn.sigmoid(gates[:, Hp:2 * Hp])
        g = jnp.tanh(gates[:, 2 * Hp:3 * Hp])
        o = jax.nn.sigmoid(gates[:, 3 * Hp:4 * Hp])
        c_new = f * c_prev + i * g
        h_new = o * jnp.tanh(c_new)
        return h_new, c_new

    # (3) Interleaved forward (t = s) and backward (t = T-1-s) recurrence:
    #     two independent chains per iteration -> co-issued MXU/EUP work.
    def step(s, carry):
        rf = pl.multiple_of(s * Bp, Bp)
        rb = pl.multiple_of((T - 1 - s) * Bp, Bp)

        gates_f = gx_ref[pl.ds(rf, Bp), 0:G] + jnp.dot(
            h_f[...], whh_f_ref[...], preferred_element_type=jnp.float32)
        gates_b = gx_ref[pl.ds(rb, Bp), G:2 * G] + jnp.dot(
            h_b[...], whh_b_ref[...], preferred_element_type=jnp.float32)

        hf_new, cf_new = gates_to_hc(gates_f, c_f[...])
        hb_new, cb_new = gates_to_hc(gates_b, c_b[...])

        h_f[...] = hf_new
        c_f[...] = cf_new
        h_b[...] = hb_new
        c_b[...] = cb_new

        rec_ref[pl.ds(rf, Bp), 0:Hp] = hf_new
        rec_ref[pl.ds(rb, Bp), Hp:2 * Hp] = hb_new
        return carry

    lax.fori_loop(0, T, step, 0, unroll=True if T <= 32 else 4)

    # (4) Single batched Linear projection; lane-dense output store.
    out_ref[...] = (
        jnp.dot(rec_ref[...], wemb_ref[...], preferred_element_type=jnp.float32)
        + be_ref[...]).astype(out_ref.dtype)


def bidirectional_lstm(x, packed, nOut):
    """x: (T, B, nIn) f32; packed: dict from pack_params. Returns (T, B, nOut)."""
    T, B, nIn = x.shape
    Hp = packed["whh_f"].shape[0]
    Np = packed["wemb"].shape[1]
    Bp = _round_up(B, SUBLANE)

    x_p = jnp.pad(x, ((0, 0), (0, Bp - B), (0, 0))).reshape(T * Bp, nIn)

    arrays = (x_p, packed["wih_cat"], packed["bg_cat"], packed["whh_f"],
              packed["whh_b"], packed["wemb"], packed["be"])
    n_elems = (sum(a.size for a in arrays)
               + T * Bp * Np                     # output
               + T * Bp * 8 * Hp                 # gx scratch
               + T * Bp * 2 * Hp                 # rec scratch
               + 4 * Bp * Hp)                    # h/c state
    vmem_limit = min(int(n_elems * 4 * 2) + (4 << 20), 64 * 1024 * 1024)

    vmem = pl.BlockSpec(memory_space=pltpu.MemorySpace.VMEM)
    out = pl.pallas_call(
        _bilstm_kernel,
        out_shape=jax.ShapeDtypeStruct((T * Bp, Np), jnp.float32),
        in_specs=[vmem] * 7,
        out_specs=vmem,
        scratch_shapes=[
            pltpu.VMEM((T * Bp, 8 * Hp), jnp.float32),   # gx
            pltpu.VMEM((T * Bp, 2 * Hp), jnp.float32),   # rec (fwd|bwd)
            pltpu.VMEM((Bp, Hp), jnp.float32),           # h_f
            pltpu.VMEM((Bp, Hp), jnp.float32),           # c_f
            pltpu.VMEM((Bp, Hp), jnp.float32),           # h_b
            pltpu.VMEM((Bp, Hp), jnp.float32),           # c_b
        ],
        compiler_params=pltpu.CompilerParams(vmem_limit_bytes=vmem_limit),
    )(*arrays)

    return out.reshape(T, Bp, Np)[:, :B, :nOut]


def init_params(key, nIn, nHidden, nOut):
    """PyTorch-layout parameters, uniform(-1/sqrt(fan), +1/sqrt(fan)) init."""
    ks = jax.random.split(key, 10)
    kH = 1.0 / float(jnp.sqrt(nHidden))
    kE = 1.0 / float(jnp.sqrt(2 * nHidden))

    def u(k, shape, scale):
        return jax.random.uniform(k, shape, jnp.float32, -scale, scale)

    return {
        "w_ih_f": u(ks[0], (4 * nHidden, nIn), kH),
        "w_hh_f": u(ks[1], (4 * nHidden, nHidden), kH),
        "b_ih_f": u(ks[2], (4 * nHidden,), kH),
        "b_hh_f": u(ks[3], (4 * nHidden,), kH),
        "w_ih_b": u(ks[4], (4 * nHidden, nIn), kH),
        "w_hh_b": u(ks[5], (4 * nHidden, nHidden), kH),
        "b_ih_b": u(ks[6], (4 * nHidden,), kH),
        "b_hh_b": u(ks[7], (4 * nHidden,), kH),
        "w_emb": u(ks[8], (nOut, 2 * nHidden), kE),
        "b_emb": u(ks[9], (nOut,), kE),
    }


def pack_params(p, nIn, H, nOut):
    """Pad H -> Hp (128) per gate, nOut -> Np (128); transpose for the kernel.

    Zero-padded gates keep padded hidden units exactly 0 through the
    recurrence (i=f=o=sigmoid(0)=0.5, g=tanh(0)=0 -> c=h=0), so padding is
    numerically transparent.
    """
    Hp = _round_up(H, LANE)
    Np = _round_up(nOut, LANE)

    def pad_gate_rows(w):                       # (4H, X) -> (4Hp, X)
        chunks = jnp.split(w, 4, axis=0)
        return jnp.concatenate(
            [jnp.pad(c, ((0, Hp - H), (0, 0))) for c in chunks], axis=0)

    def pad_gate_vec(b):                        # (4H,) -> (4Hp,)
        chunks = jnp.split(b, 4)
        return jnp.concatenate([jnp.pad(c, (0, Hp - H)) for c in chunks])

    wih_f = pad_gate_rows(p["w_ih_f"]).T        # (nIn, 4Hp)
    wih_b = pad_gate_rows(p["w_ih_b"]).T
    wih_cat = jnp.concatenate([wih_f, wih_b], axis=1)          # (nIn, 8Hp)

    whh_f = jnp.pad(pad_gate_rows(p["w_hh_f"]), ((0, 0), (0, Hp - H))).T
    whh_b = jnp.pad(pad_gate_rows(p["w_hh_b"]), ((0, 0), (0, Hp - H))).T

    bg_f = pad_gate_vec(p["b_ih_f"] + p["b_hh_f"])
    bg_b = pad_gate_vec(p["b_ih_b"] + p["b_hh_b"])
    bg_cat = jnp.concatenate([bg_f, bg_b])[None, :]            # (1, 8Hp)

    we_f = jnp.pad(p["w_emb"][:, :H], ((0, Np - nOut), (0, Hp - H)))
    we_b = jnp.pad(p["w_emb"][:, H:], ((0, Np - nOut), (0, Hp - H)))
    wemb = jnp.concatenate([we_f, we_b], axis=1).T             # (2Hp, Np)
    be = jnp.pad(p["b_emb"], (0, Np - nOut))[None, :]          # (1, Np)

    return {"wih_cat": wih_cat, "bg_cat": bg_cat, "whh_f": whh_f,
            "whh_b": whh_b, "wemb": wemb, "be": be}


def ref_forward(x, p):
    """Pure-JAX reference on the original (unpadded) PyTorch-layout params."""
    H = p["w_hh_f"].shape[1]
    B = x.shape[1]

    def run_dir(w_ih, w_hh, b_ih, b_hh, reverse):
        wih_t, whh_t = w_ih.T, w_hh.T
        b = (b_ih + b_hh)[None, :]

        def step(carry, x_t):
            h, c = carry
            gates = x_t @ wih_t + h @ whh_t + b
            i = jax.nn.sigmoid(gates[:, :H])
            f = jax.nn.sigmoid(gates[:, H:2 * H])
            g = jnp.tanh(gates[:, 2 * H:3 * H])
            o = jax.nn.sigmoid(gates[:, 3 * H:])
            c = f * c + i * g
            h = o * jnp.tanh(c)
            return (h, c), h

        init = (jnp.zeros((B, H), jnp.float32), jnp.zeros((B, H), jnp.float32))
        _, hs = lax.scan(step, init, x, reverse=reverse)
        return hs

    hf = run_dir(p["w_ih_f"], p["w_hh_f"], p["b_ih_f"], p["b_hh_f"], False)
    hb = run_dir(p["w_ih_b"], p["w_hh_b"], p["b_ih_b"], p["b_hh_b"], True)
    rec = jnp.concatenate([hf, hb], axis=-1)
    return rec @ p["w_emb"].T + p["b_emb"]


if __name__ == "__main__":
    T, B, nIn, nHidden, nOut = 8, 2, 32, 32, 16
    key = jax.random.PRNGKey(0)
    kx, kp = jax.random.split(key)
    x = jax.random.normal(kx, (T, B, nIn), jnp.float32)

    params = init_params(kp, nIn, nHidden, nOut)
    packed = pack_params(params, nIn, nHidden, nOut)

    out = bidirectional_lstm(x, packed, nOut)
    out = jax.block_until_ready(out)
    assert out.shape == (T, B, nOut), out.shape

    ref = ref_forward(x, params)
    err = float(jnp.max(jnp.abs(out - ref)))
    assert err < 1e-4, f"max abs err {err}"

    print("KERNEL_OK")
</pallas_src>

<mosaic_0001>
module attributes {stable_mosaic.version = 11 : i64} {
  func.func @_bilstm_kernel(%arg0: memref<64x32xf32, #tpu.memory_space<vmem>>, %arg1: memref<32x1024xf32, #tpu.memory_space<vmem>>, %arg2: memref<1x1024xf32, #tpu.memory_space<vmem>>, %arg3: memref<128x512xf32, #tpu.memory_space<vmem>>, %arg4: memref<128x512xf32, #tpu.memory_space<vmem>>, %arg5: memref<256x128xf32, #tpu.memory_space<vmem>>, %arg6: memref<1x128xf32, #tpu.memory_space<vmem>>, %arg7: memref<64x128xf32, #tpu.memory_space<vmem>>, %arg8: memref<64x1024xf32, #tpu.memory_space<vmem>>, %arg9: memref<64x256xf32, #tpu.memory_space<vmem>>, %arg10: memref<8x128xf32, #tpu.memory_space<vmem>>, %arg11: memref<8x128xf32, #tpu.memory_space<vmem>>, %arg12: memref<8x128xf32, #tpu.memory_space<vmem>>, %arg13: memref<8x128xf32, #tpu.memory_space<vmem>>) attributes {dimension_semantics = [], scalar_prefetch = 0 : i64, scratch_operands = 6 : i64, tpu.core_type = #tpu.core_type<tc>} {
    %c0 = arith.constant 0 : index
    %c0_0 = arith.constant 0 : index
    %0 = vector.load %arg0[%c0, %c0_0] : memref<64x32xf32, #tpu.memory_space<vmem>>, vector<64x32xf32>
    %c0_1 = arith.constant 0 : index
    %c0_2 = arith.constant 0 : index
    %1 = vector.load %arg1[%c0_1, %c0_2] : memref<32x1024xf32, #tpu.memory_space<vmem>>, vector<32x1024xf32>
    %cst = arith.constant dense<0.000000e+00> : vector<64x1024xf32>
    %2 = tpu.matmul %0, %1, %cst {dimension_numbers = #tpu.dot_dimension_numbers<[1], [0], [0], [1], [0, 0, 1, 1], [], []>} : vector<64x32xf32>, vector<32x1024xf32>, vector<64x1024xf32> -> vector<64x1024xf32>
    %c0_3 = arith.constant 0 : index
    %c0_4 = arith.constant 0 : index
    %3 = vector.load %arg2[%c0_3, %c0_4] : memref<1x1024xf32, #tpu.memory_space<vmem>>, vector<1x1024xf32>
    %4 = vector.broadcast %3 : vector<1x1024xf32> to vector<64x1024xf32>
    %5 = arith.addf %2, %4 : vector<64x1024xf32>
    %c0_5 = arith.constant 0 : index
    %c0_6 = arith.constant 0 : index
    %6 = vector.load %arg8[%c0_5, %c0_6] : memref<64x1024xf32, #tpu.memory_space<vmem>>, vector<64x1024xf32>
    tpu.vector_store %arg8[%c0_5, %c0_6], %5 {strides = array<i32>} : memref<64x1024xf32, #tpu.memory_space<vmem>>, vector<64x1024xf32>,
    %cst_7 = arith.constant 0.000000e+00 : f32
    %7 = vector.broadcast %cst_7 : f32 to vector<8x128xf32>
    %c0_8 = arith.constant 0 : index
    %c0_9 = arith.constant 0 : index
    %8 = vector.load %arg10[%c0_8, %c0_9] : memref<8x128xf32, #tpu.memory_space<vmem>>, vector<8x128xf32>
    tpu.vector_store %arg10[%c0_8, %c0_9], %7 {strides = array<i32>} : memref<8x128xf32, #tpu.memory_space<vmem>>, vector<8x128xf32>,
    %cst_10 = arith.constant 0.000000e+00 : f32
    %9 = vector.broadcast %cst_10 : f32 to vector<8x128xf32>
    %c0_11 = arith.constant 0 : index
    %c0_12 = arith.constant 0 : index
    %10 = vector.load %arg11[%c0_11, %c0_12] : memref<8x128xf32, #tpu.memory_space<vmem>>, vector<8x128xf32>
    tpu.vector_store %arg11[%c0_11, %c0_12], %9 {strides = array<i32>} : memref<8x128xf32, #tpu.memory_space<vmem>>, vector<8x128xf32>,
    %cst_13 = arith.constant 0.000000e+00 : f32
    %11 = vector.broadcast %cst_13 : f32 to vector<8x128xf32>
    %c0_14 = arith.constant 0 : index
    %c0_15 = arith.constant 0 : index
    %12 = vector.load %arg12[%c0_14, %c0_15] : memref<8x128xf32, #tpu.memory_space<vmem>>, vector<8x128xf32>
    tpu.vector_store %arg12[%c0_14, %c0_15], %11 {strides = array<i32>} : memref<8x128xf32, #tpu.memory_space<vmem>>, vector<8x128xf32>,
    %cst_16 = arith.constant 0.000000e+00 : f32
    %13 = vector.broadcast %cst_16 : f32 to vector<8x128xf32>
    %c0_17 = arith.constant 0 : index
    %c0_18 = arith.constant 0 : index
    %14 = vector.load %arg13[%c0_17, %c0_18] : memref<8x128xf32, #tpu.memory_space<vmem>>, vector<8x128xf32>
    tpu.vector_store %arg13[%c0_17, %c0_18], %13 {strides = array<i32>} : memref<8x128xf32, #tpu.memory_space<vmem>>, vector<8x128xf32>,
    %c0_i32 = arith.constant 0 : i32
    %c8_i32 = arith.constant 8 : i32
    %15 = arith.muli %c0_i32, %c8_i32 : i32
    %16 = tpu.assume_multiple %15, 8 : i32
    %c7_i32 = arith.constant 7 : i32
    %17 = arith.subi %c7_i32, %c0_i32 : i32
    %c8_i32_19 = arith.constant 8 : i32
    %18 = arith.muli %17, %c8_i32_19 : i32
    %19 = tpu.assume_multiple %18, 8 : i32
    %20 = arith.index_cast %16 : i32 to index
    %c0_20 = arith.constant 0 : index
    %21 = vector.load %arg8[%20, %c0_20] : memref<64x1024xf32, #tpu.memory_space<vmem>>, vector<8x512xf32>
    %c0_21 = arith.constant 0 : index
    %c0_22 = arith.constant 0 : index
    %22 = vector.load %arg10[%c0_21, %c0_22] : memref<8x128xf32, #tpu.memory_space<vmem>>, vector<8x128xf32>
    %c0_23 = arith.constant 0 : index
    %c0_24 = arith.constant 0 : index
    %23 = vector.load %arg3[%c0_23, %c0_24] : memref<128x512xf32, #tpu.memory_space<vmem>>, vector<128x512xf32>
    %cst_25 = arith.constant dense<0.000000e+00> : vector<8x512xf32>
    %24 = tpu.matmul %22, %23, %cst_25 {dimension_numbers = #tpu.dot_dimension_numbers<[1], [0], [0], [1], [0, 0, 1, 1], [], []>} : vector<8x128xf32>, vector<128x512xf32>, vector<8x512xf32> -> vector<8x512xf32>
    %25 = arith.addf %21, %24 : vector<8x512xf32>
    %26 = arith.index_cast %19 : i32 to index
    %c512 = arith.constant 512 : index
    %27 = vector.load %arg8[%26, %c512] : memref<64x1024xf32, #tpu.memory_space<vmem>>, vector<8x512xf32>
    %c0_26 = arith.constant 0 : index
    %c0_27 = arith.constant 0 : index
    %28 = vector.load %arg12[%c0_26, %c0_27] : memref<8x128xf32, #tpu.memory_space<vmem>>, vector<8x128xf32>
    %c0_28 = arith.constant 0 : index
    %c0_29 = arith.constant 0 : index
    %29 = vector.load %arg4[%c0_28, %c0_29] : memref<128x512xf32, #tpu.memory_space<vmem>>, vector<128x512xf32>
    %cst_30 = arith.constant dense<0.000000e+00> : vector<8x512xf32>
    %30 = tpu.matmul %28, %29, %cst_30 {dimension_numbers = #tpu.dot_dimension_numbers<[1], [0], [0], [1], [0, 0, 1, 1], [], []>} : vector<8x128xf32>, vector<128x512xf32>, vector<8x512xf32> -> vector<8x512xf32>
    %31 = arith.addf %27, %30 : vector<8x512xf32>
    %c0_31 = arith.constant 0 : index
    %c0_32 = arith.constant 0 : index
    %32 = vector.load %arg11[%c0_31, %c0_32] : memref<8x128xf32, #tpu.memory_space<vmem>>, vector<8x128xf32>
    %33 = vector.extract_strided_slice %25 {offsets = [0, 0], sizes = [8, 128], strides = [1, 1]} : vector<8x512xf32> to vector<8x128xf32>
    %34 = arith.negf %33 : vector<8x128xf32>
    %35 = math.exp %34 : vector<8x128xf32>
    %cst_33 = arith.constant 1.000000e+00 : f32
    %36 = vector.broadcast %cst_33 : f32 to vector<8x128xf32>
    %37 = arith.addf %36, %35 : vector<8x128xf32>
    %38 = arith.divf %36, %37 : vector<8x128xf32>
    %39 = vector.extract_strided_slice %25 {offsets = [0, 128], sizes = [8, 128], strides = [1, 1]} : vector<8x512xf32> to vector<8x128xf32>
    %40 = arith.negf %39 : vector<8x128xf32>
    %41 = math.exp %40 : vector<8x128xf32>
    %cst_34 = arith.constant 1.000000e+00 : f32
    %42 = vector.broadcast %cst_34 : f32 to vector<8x128xf32>
    %43 = arith.addf %42, %41 : vector<8x128xf32>
    %44 = arith.divf %42, %43 : vector<8x128xf32>
    %45 = vector.extract_strided_slice %25 {offsets = [0, 256], sizes = [8, 128], strides = [1, 1]} : vector<8x512xf32> to vector<8x128xf32>
    %46 = math.tanh %45 : vector<8x128xf32>
    %47 = vector.extract_strided_slice %25 {offsets = [0, 384], sizes = [8, 128], strides = [1, 1]} : vector<8x512xf32> to vector<8x128xf32>
    %48 = arith.negf %47 : vector<8x128xf32>
    %49 = math.exp %48 : vector<8x128xf32>
    %cst_35 = arith.constant 1.000000e+00 : f32
    %50 = vector.broadcast %cst_35 : f32 to vector<8x128xf32>
    %51 = arith.addf %50, %49 : vector<8x128xf32>
    %52 = arith.divf %50, %51 : vector<8x128xf32>
    %53 = arith.mulf %44, %32 : vector<8x128xf32>
    %54 = arith.mulf %38, %46 : vector<8x128xf32>
    %55 = arith.addf %53, %54 : vector<8x128xf32>
    %56 = math.tanh %55 : vector<8x128xf32>
    %57 = arith.mulf %52, %56 : vector<8x128xf32>
    %c0_36 = arith.constant 0 : index
    %c0_37 = arith.constant 0 : index
    %58 = vector.load %arg13[%c0_36, %c0_37] : memref<8x128xf32, #tpu.memory_space<vmem>>, vector<8x128xf32>
    %59 = vector.extract_strided_slice %31 {offsets = [0, 0], sizes = [8, 128], strides = [1, 1]} : vector<8x512xf32> to vector<8x128xf32>
    %60 = arith.negf %59 : vector<8x128xf32>
    %61 = math.exp %60 : vector<8x128xf32>
    %cst_38 = arith.constant 1.000000e+00 : f32
    %62 = vector.broadcast %cst_38 : f32 to vector<8x128xf32>
    %63 = arith.addf %62, %61 : vector<8x128xf32>
    %64 = arith.divf %62, %63 : vector<8x128xf32>
    %65 = vector.extract_strided_slice %31 {offsets = [0, 128], sizes = [8, 128], strides = [1, 1]} : vector<8x512xf32> to vector<8x128xf32>
    %66 = arith.negf %65 : vector<8x128xf32>
    %67 = math.exp %66 : vector<8x128xf32>
    %cst_39 = arith.constant 1.000000e+00 : f32
    %68 = vector.broadcast %cst_39 : f32 to vector<8x128xf32>
    %69 = arith.addf %68, %67 : vector<8x128xf32>
    %70 = arith.divf %68, %69 : vector<8x128xf32>
    %71 = vector.extract_strided_slice %31 {offsets = [0, 256], sizes = [8, 128], strides = [1, 1]} : vector<8x512xf32> to vector<8x128xf32>
    %72 = math.tanh %71 : vector<8x128xf32>
    %73 = vector.extract_strided_slice %31 {offsets = [0, 384], sizes = [8, 128], strides = [1, 1]} : vector<8x512xf32> to vector<8x128xf32>
    %74 = arith.negf %73 : vector<8x128xf32>
    %75 = math.exp %74 : vector<8x128xf32>
    %cst_40 = arith.constant 1.000000e+00 : f32
    %76 = vector.broadcast %cst_40 : f32 to vector<8x128xf32>
    %77 = arith.addf %76, %75 : vector<8x128xf32>
    %78 = arith.divf %76, %77 : vector<8x128xf32>
    %79 = arith.mulf %70, %58 : vector<8x128xf32>
    %80 = arith.mulf %64, %72 : vector<8x128xf32>
    %81 = arith.addf %79, %80 : vector<8x128xf32>
    %82 = math.tanh %81 : vector<8x128xf32>
    %83 = arith.mulf %78, %82 : vector<8x128xf32>
    %c0_41 = arith.constant 0 : index
    %c0_42 = arith.constant 0 : index
    %84 = vector.load %arg10[%c0_41, %c0_42] : memref<8x128xf32, #tpu.memory_space<vmem>>, vector<8x128xf32>
    tpu.vector_store %arg10[%c0_41, %c0_42], %57 {strides = array<i32>} : memref<8x128xf32, #tpu.memory_space<vmem>>, vector<8x128xf32>,
    %c0_43 = arith.constant 0 : index
    %c0_44 = arith.constant 0 : index
    %85 = vector.load %arg11[%c0_43, %c0_44] : memref<8x128xf32, #tpu.memory_space<vmem>>, vector<8x128xf32>
    tpu.vector_store %arg11[%c0_43, %c0_44], %55 {strides = array<i32>} : memref<8x128xf32, #tpu.memory_space<vmem>>, vector<8x128xf32>,
    %c0_45 = arith.constant 0 : index
    %c0_46 = arith.constant 0 : index
    %86 = vector.load %arg12[%c0_45, %c0_46] : memref<8x128xf32, #tpu.memory_space<vmem>>, vector<8x128xf32>
    tpu.vector_store %arg12[%c0_45, %c0_46], %83 {strides = array<i32>} : memref<8x128xf32, #tpu.memory_space<vmem>>, vector<8x128xf32>,
    %c0_47 = arith.constant 0 : index
    %c0_48 = arith.constant 0 : index
    %87 = vector.load %arg13[%c0_47, %c0_48] : memref<8x128xf32, #tpu.memory_space<vmem>>, vector<8x128xf32>
    tpu.vector_store %arg13[%c0_47, %c0_48], %81 {strides = array<i32>} : memref<8x128xf32, #tpu.memory_space<vmem>>, vector<8x128xf32>,
    %88 = arith.index_cast %16 : i32 to index
    %c0_49 = arith.constant 0 : index
    %89 = vector.load %arg9[%88, %c0_49] : memref<64x256xf32, #tpu.memory_space<vmem>>, vector<8x128xf32>
    tpu.vector_store %arg9[%88, %c0_49], %57 {strides = array<i32>} : memref<64x256xf32, #tpu.memory_space<vmem>>, vector<8x128xf32>,
    %90 = arith.index_cast %19 : i32 to index
    %c128 = arith.constant 128 : index
    %91 = vector.load %arg9[%90, %c128] : memref<64x256xf32, #tpu.memory_space<vmem>>, vector<8x128xf32>
    tpu.vector_store %arg9[%90, %c128], %83 {strides = array<i32>} : memref<64x256xf32, #tpu.memory_space<vmem>>, vector<8x128xf32>,
    %c1_i32 = arith.constant 1 : i32
    %c8_i32_50 = arith.constant 8 : i32
    %92 = arith.muli %c1_i32, %c8_i32_50 : i32
    %93 = tpu.assume_multiple %92, 8 : i32
    %c7_i32_51 = arith.constant 7 : i32
    %94 = arith.subi %c7_i32_51, %c1_i32 : i32
    %c8_i32_52 = arith.constant 8 : i32
    %95 = arith.muli %94, %c8_i32_52 : i32
    %96 = tpu.assume_multiple %95, 8 : i32
    %97 = arith.index_cast %93 : i32 to index
    %c0_53 = arith.constant 0 : index
    %98 = vector.load %arg8[%97, %c0_53] : memref<64x1024xf32, #tpu.memory_space<vmem>>, vector<8x512xf32>
    %c0_54 = arith.constant 0 : index
    %c0_55 = arith.constant 0 : index
    %99 = vector.load %arg10[%c0_54, %c0_55] : memref<8x128xf32, #tpu.memory_space<vmem>>, vector<8x128xf32>
    %c0_56 = arith.constant 0 : index
    %c0_57 = arith.constant 0 : index
    %100 = vector.load %arg3[%c0_56, %c0_57] : memref<128x512xf32, #tpu.memory_space<vmem>>, vector<128x512xf32>
    %cst_58 = arith.constant dense<0.000000e+00> : vector<8x512xf32>
    %101 = tpu.matmul %99, %100, %cst_58 {dimension_numbers = #tpu.dot_dimension_numbers<[1], [0], [0], [1], [0, 0, 1, 1], [], []>} : vector<8x128xf32>, vector<128x512xf32>, vector<8x512xf32> -> vector<8x512xf32>
    %102 = arith.addf %98, %101 : vector<8x512xf32>
    %103 = arith.index_cast %96 : i32 to index
    %c512_59 = arith.constant 512 : index
    %104 = vector.load %arg8[%103, %c512_59] : memref<64x1024xf32, #tpu.memory_space<vmem>>, vector<8x512xf32>
    %c0_60 = arith.constant 0 : index
    %c0_61 = arith.constant 0 : index
    %105 = vector.load %arg12[%c0_60, %c0_61] : memref<8x128xf32, #tpu.memory_space<vmem>>, vector<8x128xf32>
    %c0_62 = arith.constant 0 : index
    %c0_63 = arith.constant 0 : index
    %106 = vector.load %arg4[%c0_62, %c0_63] : memref<128x512xf32, #tpu.memory_space<vmem>>, vector<128x512xf32>
    %cst_64 = arith.constant dense<0.000000e+00> : vector<8x512xf32>
    %107 = tpu.matmul %105, %106, %cst_64 {dimension_numbers = #tpu.dot_dimension_numbers<[1], [0], [0], [1], [0, 0, 1, 1], [], []>} : vector<8x128xf32>, vector<128x512xf32>, vector<8x512xf32> -> vector<8x512xf32>
    %108 = arith.addf %104, %107 : vector<8x512xf32>
    %c0_65 = arith.constant 0 : index
    %c0_66 = arith.constant 0 : index
    %109 = vector.load %arg11[%c0_65, %c0_66] : memref<8x128xf32, #tpu.memory_space<vmem>>, vector<8x128xf32>
    %110 = vector.extract_strided_slice %102 {offsets = [0, 0], sizes = [8, 128], strides = [1, 1]} : vector<8x512xf32> to vector<8x128xf32>
    %111 = arith.negf %110 : vector<8x128xf32>
    %112 = math.exp %111 : vector<8x128xf32>
    %cst_67 = arith.constant 1.000000e+00 : f32
    %113 = vector.broadcast %cst_67 : f32 to vector<8x128xf32>
    %114 = arith.addf %113, %112 : vector<8x128xf32>
    %115 = arith.divf %113, %114 : vector<8x128xf32>
    %116 = vector.extract_strided_slice %102 {offsets = [0, 128], sizes = [8, 128], strides = [1, 1]} : vector<8x512xf32> to vector<8x128xf32>
    %117 = arith.negf %116 : vector<8x128xf32>
    %118 = math.exp %117 : vector<8x128xf32>
    %cst_68 = arith.constant 1.000000e+00 : f32
    %119 = vector.broadcast %cst_68 : f32 to vector<8x128xf32>
    %120 = arith.addf %119, %118 : vector<8x128xf32>
    %121 = arith.divf %119, %120 : vector<8x128xf32>
    %122 = vector.extract_strided_slice %102 {offsets = [0, 256], sizes = [8, 128], strides = [1, 1]} : vector<8x512xf32> to vector<8x128xf32>
    %123 = math.tanh %122 : vector<8x128xf32>
    %124 = vector.extract_strided_slice %102 {offsets = [0, 384], sizes = [8, 128], strides = [1, 1]} : vector<8x512xf32> to vector<8x128xf32>
    %125 = arith.negf %124 : vector<8x128xf32>
    %126 = math.exp %125 : vector<8x128xf32>
    %cst_69 = arith.constant 1.000000e+00 : f32
    %127 = vector.broadcast %cst_69 : f32 to vector<8x128xf32>
    %128 = arith.addf %127, %126 : vector<8x128xf32>
    %129 = arith.divf %127, %128 : vector<8x128xf32>
    %130 = arith.mulf %121, %109 : vector<8x128xf32>
    %131 = arith.mulf %115, %123 : vector<8x128xf32>
    %132 = arith.addf %130, %131 : vector<8x128xf32>
    %133 = math.tanh %132 : vector<8x128xf32>
    %134 = arith.mulf %129, %133 : vector<8x128xf32>
    %c0_70 = arith.constant 0 : index
    %c0_71 = arith.constant 0 : index
    %135 = vector.load %arg13[%c0_70, %c0_71] : memref<8x128xf32, #tpu.memory_space<vmem>>, vector<8x128xf32>
    %136 = vector.extract_strided_slice %108 {offsets = [0, 0], sizes = [8, 128], strides = [1, 1]} : vector<8x512xf32> to vector<8x128xf32>
    %137 = arith.negf %136 : vector<8x128xf32>
    %138 = math.exp %137 : vector<8x128xf32>
    %cst_72 = arith.constant 1.000000e+00 : f32
    %139 = vector.broadcast %cst_72 : f32 to vector<8x128xf32>
    %140 = arith.addf %139, %138 : vector<8x128xf32>
    %141 = arith.divf %139, %140 : vector<8x128xf32>
    %142 = vector.extract_strided_slice %108 {offsets = [0, 128], sizes = [8, 128], strides = [1, 1]} : vector<8x512xf32> to vector<8x128xf32>
    %143 = arith.negf %142 : vector<8x128xf32>
    %144 = math.exp %143 : vector<8x128xf32>
    %cst_73 = arith.constant 1.000000e+00 : f32
    %145 = vector.broadcast %cst_73 : f32 to vector<8x128xf32>
    %146 = arith.addf %145, %144 : vector<8x128xf32>
    %147 = arith.divf %145, %146 : vector<8x128xf32>
    %148 = vector.extract_strided_slice %108 {offsets = [0, 256], sizes = [8, 128], strides = [1, 1]} : vector<8x512xf32> to vector<8x128xf32>
    %149 = math.tanh %148 : vector<8x128xf32>
    %150 = vector.extract_strided_slice %108 {offsets = [0, 384], sizes = [8, 128], strides = [1, 1]} : vector<8x512xf32> to vector<8x128xf32>
    %151 = arith.negf %150 : vector<8x128xf32>
    %152 = math.exp %151 : vector<8x128xf32>
    %cst_74 = arith.constant 1.000000e+00 : f32
    %153 = vector.broadcast %cst_74 : f32 to vector<8x128xf32>
    %154 = arith.addf %153, %152 : vector<8x128xf32>
    %155 = arith.divf %153, %154 : vector<8x128xf32>
    %156 = arith.mulf %147, %135 : vector<8x128xf32>
    %157 = arith.mulf %141, %149 : vector<8x128xf32>
    %158 = arith.addf %156, %157 : vector<8x128xf32>
    %159 = math.tanh %158 : vector<8x128xf32>
    %160 = arith.mulf %155, %159 : vector<8x128xf32>
    %c0_75 = arith.constant 0 : index
    %c0_76 = arith.constant 0 : index
    %161 = vector.load %arg10[%c0_75, %c0_76] : memref<8x128xf32, #tpu.memory_space<vmem>>, vector<8x128xf32>
    tpu.vector_store %arg10[%c0_75, %c0_76], %134 {strides = array<i32>} : memref<8x128xf32, #tpu.memory_space<vmem>>, vector<8x128xf32>,
    %c0_77 = arith.constant 0 : index
    %c0_78 = arith.constant 0 : index
    %162 = vector.load %arg11[%c0_77, %c0_78] : memref<8x128xf32, #tpu.memory_space<vmem>>, vector<8x128xf32>
    tpu.vector_store %arg11[%c0_77, %c0_78], %132 {strides = array<i32>} : memref<8x128xf32, #tpu.memory_space<vmem>>, vector<8x128xf32>,
    %c0_79 = arith.constant 0 : index
    %c0_80 = arith.constant 0 : index
    %163 = vector.load %arg12[%c0_79, %c0_80] : memref<8x128xf32, #tpu.memory_space<vmem>>, vector<8x128xf32>
    tpu.vector_store %arg12[%c0_79, %c0_80], %160 {strides = array<i32>} : memref<8x128xf32, #tpu.memory_space<vmem>>, vector<8x128xf32>,
    %c0_81 = arith.constant 0 : index
    %c0_82 = arith.constant 0 : index
    %164 = vector.load %arg13[%c0_81, %c0_82] : memref<8x128xf32, #tpu.memory_space<vmem>>, vector<8x128xf32>
    tpu.vector_store %arg13[%c0_81, %c0_82], %158 {strides = array<i32>} : memref<8x128xf32, #tpu.memory_space<vmem>>, vector<8x128xf32>,
    %165 = arith.index_cast %93 : i32 to index
    %c0_83 = arith.constant 0 : index
    %166 = vector.load %arg9[%165, %c0_83] : memref<64x256xf32, #tpu.memory_space<vmem>>, vector<8x128xf32>
    tpu.vector_store %arg9[%165, %c0_83], %134 {strides = array<i32>} : memref<64x256xf32, #tpu.memory_space<vmem>>, vector<8x128xf32>,
    %167 = arith.index_cast %96 : i32 to index
    %c128_84 = arith.constant 128 : index
    %168 = vector.load %arg9[%167, %c128_84] : memref<64x256xf32, #tpu.memory_space<vmem>>, vector<8x128xf32>
    tpu.vector_store %arg9[%167, %c128_84], %160 {strides = array<i32>} : memref<64x256xf32, #tpu.memory_space<vmem>>, vector<8x128xf32>,
    %c2_i32 = arith.constant 2 : i32
    %c8_i32_85 = arith.constant 8 : i32
    %169 = arith.muli %c2_i32, %c8_i32_85 : i32
    %170 = tpu.assume_multiple %169, 8 : i32
    %c7_i32_86 = arith.constant 7 : i32
    %171 = arith.subi %c7_i32_86, %c2_i32 : i32
    %c8_i32_87 = arith.constant 8 : i32
    %172 = arith.muli %171, %c8_i32_87 : i32
    %173 = tpu.assume_multiple %172, 8 : i32
    %174 = arith.index_cast %170 : i32 to index
    %c0_88 = arith.constant 0 : index
    %175 = vector.load %arg8[%174, %c0_88] : memref<64x1024xf32, #tpu.memory_space<vmem>>, vector<8x512xf32>
    %c0_89 = arith.constant 0 : index
    %c0_90 = arith.constant 0 : index
    %176 = vector.load %arg10[%c0_89, %c0_90] : memref<8x128xf32, #tpu.memory_space<vmem>>, vector<8x128xf32>
    %c0_91 = arith.constant 0 : index
    %c0_92 = arith.constant 0 : index
    %177 = vector.load %arg3[%c0_91, %c0_92] : memref<128x512xf32, #tpu.memory_space<vmem>>, vector<128x512xf32>
    %cst_93 = arith.constant dense<0.000000e+00> : vector<8x512xf32>
    %178 = tpu.matmul %176, %177, %cst_93 {dimension_numbers = #tpu.dot_dimension_numbers<[1], [0], [0], [1], [0, 0, 1, 1], [], []>} : vector<8x128xf32>, vector<128x512xf32>, vector<8x512xf32> -> vector<8x512xf32>
    %179 = arith.addf %175, %178 : vector<8x512xf32>
    %180 = arith.index_cast %173 : i32 to index
    %c512_94 = arith.constant 512 : index
    %181 = vector.load %arg8[%180, %c512_94] : memref<64x1024xf32, #tpu.memory_space<vmem>>, vector<8x512xf32>
    %c0_95 = arith.constant 0 : index
    %c0_96 = arith.constant 0 : index
    %182 = vector.load %arg12[%c0_95, %c0_96] : memref<8x128xf32, #tpu.memory_space<vmem>>, vector<8x128xf32>
    %c0_97 = arith.constant 0 : index
    %c0_98 = arith.constant 0 : index
    %183 = vector.load %arg4[%c0_97, %c0_98] : memref<128x512xf32, #tpu.memory_space<vmem>>, vector<128x512xf32>
    %cst_99 = arith.constant dense<0.000000e+00> : vector<8x512xf32>
    %184 = tpu.matmul %182, %183, %cst_99 {dimension_numbers = #tpu.dot_dimension_numbers<[1], [0], [0], [1], [0, 0, 1, 1], [], []>} : vector<8x128xf32>, vector<128x512xf32>, vector<8x512xf32> -> vector<8x512xf32>
    %185 = arith.addf %181, %184 : vector<8x512xf32>
    %c0_100 = arith.constant 0 : index
    %c0_101 = arith.constant 0 : index
    %186 = vector.load %arg11[%c0_100, %c0_101] : memref<8x128xf32, #tpu.memory_space<vmem>>, vector<8x128xf32>
    %187 = vector.extract_strided_slice %179 {offsets = [0, 0], sizes = [8, 128], strides = [1, 1]} : vector<8x512xf32> to vector<8x128xf32>
    %188 = arith.negf %187 : vector<8x128xf32>
    %189 = math.exp %188 : vector<8x128xf32>
    %cst_102 = arith.constant 1.000000e+00 : f32
    %190 = vector.broadcast %cst_102 : f32 to vector<8x128xf32>
    %191 = arith.addf %190, %189 : vector<8x128xf32>
    %192 = arith.divf %190, %191 : vector<8x128xf32>
    %193 = vector.extract_strided_slice %179 {offsets = [0, 128], sizes = [8, 128], strides = [1, 1]} : vector<8x512xf32> to vector<8x128xf32>
    %194 = arith.negf %193 : vector<8x128xf32>
    %195 = math.exp %194 : vector<8x128xf32>
    %cst_103 = arith.constant 1.000000e+00 : f32
    %196 = vector.broadcast %cst_103 : f32 to vector<8x128xf32>
    %197 = arith.addf %196, %195 : vector<8x128xf32>
    %198 = arith.divf %196, %197 : vector<8x128xf32>
    %199 = vector.extract_strided_slice %179 {offsets = [0, 256], sizes = [8, 128], strides = [1, 1]} : vector<8x512xf32> to vector<8x128xf32>
    %200 = math.tanh %199 : vector<8x128xf32>
    %201 = vector.extract_strided_slice %179 {offsets = [0, 384], sizes = [8, 128], strides = [1, 1]} : vector<8x512xf32> to vector<8x128xf32>
    %202 = arith.negf %201 : vector<8x128xf32>
    %203 = math.exp %202 : vector<8x128xf32>
    %cst_104 = arith.constant 1.000000e+00 : f32
    %204 = vector.broadcast %cst_104 : f32 to vector<8x128xf32>
    %205 = arith.addf %204, %203 : vector<8x128xf32>
    %206 = arith.divf %204, %205 : vector<8x128xf32>
    %207 = arith.mulf %198, %186 : vector<8x128xf32>
    %208 = arith.mulf %192, %200 : vector<8x128xf32>
    %209 = arith.addf %207, %208 : vector<8x128xf32>
    %210 = math.tanh %209 : vector<8x128xf32>
    %211 = arith.mulf %206, %210 : vector<8x128xf32>
    %c0_105 = arith.constant 0 : index
    %c0_106 = arith.constant 0 : index
    %212 = vector.load %arg13[%c0_105, %c0_106] : memref<8x128xf32, #tpu.memory_space<vmem>>, vector<8x128xf32>
    %213 = vector.extract_strided_slice %185 {offsets = [0, 0], sizes = [8, 128], strides = [1, 1]} : vector<8x512xf32> to vector<8x128xf32>
    %214 = arith.negf %213 : vector<8x128xf32>
    %215 = math.exp %214 : vector<8x128xf32>
    %cst_107 = arith.constant 1.000000e+00 : f32
    %216 = vector.broadcast %cst_107 : f32 to vector<8x128xf32>
    %217 = arith.addf %216, %215 : vector<8x128xf32>
    %218 = arith.divf %216, %217 : vector<8x128xf32>
    %219 = vector.extract_strided_slice %185 {offsets = [0, 128], sizes = [8, 128], strides = [1, 1]} : vector<8x512xf32> to vector<8x128xf32>
    %220 = arith.negf %219 : vector<8x128xf32>
    %221 = math.exp %220 : vector<8x128xf32>
    %cst_108 = arith.constant 1.000000e+00 : f32
    %222 = vector.broadcast %cst_108 : f32 to vector<8x128xf32>
    %223 = arith.addf %222, %221 : vector<8x128xf32>
    %224 = arith.divf %222, %223 : vector<8x128xf32>
    %225 = vector.extract_strided_slice %185 {offsets = [0, 256], sizes = [8, 128], strides = [1, 1]} : vector<8x512xf32> to vector<8x128xf32>
    %226 = math.tanh %225 : vector<8x128xf32>
    %227 = vector.extract_strided_slice %185 {offsets = [0, 384], sizes = [8, 128], strides = [1, 1]} : vector<8x512xf32> to vector<8x128xf32>
    %228 = arith.negf %227 : vector<8x128xf32>
    %229 = math.exp %228 : vector<8x128xf32>
    %cst_109 = arith.constant 1.000000e+00 : f32
    %230 = vector.broadcast %cst_109 : f32 to vector<8x128xf32>
    %231 = arith.addf %230, %229 : vector<8x128xf32>
    %232 = arith.divf %230, %231 : vector<8x128xf32>
    %233 = arith.mulf %224, %212 : vector<8x128xf32>
    %234 = arith.mulf %218, %226 : vector<8x128xf32>
    %235 = arith.addf %233, %234 : vector<8x128xf32>
    %236 = math.tanh %235 : vector<8x128xf32>
    %237 = arith.mulf %232, %236 : vector<8x128xf32>
    %c0_110 = arith.constant 0 : index
    %c0_111 = arith.constant 0 : index
    %238 = vector.load %arg10[%c0_110, %c0_111] : memref<8x128xf32, #tpu.memory_space<vmem>>, vector<8x128xf32>
    tpu.vector_store %arg10[%c0_110, %c0_111], %211 {strides = array<i32>} : memref<8x128xf32, #tpu.memory_space<vmem>>, vector<8x128xf32>,
    %c0_112 = arith.constant 0 : index
    %c0_113 = arith.constant 0 : index
    %239 = vector.load %arg11[%c0_112, %c0_113] : memref<8x128xf32, #tpu.memory_space<vmem>>, vector<8x128xf32>
    tpu.vector_store %arg11[%c0_112, %c0_113], %209 {strides = array<i32>} : memref<8x128xf32, #tpu.memory_space<vmem>>, vector<8x128xf32>,
    %c0_114 = arith.constant 0 : index
    %c0_115 = arith.constant 0 : index
    %240 = vector.load %arg12[%c0_114, %c0_115] : memref<8x128xf32, #tpu.memory_space<vmem>>, vector<8x128xf32>
    tpu.vector_store %arg12[%c0_114, %c0_115], %237 {strides = array<i32>} : memref<8x128xf32, #tpu.memory_space<vmem>>, vector<8x128xf32>,
    %c0_116 = arith.constant 0 : index
    %c0_117 = arith.constant 0 : index
    %241 = vector.load %arg13[%c0_116, %c0_117] : memref<8x128xf32, #tpu.memory_space<vmem>>, vector<8x128xf32>
    tpu.vector_store %arg13[%c0_116, %c0_117], %235 {strides = array<i32>} : memref<8x128xf32, #tpu.memory_space<vmem>>, vector<8x128xf32>,
    %242 = arith.index_cast %170 : i32 to index
    %c0_118 = arith.constant 0 : index
    %243 = vector.load %arg9[%242, %c0_118] : memref<64x256xf32, #tpu.memory_space<vmem>>, vector<8x128xf32>
    tpu.vector_store %arg9[%242, %c0_118], %211 {strides = array<i32>} : memref<64x256xf32, #tpu.memory_space<vmem>>, vector<8x128xf32>,
    %244 = arith.index_cast %173 : i32 to index
    %c128_119 = arith.constant 128 : index
    %245 = vector.load %arg9[%244, %c128_119] : memref<64x256xf32, #tpu.memory_space<vmem>>, vector<8x128xf32>
    tpu.vector_store %arg9[%244, %c128_119], %237 {strides = array<i32>} : memref<64x256xf32, #tpu.memory_space<vmem>>, vector<8x128xf32>,
    %c3_i32 = arith.constant 3 : i32
    %c8_i32_120 = arith.constant 8 : i32
    %246 = arith.muli %c3_i32, %c8_i32_120 : i32
    %247 = tpu.assume_multiple %246, 8 : i32
    %c7_i32_121 = arith.constant 7 : i32
    %248 = arith.subi %c7_i32_121, %c3_i32 : i32
    %c8_i32_122 = arith.constant 8 : i32
    %249 = arith.muli %248, %c8_i32_122 : i32
    %250 = tpu.assume_multiple %249, 8 : i32
    %251 = arith.index_cast %247 : i32 to index
    %c0_123 = arith.constant 0 : index
    %252 = vector.load %arg8[%251, %c0_123] : memref<64x1024xf32, #tpu.memory_space<vmem>>, vector<8x512xf32>
    %c0_124 = arith.constant 0 : index
    %c0_125 = arith.constant 0 : index
    %253 = vector.load %arg10[%c0_124, %c0_125] : memref<8x128xf32, #tpu.memory_space<vmem>>, vector<8x128xf32>
    %c0_126 = arith.constant 0 : index
    %c0_127 = arith.constant 0 : index
    %254 = vector.load %arg3[%c0_126, %c0_127] : memref<128x512xf32, #tpu.memory_space<vmem>>, vector<128x512xf32>
    %cst_128 = arith.constant dense<0.000000e+00> : vector<8x512xf32>
    %255 = tpu.matmul %253, %254, %cst_128 {dimension_numbers = #tpu.dot_dimension_numbers<[1], [0], [0], [1], [0, 0, 1, 1], [], []>} : vector<8x128xf32>, vector<128x512xf32>, vector<8x512xf32> -> vector<8x512xf32>
    %256 = arith.addf %252, %255 : vector<8x512xf32>
    %257 = arith.index_cast %250 : i32 to index
    %c512_129 = arith.constant 512 : index
    %258 = vector.load %arg8[%257, %c512_129] : memref<64x1024xf32, #tpu.memory_space<vmem>>, vector<8x512xf32>
    %c0_130 = arith.constant 0 : index
    %c0_131 = arith.constant 0 : index
    %259 = vector.load %arg12[%c0_130, %c0_131] : memref<8x128xf32, #tpu.memory_space<vmem>>, vector<8x128xf32>
    %c0_132 = arith.constant 0 : index
    %c0_133 = arith.constant 0 : index
    %260 = vector.load %arg4[%c0_132, %c0_133] : memref<128x512xf32, #tpu.memory_space<vmem>>, vector<128x512xf32>
    %cst_134 = arith.constant dense<0.000000e+00> : vector<8x512xf32>
    %261 = tpu.matmul %259, %260, %cst_134 {dimension_numbers = #tpu.dot_dimension_numbers<[1], [0], [0], [1], [0, 0, 1, 1], [], []>} : vector<8x128xf32>, vector<128x512xf32>, vector<8x512xf32> -> vector<8x512xf32>
    %262 = arith.addf %258, %261 : vector<8x512xf32>
    %c0_135 = arith.constant 0 : index
    %c0_136 = arith.constant 0 : index
    %263 = vector.load %arg11[%c0_135, %c0_136] : memref<8x128xf32, #tpu.memory_space<vmem>>, vector<8x128xf32>
    %264 = vector.extract_strided_slice %256 {offsets = [0, 0], sizes = [8, 128], strides = [1, 1]} : vector<8x512xf32> to vector<8x128xf32>
    %265 = arith.negf %264 : vector<8x128xf32>
    %266 = math.exp %265 : vector<8x128xf32>
    %cst_137 = arith.constant 1.000000e+00 : f32
    %267 = vector.broadcast %cst_137 : f32 to vector<8x128xf32>
    %268 = arith.addf %267, %266 : vector<8x128xf32>
    %269 = arith.divf %267, %268 : vector<8x128xf32>
    %270 = vector.extract_strided_slice %256 {offsets = [0, 128], sizes = [8, 128], strides = [1, 1]} : vector<8x512xf32> to vector<8x128xf32>
    %271 = arith.negf %270 : vector<8x128xf32>
    %272 = math.exp %271 : vector<8x128xf32>
    %cst_138 = arith.constant 1.000000e+00 : f32
    %273 = vector.broadcast %cst_138 : f32 to vector<8x128xf32>
    %274 = arith.addf %273, %272 : vector<8x128xf32>
    %275 = arith.divf %273, %274 : vector<8x128xf32>
    %276 = vector.extract_strided_slice %256 {offsets = [0, 256], sizes = [8, 128], strides = [1, 1]} : vector<8x512xf32> to vector<8x128xf32>
    %277 = math.tanh %276 : vector<8x128xf32>
    %278 = vector.extract_strided_slice %256 {offsets = [0, 384], sizes = [8, 128], strides = [1, 1]} : vector<8x512xf32> to vector<8x128xf32>
    %279 = arith.negf %278 : vector<8x128xf32>
    %280 = math.exp %279 : vector<8x128xf32>
    %cst_139 = arith.constant 1.000000e+00 : f32
    %281 = vector.broadcast %cst_139 : f32 to vector<8x128xf32>
    %282 = arith.addf %281, %280 : vector<8x128xf32>
    %283 = arith.divf %281, %282 : vector<8x128xf32>
    %284 = arith.mulf %275, %263 : vector<8x128xf32>
    %285 = arith.mulf %269, %277 : vector<8x128xf32>
    %286 = arith.addf %284, %285 : vector<8x128xf32>
    %287 = math.tanh %286 : vector<8x128xf32>
    %288 = arith.mulf %283, %287 : vector<8x128xf32>
    %c0_140 = arith.constant 0 : index
    %c0_141 = arith.constant 0 : index
    %289 = vector.load %arg13[%c0_140, %c0_141] : memref<8x128xf32, #tpu.memory_space<vmem>>, vector<8x128xf32>
    %290 = vector.extract_strided_slice %262 {offsets = [0, 0], sizes = [8, 128], strides = [1, 1]} : vector<8x512xf32> to vector<8x128xf32>
    %291 = arith.negf %290 : vector<8x128xf32>
    %292 = math.exp %291 : vector<8x128xf32>
    %cst_142 = arith.constant 1.000000e+00 : f32
    %293 = vector.broadcast %cst_142 : f32 to vector<8x128xf32>
    %294 = arith.addf %293, %292 : vector<8x128xf32>
    %295 = arith.divf %293, %294 : vector<8x128xf32>
    %296 = vector.extract_strided_slice %262 {offsets = [0, 128], sizes = [8, 128], strides = [1, 1]} : vector<8x512xf32> to vector<8x128xf32>
    %297 = arith.negf %296 : vector<8x128xf32>
    %298 = math.exp %297 : vector<8x128xf32>
    %cst_143 = arith.constant 1.000000e+00 : f32
    %299 = vector.broadcast %cst_143 : f32 to vector<8x128xf32>
    %300 = arith.addf %299, %298 : vector<8x128xf32>
    %301 = arith.divf %299, %300 : vector<8x128xf32>
    %302 = vector.extract_strided_slice %262 {offsets = [0, 256], sizes = [8, 128], strides = [1, 1]} : vector<8x512xf32> to vector<8x128xf32>
    %303 = math.tanh %302 : vector<8x128xf32>
    %304 = vector.extract_strided_slice %262 {offsets = [0, 384], sizes = [8, 128], strides = [1, 1]} : vector<8x512xf32> to vector<8x128xf32>
    %305 = arith.negf %304 : vector<8x128xf32>
    %306 = math.exp %305 : vector<8x128xf32>
    %cst_144 = arith.constant 1.000000e+00 : f32
    %307 = vector.broadcast %cst_144 : f32 to vector<8x128xf32>
    %308 = arith.addf %307, %306 : vector<8x128xf32>
    %309 = arith.divf %307, %308 : vector<8x128xf32>
    %310 = arith.mulf %301, %289 : vector<8x128xf32>
    %311 = arith.mulf %295, %303 : vector<8x128xf32>
    %312 = arith.addf %310, %311 : vector<8x128xf32>
    %313 = math.tanh %312 : vector<8x128xf32>
    %314 = arith.mulf %309, %313 : vector<8x128xf32>
    %c0_145 = arith.constant 0 : index
    %c0_146 = arith.constant 0 : index
    %315 = vector.load %arg10[%c0_145, %c0_146] : memref<8x128xf32, #tpu.memory_space<vmem>>, vector<8x128xf32>
    tpu.vector_store %arg10[%c0_145, %c0_146], %288 {strides = array<i32>} : memref<8x128xf32, #tpu.memory_space<vmem>>, vector<8x128xf32>,
    %c0_147 = arith.constant 0 : index
    %c0_148 = arith.constant 0 : index
    %316 = vector.load %arg11[%c0_147, %c0_148] : memref<8x128xf32, #tpu.memory_space<vmem>>, vector<8x128xf32>
    tpu.vector_store %arg11[%c0_147, %c0_148], %286 {strides = array<i32>} : memref<8x128xf32, #tpu.memory_space<vmem>>, vector<8x128xf32>,
    %c0_149 = arith.constant 0 : index
    %c0_150 = arith.constant 0 : index
    %317 = vector.load %arg12[%c0_149, %c0_150] : memref<8x128xf32, #tpu.memory_space<vmem>>, vector<8x128xf32>
    tpu.vector_store %arg12[%c0_149, %c0_150], %314 {strides = array<i32>} : memref<8x128xf32, #tpu.memory_space<vmem>>, vector<8x128xf32>,
    %c0_151 = arith.constant 0 : index
    %c0_152 = arith.constant 0 : index
    %318 = vector.load %arg13[%c0_151, %c0_152] : memref<8x128xf32, #tpu.memory_space<vmem>>, vector<8x128xf32>
    tpu.vector_store %arg13[%c0_151, %c0_152], %312 {strides = array<i32>} : memref<8x128xf32, #tpu.memory_space<vmem>>, vector<8x128xf32>,
    %319 = arith.index_cast %247 : i32 to index
    %c0_153 = arith.constant 0 : index
    %320 = vector.load %arg9[%319, %c0_153] : memref<64x256xf32, #tpu.memory_space<vmem>>, vector<8x128xf32>
    tpu.vector_store %arg9[%319, %c0_153], %288 {strides = array<i32>} : memref<64x256xf32, #tpu.memory_space<vmem>>, vector<8x128xf32>,
    %321 = arith.index_cast %250 : i32 to index
    %c128_154 = arith.constant 128 : index
    %322 = vector.load %arg9[%321, %c128_154] : memref<64x256xf32, #tpu.memory_space<vmem>>, vector<8x128xf32>
    tpu.vector_store %arg9[%321, %c128_154], %314 {strides = array<i32>} : memref<64x256xf32, #tpu.memory_space<vmem>>, vector<8x128xf32>,
    %c4_i32 = arith.constant 4 : i32
    %c8_i32_155 = arith.constant 8 : i32
    %323 = arith.muli %c4_i32, %c8_i32_155 : i32
    %324 = tpu.assume_multiple %323, 8 : i32
    %c7_i32_156 = arith.constant 7 : i32
    %325 = arith.subi %c7_i32_156, %c4_i32 : i32
    %c8_i32_157 = arith.constant 8 : i32
    %326 = arith.muli %325, %c8_i32_157 : i32
    %327 = tpu.assume_multiple %326, 8 : i32
    %328 = arith.index_cast %324 : i32 to index
    %c0_158 = arith.constant 0 : index
    %329 = vector.load %arg8[%328, %c0_158] : memref<64x1024xf32, #tpu.memory_space<vmem>>, vector<8x512xf32>
    %c0_159 = arith.constant 0 : index
    %c0_160 = arith.constant 0 : index
    %330 = vector.load %arg10[%c0_159, %c0_160] : memref<8x128xf32, #tpu.memory_space<vmem>>, vector<8x128xf32>
    %c0_161 = arith.constant 0 : index
    %c0_162 = arith.constant 0 : index
    %331 = vector.load %arg3[%c0_161, %c0_162] : memref<128x512xf32, #tpu.memory_space<vmem>>, vector<128x512xf32>
    %cst_163 = arith.constant dense<0.000000e+00> : vector<8x512xf32>
    %332 = tpu.matmul %330, %331, %cst_163 {dimension_numbers = #tpu.dot_dimension_numbers<[1], [0], [0], [1], [0, 0, 1, 1], [], []>} : vector<8x128xf32>, vector<128x512xf32>, vector<8x512xf32> -> vector<8x512xf32>
    %333 = arith.addf %329, %332 : vector<8x512xf32>
    %334 = arith.index_cast %327 : i32 to index
    %c512_164 = arith.constant 512 : index
    %335 = vector.load %arg8[%334, %c512_164] : memref<64x1024xf32, #tpu.memory_space<vmem>>, vector<8x512xf32>
    %c0_165 = arith.constant 0 : index
    %c0_166 = arith.constant 0 : index
    %336 = vector.load %arg12[%c0_165, %c0_166] : memref<8x128xf32, #tpu.memory_space<vmem>>, vector<8x128xf32>
    %c0_167 = arith.constant 0 : index
    %c0_168 = arith.constant 0 : index
    %337 = vector.load %arg4[%c0_167, %c0_168] : memref<128x512xf32, #tpu.memory_space<vmem>>, vector<128x512xf32>
    %cst_169 = arith.constant dense<0.000000e+00> : vector<8x512xf32>
    %338 = tpu.matmul %336, %337, %cst_169 {dimension_numbers = #tpu.dot_dimension_numbers<[1], [0], [0], [1], [0, 0, 1, 1], [], []>} : vector<8x128xf32>, vector<128x512xf32>, vector<8x512xf32> -> vector<8x512xf32>
    %339 = arith.addf %335, %338 : vector<8x512xf32>
    %c0_170 = arith.constant 0 : index
    %c0_171 = arith.constant 0 : index
    %340 = vector.load %arg11[%c0_170, %c0_171] : memref<8x128xf32, #tpu.memory_space<vmem>>, vector<8x128xf32>
    %341 = vector.extract_strided_slice %333 {offsets = [0, 0], sizes = [8, 128], strides = [1, 1]} : vector<8x512xf32> to vector<8x128xf32>
    %342 = arith.negf %341 : vector<8x128xf32>
    %343 = math.exp %342 : vector<8x128xf32>
    %cst_172 = arith.constant 1.000000e+00 : f32
    %344 = vector.broadcast %cst_172 : f32 to vector<8x128xf32>
    %345 = arith.addf %344, %343 : vector<8x128xf32>
    %346 = arith.divf %344, %345 : vector<8x128xf32>
    %347 = vector.extract_strided_slice %333 {offsets = [0, 128], sizes = [8, 128], strides = [1, 1]} : vector<8x512xf32> to vector<8x128xf32>
    %348 = arith.negf %347 : vector<8x128xf32>
    %349 = math.exp %348 : vector<8x128xf32>
    %cst_173 = arith.constant 1.000000e+00 : f32
    %350 = vector.broadcast %cst_173 : f32 to vector<8x128xf32>
    %351 = arith.addf %350, %349 : vector<8x128xf32>
    %352 = arith.divf %350, %351 : vector<8x128xf32>
    %353 = vector.extract_strided_slice %333 {offsets = [0, 256], sizes = [8, 128], strides = [1, 1]} : vector<8x512xf32> to vector<8x128xf32>
    %354 = math.tanh %353 : vector<8x128xf32>
    %355 = vector.extract_strided_slice %333 {offsets = [0, 384], sizes = [8, 128], strides = [1, 1]} : vector<8x512xf32> to vector<8x128xf32>
    %356 = arith.negf %355 : vector<8x128xf32>
    %357 = math.exp %356 : vector<8x128xf32>
    %cst_174 = arith.constant 1.000000e+00 : f32
    %358 = vector.broadcast %cst_174 : f32 to vector<8x128xf32>
    %359 = arith.addf %358, %357 : vector<8x128xf32>
    %360 = arith.divf %358, %359 : vector<8x128xf32>
    %361 = arith.mulf %352, %340 : vector<8x128xf32>
    %362 = arith.mulf %346, %354 : vector<8x128xf32>
    %363 = arith.addf %361, %362 : vector<8x128xf32>
    %364 = math.tanh %363 : vector<8x128xf32>
    %365 = arith.mulf %360, %364 : vector<8x128xf32>
    %c0_175 = arith.constant 0 : index
    %c0_176 = arith.constant 0 : index
    %366 = vector.load %arg13[%c0_175, %c0_176] : memref<8x128xf32, #tpu.memory_space<vmem>>, vector<8x128xf32>
    %367 = vector.extract_strided_slice %339 {offsets = [0, 0], sizes = [8, 128], strides = [1, 1]} : vector<8x512xf32> to vector<8x128xf32>
    %368 = arith.negf %367 : vector<8x128xf32>
    %369 = math.exp %368 : vector<8x128xf32>
    %cst_177 = arith.constant 1.000000e+00 : f32
    %370 = vector.broadcast %cst_177 : f32 to vector<8x128xf32>
    %371 = arith.addf %370, %369 : vector<8x128xf32>
    %372 = arith.divf %370, %371 : vector<8x128xf32>
    %373 = vector.extract_strided_slice %339 {offsets = [0, 128], sizes = [8, 128], strides = [1, 1]} : vector<8x512xf32> to vector<8x128xf32>
    %374 = arith.negf %373 : vector<8x128xf32>
    %375 = math.exp %374 : vector<8x128xf32>
    %cst_178 = arith.constant 1.000000e+00 : f32
    %376 = vector.broadcast %cst_178 : f32 to vector<8x128xf32>
    %377 = arith.addf %376, %375 : vector<8x128xf32>
    %378 = arith.divf %376, %377 : vector<8x128xf32>
    %379 = vector.extract_strided_slice %339 {offsets = [0, 256], sizes = [8, 128], strides = [1, 1]} : vector<8x512xf32> to vector<8x128xf32>
    %380 = math.tanh %379 : vector<8x128xf32>
    %381 = vector.extract_strided_slice %339 {offsets = [0, 384], sizes = [8, 128], strides = [1, 1]} : vector<8x512xf32> to vector<8x128xf32>
    %382 = arith.negf %381 : vector<8x128xf32>
    %383 = math.exp %382 : vector<8x128xf32>
    %cst_179 = arith.constant 1.000000e+00 : f32
    %384 = vector.broadcast %cst_179 : f32 to vector<8x128xf32>
    %385 = arith.addf %384, %383 : vector<8x128xf32>
    %386 = arith.divf %384, %385 : vector<8x128xf32>
    %387 = arith.mulf %378, %366 : vector<8x128xf32>
    %388 = arith.mulf %372, %380 : vector<8x128xf32>
    %389 = arith.addf %387, %388 : vector<8x128xf32>
    %390 = math.tanh %389 : vector<8x128xf32>
    %391 = arith.mulf %386, %390 : vector<8x128xf32>
    %c0_180 = arith.constant 0 : index
    %c0_181 = arith.constant 0 : index
    %392 = vector.load %arg10[%c0_180, %c0_181] : memref<8x128xf32, #tpu.memory_space<vmem>>, vector<8x128xf32>
    tpu.vector_store %arg10[%c0_180, %c0_181], %365 {strides = array<i32>} : memref<8x128xf32, #tpu.memory_space<vmem>>, vector<8x128xf32>,
    %c0_182 = arith.constant 0 : index
    %c0_183 = arith.constant 0 : index
    %393 = vector.load %arg11[%c0_182, %c0_183] : memref<8x128xf32, #tpu.memory_space<vmem>>, vector<8x128xf32>
    tpu.vector_store %arg11[%c0_182, %c0_183], %363 {strides = array<i32>} : memref<8x128xf32, #tpu.memory_space<vmem>>, vector<8x128xf32>,
    %c0_184 = arith.constant 0 : index
    %c0_185 = arith.constant 0 : index
    %394 = vector.load %arg12[%c0_184, %c0_185] : memref<8x128xf32, #tpu.memory_space<vmem>>, vector<8x128xf32>
    tpu.vector_store %arg12[%c0_184, %c0_185], %391 {strides = array<i32>} : memref<8x128xf32, #tpu.memory_space<vmem>>, vector<8x128xf32>,
    %c0_186 = arith.constant 0 : index
    %c0_187 = arith.constant 0 : index
    %395 = vector.load %arg13[%c0_186, %c0_187] : memref<8x128xf32, #tpu.memory_space<vmem>>, vector<8x128xf32>
    tpu.vector_store %arg13[%c0_186, %c0_187], %389 {strides = array<i32>} : memref<8x128xf32, #tpu.memory_space<vmem>>, vector<8x128xf32>,
    %396 = arith.index_cast %324 : i32 to index
    %c0_188 = arith.constant 0 : index
    %397 = vector.load %arg9[%396, %c0_188] : memref<64x256xf32, #tpu.memory_space<vmem>>, vector<8x128xf32>
    tpu.vector_store %arg9[%396, %c0_188], %365 {strides = array<i32>} : memref<64x256xf32, #tpu.memory_space<vmem>>, vector<8x128xf32>,
    %398 = arith.index_cast %327 : i32 to index
    %c128_189 = arith.constant 128 : index
    %399 = vector.load %arg9[%398, %c128_189] : memref<64x256xf32, #tpu.memory_space<vmem>>, vector<8x128xf32>
    tpu.vector_store %arg9[%398, %c128_189], %391 {strides = array<i32>} : memref<64x256xf32, #tpu.memory_space<vmem>>, vector<8x128xf32>,
    %c5_i32 = arith.constant 5 : i32
    %c8_i32_190 = arith.constant 8 : i32
    %400 = arith.muli %c5_i32, %c8_i32_190 : i32
    %401 = tpu.assume_multiple %400, 8 : i32
    %c7_i32_191 = arith.constant 7 : i32
    %402 = arith.subi %c7_i32_191, %c5_i32 : i32
    %c8_i32_192 = arith.constant 8 : i32
    %403 = arith.muli %402, %c8_i32_192 : i32
    %404 = tpu.assume_multiple %403, 8 : i32
    %405 = arith.index_cast %401 : i32 to index
    %c0_193 = arith.constant 0 : index
    %406 = vector.load %arg8[%405, %c0_193] : memref<64x1024xf32, #tpu.memory_space<vmem>>, vector<8x512xf32>
    %c0_194 = arith.constant 0 : index
    %c0_195 = arith.constant 0 : index
    %407 = vector.load %arg10[%c0_194, %c0_195] : memref<8x128xf32, #tpu.memory_space<vmem>>, vector<8x128xf32>
    %c0_196 = arith.constant 0 : index
    %c0_197 = arith.constant 0 : index
    %408 = vector.load %arg3[%c0_196, %c0_197] : memref<128x512xf32, #tpu.memory_space<vmem>>, vector<128x512xf32>
    %cst_198 = arith.constant dense<0.000000e+00> : vector<8x512xf32>
    %409 = tpu.matmul %407, %408, %cst_198 {dimension_numbers = #tpu.dot_dimension_numbers<[1], [0], [0], [1], [0, 0, 1, 1], [], []>} : vector<8x128xf32>, vector<128x512xf32>, vector<8x512xf32> -> vector<8x512xf32>
    %410 = arith.addf %406, %409 : vector<8x512xf32>
    %411 = arith.index_cast %404 : i32 to index
    %c512_199 = arith.constant 512 : index
    %412 = vector.load %arg8[%411, %c512_199] : memref<64x1024xf32, #tpu.memory_space<vmem>>, vector<8x512xf32>
    %c0_200 = arith.constant 0 : index
    %c0_201 = arith.constant 0 : index
    %413 = vector.load %arg12[%c0_200, %c0_201] : memref<8x128xf32, #tpu.memory_space<vmem>>, vector<8x128xf32>
    %c0_202 = arith.constant 0 : index
    %c0_203 = arith.constant 0 : index
    %414 = vector.load %arg4[%c0_202, %c0_203] : memref<128x512xf32, #tpu.memory_space<vmem>>, vector<128x512xf32>
    %cst_204 = arith.constant dense<0.000000e+00> : vector<8x512xf32>
    %415 = tpu.matmul %413, %414, %cst_204 {dimension_numbers = #tpu.dot_dimension_numbers<[1], [0], [0], [1], [0, 0, 1, 1], [], []>} : vector<8x128xf32>, vector<128x512xf32>, vector<8x512xf32> -> vector<8x512xf32>
    %416 = arith.addf %412, %415 : vector<8x512xf32>
    %c0_205 = arith.constant 0 : index
    %c0_206 = arith.constant 0 : index
    %417 = vector.load %arg11[%c0_205, %c0_206] : memref<8x128xf32, #tpu.memory_space<vmem>>, vector<8x128xf32>
    %418 = vector.extract_strided_slice %410 {offsets = [0, 0], sizes = [8, 128], strides = [1, 1]} : vector<8x512xf32> to vector<8x128xf32>
    %419 = arith.negf %418 : vector<8x128xf32>
    %420 = math.exp %419 : vector<8x128xf32>
    %cst_207 = arith.constant 1.000000e+00 : f32
    %421 = vector.broadcast %cst_207 : f32 to vector<8x128xf32>
    %422 = arith.addf %421, %420 : vector<8x128xf32>
    %423 = arith.divf %421, %422 : vector<8x128xf32>
    %424 = vector.extract_strided_slice %410 {offsets = [0, 128], sizes = [8, 128], strides = [1, 1]} : vector<8x512xf32> to vector<8x128xf32>
    %425 = arith.negf %424 : vector<8x128xf32>
    %426 = math.exp %425 : vector<8x128xf32>
    %cst_208 = arith.constant 1.000000e+00 : f32
    %427 = vector.broadcast %cst_208 : f32 to vector<8x128xf32>
    %428 = arith.addf %427, %426 : vector<8x128xf32>
    %429 = arith.divf %427, %428 : vector<8x128xf32>
    %430 = vector.extract_strided_slice %410 {offsets = [0, 256], sizes = [8, 128], strides = [1, 1]} : vector<8x512xf32> to vector<8x128xf32>
    %431 = math.tanh %430 : vector<8x128xf32>
    %432 = vector.extract_strided_slice %410 {offsets = [0, 384], sizes = [8, 128], strides = [1, 1]} : vector<8x512xf32> to vector<8x128xf32>
    %433 = arith.negf %432 : vector<8x128xf32>
    %434 = math.exp %433 : vector<8x128xf32>
    %cst_209 = arith.constant 1.000000e+00 : f32
    %435 = vector.broadcast %cst_209 : f32 to vector<8x128xf32>
    %436 = arith.addf %435, %434 : vector<8x128xf32>
    %437 = arith.divf %435, %436 : vector<8x128xf32>
    %438 = arith.mulf %429, %417 : vector<8x128xf32>
    %439 = arith.mulf %423, %431 : vector<8x128xf32>
    %440 = arith.addf %438, %439 : vector<8x128xf32>
    %441 = math.tanh %440 : vector<8x128xf32>
    %442 = arith.mulf %437, %441 : vector<8x128xf32>
    %c0_210 = arith.constant 0 : index
    %c0_211 = arith.constant 0 : index
    %443 = vector.load %arg13[%c0_210, %c0_211] : memref<8x128xf32, #tpu.memory_space<vmem>>, vector<8x128xf32>
    %444 = vector.extract_strided_slice %416 {offsets = [0, 0], sizes = [8, 128], strides = [1, 1]} : vector<8x512xf32> to vector<8x128xf32>
    %445 = arith.negf %444 : vector<8x128xf32>
    %446 = math.exp %445 : vector<8x128xf32>
    %cst_212 = arith.constant 1.000000e+00 : f32
    %447 = vector.broadcast %cst_212 : f32 to vector<8x128xf32>
    %448 = arith.addf %447, %446 : vector<8x128xf32>
    %449 = arith.divf %447, %448 : vector<8x128xf32>
    %450 = vector.extract_strided_slice %416 {offsets = [0, 128], sizes = [8, 128], strides = [1, 1]} : vector<8x512xf32> to vector<8x128xf32>
    %451 = arith.negf %450 : vector<8x128xf32>
    %452 = math.exp %451 : vector<8x128xf32>
    %cst_213 = arith.constant 1.000000e+00 : f32
    %453 = vector.broadcast %cst_213 : f32 to vector<8x128xf32>
    %454 = arith.addf %453, %452 : vector<8x128xf32>
    %455 = arith.divf %453, %454 : vector<8x128xf32>
    %456 = vector.extract_strided_slice %416 {offsets = [0, 256], sizes = [8, 128], strides = [1, 1]} : vector<8x512xf32> to vector<8x128xf32>
    %457 = math.tanh %456 : vector<8x128xf32>
    %458 = vector.extract_strided_slice %416 {offsets = [0, 384], sizes = [8, 128], strides = [1, 1]} : vector<8x512xf32> to vector<8x128xf32>
    %459 = arith.negf %458 : vector<8x128xf32>
    %460 = math.exp %459 : vector<8x128xf32>
    %cst_214 = arith.constant 1.000000e+00 : f32
    %461 = vector.broadcast %cst_214 : f32 to vector<8x128xf32>
    %462 = arith.addf %461, %460 : vector<8x128xf32>
    %463 = arith.divf %461, %462 : vector<8x128xf32>
    %464 = arith.mulf %455, %443 : vector<8x128xf32>
    %465 = arith.mulf %449, %457 : vector<8x128xf32>
    %466 = arith.addf %464, %465 : vector<8x128xf32>
    %467 = math.tanh %466 : vector<8x128xf32>
    %468 = arith.mulf %463, %467 : vector<8x128xf32>
    %c0_215 = arith.constant 0 : index
    %c0_216 = arith.constant 0 : index
    %469 = vector.load %arg10[%c0_215, %c0_216] : memref<8x128xf32, #tpu.memory_space<vmem>>, vector<8x128xf32>
    tpu.vector_store %arg10[%c0_215, %c0_216], %442 {strides = array<i32>} : memref<8x128xf32, #tpu.memory_space<vmem>>, vector<8x128xf32>,
    %c0_217 = arith.constant 0 : index
    %c0_218 = arith.constant 0 : index
    %470 = vector.load %arg11[%c0_217, %c0_218] : memref<8x128xf32, #tpu.memory_space<vmem>>, vector<8x128xf32>
    tpu.vector_store %arg11[%c0_217, %c0_218], %440 {strides = array<i32>} : memref<8x128xf32, #tpu.memory_space<vmem>>, vector<8x128xf32>,
    %c0_219 = arith.constant 0 : index
    %c0_220 = arith.constant 0 : index
    %471 = vector.load %arg12[%c0_219, %c0_220] : memref<8x128xf32, #tpu.memory_space<vmem>>, vector<8x128xf32>
    tpu.vector_store %arg12[%c0_219, %c0_220], %468 {strides = array<i32>} : memref<8x128xf32, #tpu.memory_space<vmem>>, vector<8x128xf32>,
    %c0_221 = arith.constant 0 : index
    %c0_222 = arith.constant 0 : index
    %472 = vector.load %arg13[%c0_221, %c0_222] : memref<8x128xf32, #tpu.memory_space<vmem>>, vector<8x128xf32>
    tpu.vector_store %arg13[%c0_221, %c0_222], %466 {strides = array<i32>} : memref<8x128xf32, #tpu.memory_space<vmem>>, vector<8x128xf32>,
    %473 = arith.index_cast %401 : i32 to index
    %c0_223 = arith.constant 0 : index
    %474 = vector.load %arg9[%473, %c0_223] : memref<64x256xf32, #tpu.memory_space<vmem>>, vector<8x128xf32>
    tpu.vector_store %arg9[%473, %c0_223], %442 {strides = array<i32>} : memref<64x256xf32, #tpu.memory_space<vmem>>, vector<8x128xf32>,
    %475 = arith.index_cast %404 : i32 to index
    %c128_224 = arith.constant 128 : index
    %476 = vector.load %arg9[%475, %c128_224] : memref<64x256xf32, #tpu.memory_space<vmem>>, vector<8x128xf32>
    tpu.vector_store %arg9[%475, %c128_224], %468 {strides = array<i32>} : memref<64x256xf32, #tpu.memory_space<vmem>>, vector<8x128xf32>,
    %c6_i32 = arith.constant 6 : i32
    %c8_i32_225 = arith.constant 8 : i32
    %477 = arith.muli %c6_i32, %c8_i32_225 : i32
    %478 = tpu.assume_multiple %477, 8 : i32
    %c7_i32_226 = arith.constant 7 : i32
    %479 = arith.subi %c7_i32_226, %c6_i32 : i32
    %c8_i32_227 = arith.constant 8 : i32
    %480 = arith.muli %479, %c8_i32_227 : i32
    %481 = tpu.assume_multiple %480, 8 : i32
    %482 = arith.index_cast %478 : i32 to index
    %c0_228 = arith.constant 0 : index
    %483 = vector.load %arg8[%482, %c0_228] : memref<64x1024xf32, #tpu.memory_space<vmem>>, vector<8x512xf32>
    %c0_229 = arith.constant 0 : index
    %c0_230 = arith.constant 0 : index
    %484 = vector.load %arg10[%c0_229, %c0_230] : memref<8x128xf32, #tpu.memory_space<vmem>>, vector<8x128xf32>
    %c0_231 = arith.constant 0 : index
    %c0_232 = arith.constant 0 : index
    %485 = vector.load %arg3[%c0_231, %c0_232] : memref<128x512xf32, #tpu.memory_space<vmem>>, vector<128x512xf32>
    %cst_233 = arith.constant dense<0.000000e+00> : vector<8x512xf32>
    %486 = tpu.matmul %484, %485, %cst_233 {dimension_numbers = #tpu.dot_dimension_numbers<[1], [0], [0], [1], [0, 0, 1, 1], [], []>} : vector<8x128xf32>, vector<128x512xf32>, vector<8x512xf32> -> vector<8x512xf32>
    %487 = arith.addf %483, %486 : vector<8x512xf32>
    %488 = arith.index_cast %481 : i32 to index
    %c512_234 = arith.constant 512 : index
    %489 = vector.load %arg8[%488, %c512_234] : memref<64x1024xf32, #tpu.memory_space<vmem>>, vector<8x512xf32>
    %c0_235 = arith.constant 0 : index
    %c0_236 = arith.constant 0 : index
    %490 = vector.load %arg12[%c0_235, %c0_236] : memref<8x128xf32, #tpu.memory_space<vmem>>, vector<8x128xf32>
    %c0_237 = arith.constant 0 : index
    %c0_238 = arith.constant 0 : index
    %491 = vector.load %arg4[%c0_237, %c0_238] : memref<128x512xf32, #tpu.memory_space<vmem>>, vector<128x512xf32>
    %cst_239 = arith.constant dense<0.000000e+00> : vector<8x512xf32>
    %492 = tpu.matmul %490, %491, %cst_239 {dimension_numbers = #tpu.dot_dimension_numbers<[1], [0], [0], [1], [0, 0, 1, 1], [], []>} : vector<8x128xf32>, vector<128x512xf32>, vector<8x512xf32> -> vector<8x512xf32>
    %493 = arith.addf %489, %492 : vector<8x512xf32>
    %c0_240 = arith.constant 0 : index
    %c0_241 = arith.constant 0 : index
    %494 = vector.load %arg11[%c0_240, %c0_241] : memref<8x128xf32, #tpu.memory_space<vmem>>, vector<8x128xf32>
    %495 = vector.extract_strided_slice %487 {offsets = [0, 0], sizes = [8, 128], strides = [1, 1]} : vector<8x512xf32> to vector<8x128xf32>
    %496 = arith.negf %495 : vector<8x128xf32>
    %497 = math.exp %496 : vector<8x128xf32>
    %cst_242 = arith.constant 1.000000e+00 : f32
    %498 = vector.broadcast %cst_242 : f32 to vector<8x128xf32>
    %499 = arith.addf %498, %497 : vector<8x128xf32>
    %500 = arith.divf %498, %499 : vector<8x128xf32>
    %501 = vector.extract_strided_slice %487 {offsets = [0, 128], sizes = [8, 128], strides = [1, 1]} : vector<8x512xf32> to vector<8x128xf32>
    %502 = arith.negf %501 : vector<8x128xf32>
    %503 = math.exp %502 : vector<8x128xf32>
    %cst_243 = arith.constant 1.000000e+00 : f32
    %504 = vector.broadcast %cst_243 : f32 to vector<8x128xf32>
    %505 = arith.addf %504, %503 : vector<8x128xf32>
    %506 = arith.divf %504, %505 : vector<8x128xf32>
    %507 = vector.extract_strided_slice %487 {offsets = [0, 256], sizes = [8, 128], strides = [1, 1]} : vector<8x512xf32> to vector<8x128xf32>
    %508 = math.tanh %507 : vector<8x128xf32>
    %509 = vector.extract_strided_slice %487 {offsets = [0, 384], sizes = [8, 128], strides = [1, 1]} : vector<8x512xf32> to vector<8x128xf32>
    %510 = arith.negf %509 : vector<8x128xf32>
    %511 = math.exp %510 : vector<8x128xf32>
    %cst_244 = arith.constant 1.000000e+00 : f32
    %512 = vector.broadcast %cst_244 : f32 to vector<8x128xf32>
    %513 = arith.addf %512, %511 : vector<8x128xf32>
    %514 = arith.divf %512, %513 : vector<8x128xf32>
    %515 = arith.mulf %506, %494 : vector<8x128xf32>
    %516 = arith.mulf %500, %508 : vector<8x128xf32>
    %517 = arith.addf %515, %516 : vector<8x128xf32>
    %518 = math.tanh %517 : vector<8x128xf32>
    %519 = arith.mulf %514, %518 : vector<8x128xf32>
    %c0_245 = arith.constant 0 : index
    %c0_246 = arith.constant 0 : index
    %520 = vector.load %arg13[%c0_245, %c0_246] : memref<8x128xf32, #tpu.memory_space<vmem>>, vector<8x128xf32>
    %521 = vector.extract_strided_slice %493 {offsets = [0, 0], sizes = [8, 128], strides = [1, 1]} : vector<8x512xf32> to vector<8x128xf32>
    %522 = arith.negf %521 : vector<8x128xf32>
    %523 = math.exp %522 : vector<8x128xf32>
    %cst_247 = arith.constant 1.000000e+00 : f32
    %524 = vector.broadcast %cst_247 : f32 to vector<8x128xf32>
    %525 = arith.addf %524, %523 : vector<8x128xf32>
    %526 = arith.divf %524, %525 : vector<8x128xf32>
    %527 = vector.extract_strided_slice %493 {offsets = [0, 128], sizes = [8, 128], strides = [1, 1]} : vector<8x512xf32> to vector<8x128xf32>
    %528 = arith.negf %527 : vector<8x128xf32>
    %529 = math.exp %528 : vector<8x128xf32>
    %cst_248 = arith.constant 1.000000e+00 : f32
    %530 = vector.broadcast %cst_248 : f32 to vector<8x128xf32>
    %531 = arith.addf %530, %529 : vector<8x128xf32>
    %532 = arith.divf %530, %531 : vector<8x128xf32>
    %533 = vector.extract_strided_slice %493 {offsets = [0, 256], sizes = [8, 128], strides = [1, 1]} : vector<8x512xf32> to vector<8x128xf32>
    %534 = math.tanh %533 : vector<8x128xf32>
    %535 = vector.extract_strided_slice %493 {offsets = [0, 384], sizes = [8, 128], strides = [1, 1]} : vector<8x512xf32> to vector<8x128xf32>
    %536 = arith.negf %535 : vector<8x128xf32>
    %537 = math.exp %536 : vector<8x128xf32>
    %cst_249 = arith.constant 1.000000e+00 : f32
    %538 = vector.broadcast %cst_249 : f32 to vector<8x128xf32>
    %539 = arith.addf %538, %537 : vector<8x128xf32>
    %540 = arith.divf %538, %539 : vector<8x128xf32>
    %541 = arith.mulf %532, %520 : vector<8x128xf32>
    %542 = arith.mulf %526, %534 : vector<8x128xf32>
    %543 = arith.addf %541, %542 : vector<8x128xf32>
    %544 = math.tanh %543 : vector<8x128xf32>
    %545 = arith.mulf %540, %544 : vector<8x128xf32>
    %c0_250 = arith.constant 0 : index
    %c0_251 = arith.constant 0 : index
    %546 = vector.load %arg10[%c0_250, %c0_251] : memref<8x128xf32, #tpu.memory_space<vmem>>, vector<8x128xf32>
    tpu.vector_store %arg10[%c0_250, %c0_251], %519 {strides = array<i32>} : memref<8x128xf32, #tpu.memory_space<vmem>>, vector<8x128xf32>,
    %c0_252 = arith.constant 0 : index
    %c0_253 = arith.constant 0 : index
    %547 = vector.load %arg11[%c0_252, %c0_253] : memref<8x128xf32, #tpu.memory_space<vmem>>, vector<8x128xf32>
    tpu.vector_store %arg11[%c0_252, %c0_253], %517 {strides = array<i32>} : memref<8x128xf32, #tpu.memory_space<vmem>>, vector<8x128xf32>,
    %c0_254 = arith.constant 0 : index
    %c0_255 = arith.constant 0 : index
    %548 = vector.load %arg12[%c0_254, %c0_255] : memref<8x128xf32, #tpu.memory_space<vmem>>, vector<8x128xf32>
    tpu.vector_store %arg12[%c0_254, %c0_255], %545 {strides = array<i32>} : memref<8x128xf32, #tpu.memory_space<vmem>>, vector<8x128xf32>,
    %c0_256 = arith.constant 0 : index
    %c0_257 = arith.constant 0 : index
    %549 = vector.load %arg13[%c0_256, %c0_257] : memref<8x128xf32, #tpu.memory_space<vmem>>, vector<8x128xf32>
    tpu.vector_store %arg13[%c0_256, %c0_257], %543 {strides = array<i32>} : memref<8x128xf32, #tpu.memory_space<vmem>>, vector<8x128xf32>,
    %550 = arith.index_cast %478 : i32 to index
    %c0_258 = arith.constant 0 : index
    %551 = vector.load %arg9[%550, %c0_258] : memref<64x256xf32, #tpu.memory_space<vmem>>, vector<8x128xf32>
    tpu.vector_store %arg9[%550, %c0_258], %519 {strides = array<i32>} : memref<64x256xf32, #tpu.memory_space<vmem>>, vector<8x128xf32>,
    %552 = arith.index_cast %481 : i32 to index
    %c128_259 = arith.constant 128 : index
    %553 = vector.load %arg9[%552, %c128_259] : memref<64x256xf32, #tpu.memory_space<vmem>>, vector<8x128xf32>
    tpu.vector_store %arg9[%552, %c128_259], %545 {strides = array<i32>} : memref<64x256xf32, #tpu.memory_space<vmem>>, vector<8x128xf32>,
    %c7_i32_260 = arith.constant 7 : i32
    %c8_i32_261 = arith.constant 8 : i32
    %554 = arith.muli %c7_i32_260, %c8_i32_261 : i32
    %555 = tpu.assume_multiple %554, 8 : i32
    %c7_i32_262 = arith.constant 7 : i32
    %556 = arith.subi %c7_i32_262, %c7_i32_260 : i32
    %c8_i32_263 = arith.constant 8 : i32
    %557 = arith.muli %556, %c8_i32_263 : i32
    %558 = tpu.assume_multiple %557, 8 : i32
    %559 = arith.index_cast %555 : i32 to index
    %c0_264 = arith.constant 0 : index
    %560 = vector.load %arg8[%559, %c0_264] : memref<64x1024xf32, #tpu.memory_space<vmem>>, vector<8x512xf32>
    %c0_265 = arith.constant 0 : index
    %c0_266 = arith.constant 0 : index
    %561 = vector.load %arg10[%c0_265, %c0_266] : memref<8x128xf32, #tpu.memory_space<vmem>>, vector<8x128xf32>
    %c0_267 = arith.constant 0 : index
    %c0_268 = arith.constant 0 : index
    %562 = vector.load %arg3[%c0_267, %c0_268] : memref<128x512xf32, #tpu.memory_space<vmem>>, vector<128x512xf32>
    %cst_269 = arith.constant dense<0.000000e+00> : vector<8x512xf32>
    %563 = tpu.matmul %561, %562, %cst_269 {dimension_numbers = #tpu.dot_dimension_numbers<[1], [0], [0], [1], [0, 0, 1, 1], [], []>} : vector<8x128xf32>, vector<128x512xf32>, vector<8x512xf32> -> vector<8x512xf32>
    %564 = arith.addf %560, %563 : vector<8x512xf32>
    %565 = arith.index_cast %558 : i32 to index
    %c512_270 = arith.constant 512 : index
    %566 = vector.load %arg8[%565, %c512_270] : memref<64x1024xf32, #tpu.memory_space<vmem>>, vector<8x512xf32>
    %c0_271 = arith.constant 0 : index
    %c0_272 = arith.constant 0 : index
    %567 = vector.load %arg12[%c0_271, %c0_272] : memref<8x128xf32, #tpu.memory_space<vmem>>, vector<8x128xf32>
    %c0_273 = arith.constant 0 : index
    %c0_274 = arith.constant 0 : index
    %568 = vector.load %arg4[%c0_273, %c0_274] : memref<128x512xf32, #tpu.memory_space<vmem>>, vector<128x512xf32>
    %cst_275 = arith.constant dense<0.000000e+00> : vector<8x512xf32>
    %569 = tpu.matmul %567, %568, %cst_275 {dimension_numbers = #tpu.dot_dimension_numbers<[1], [0], [0], [1], [0, 0, 1, 1], [], []>} : vector<8x128xf32>, vector<128x512xf32>, vector<8x512xf32> -> vector<8x512xf32>
    %570 = arith.addf %566, %569 : vector<8x512xf32>
    %c0_276 = arith.constant 0 : index
    %c0_277 = arith.constant 0 : index
    %571 = vector.load %arg11[%c0_276, %c0_277] : memref<8x128xf32, #tpu.memory_space<vmem>>, vector<8x128xf32>
    %572 = vector.extract_strided_slice %564 {offsets = [0, 0], sizes = [8, 128], strides = [1, 1]} : vector<8x512xf32> to vector<8x128xf32>
    %573 = arith.negf %572 : vector<8x128xf32>
    %574 = math.exp %573 : vector<8x128xf32>
    %cst_278 = arith.constant 1.000000e+00 : f32
    %575 = vector.broadcast %cst_278 : f32 to vector<8x128xf32>
    %576 = arith.addf %575, %574 : vector<8x128xf32>
    %577 = arith.divf %575, %576 : vector<8x128xf32>
    %578 = vector.extract_strided_slice %564 {offsets = [0, 128], sizes = [8, 128], strides = [1, 1]} : vector<8x512xf32> to vector<8x128xf32>
    %579 = arith.negf %578 : vector<8x128xf32>
    %580 = math.exp %579 : vector<8x128xf32>
    %cst_279 = arith.constant 1.000000e+00 : f32
    %581 = vector.broadcast %cst_279 : f32 to vector<8x128xf32>
    %582 = arith.addf %581, %580 : vector<8x128xf32>
    %583 = arith.divf %581, %582 : vector<8x128xf32>
    %584 = vector.extract_strided_slice %564 {offsets = [0, 256], sizes = [8, 128], strides = [1, 1]} : vector<8x512xf32> to vector<8x128xf32>
    %585 = math.tanh %584 : vector<8x128xf32>
    %586 = vector.extract_strided_slice %564 {offsets = [0, 384], sizes = [8, 128], strides = [1, 1]} : vector<8x512xf32> to vector<8x128xf32>
    %587 = arith.negf %586 : vector<8x128xf32>
    %588 = math.exp %587 : vector<8x128xf32>
    %cst_280 = arith.constant 1.000000e+00 : f32
    %589 = vector.broadcast %cst_280 : f32 to vector<8x128xf32>
    %590 = arith.addf %589, %588 : vector<8x128xf32>
    %591 = arith.divf %589, %590 : vector<8x128xf32>
    %592 = arith.mulf %583, %571 : vector<8x128xf32>
    %593 = arith.mulf %577, %585 : vector<8x128xf32>
    %594 = arith.addf %592, %593 : vector<8x128xf32>
    %595 = math.tanh %594 : vector<8x128xf32>
    %596 = arith.mulf %591, %595 : vector<8x128xf32>
    %c0_281 = arith.constant 0 : index
    %c0_282 = arith.constant 0 : index
    %597 = vector.load %arg13[%c0_281, %c0_282] : memref<8x128xf32, #tpu.memory_space<vmem>>, vector<8x128xf32>
    %598 = vector.extract_strided_slice %570 {offsets = [0, 0], sizes = [8, 128], strides = [1, 1]} : vector<8x512xf32> to vector<8x128xf32>
    %599 = arith.negf %598 : vector<8x128xf32>
    %600 = math.exp %599 : vector<8x128xf32>
    %cst_283 = arith.constant 1.000000e+00 : f32
    %601 = vector.broadcast %cst_283 : f32 to vector<8x128xf32>
    %602 = arith.addf %601, %600 : vector<8x128xf32>
    %603 = arith.divf %601, %602 : vector<8x128xf32>
    %604 = vector.extract_strided_slice %570 {offsets = [0, 128], sizes = [8, 128], strides = [1, 1]} : vector<8x512xf32> to vector<8x128xf32>
    %605 = arith.negf %604 : vector<8x128xf32>
    %606 = math.exp %605 : vector<8x128xf32>
    %cst_284 = arith.constant 1.000000e+00 : f32
    %607 = vector.broadcast %cst_284 : f32 to vector<8x128xf32>
    %608 = arith.addf %607, %606 : vector<8x128xf32>
    %609 = arith.divf %607, %608 : vector<8x128xf32>
    %610 = vector.extract_strided_slice %570 {offsets = [0, 256], sizes = [8, 128], strides = [1, 1]} : vector<8x512xf32> to vector<8x128xf32>
    %611 = math.tanh %610 : vector<8x128xf32>
    %612 = vector.extract_strided_slice %570 {offsets = [0, 384], sizes = [8, 128], strides = [1, 1]} : vector<8x512xf32> to vector<8x128xf32>
    %613 = arith.negf %612 : vector<8x128xf32>
    %614 = math.exp %613 : vector<8x128xf32>
    %cst_285 = arith.constant 1.000000e+00 : f32
    %615 = vector.broadcast %cst_285 : f32 to vector<8x128xf32>
    %616 = arith.addf %615, %614 : vector<8x128xf32>
    %617 = arith.divf %615, %616 : vector<8x128xf32>
    %618 = arith.mulf %609, %597 : vector<8x128xf32>
    %619 = arith.mulf %603, %611 : vector<8x128xf32>
    %620 = arith.addf %618, %619 : vector<8x128xf32>
    %621 = math.tanh %620 : vector<8x128xf32>
    %622 = arith.mulf %617, %621 : vector<8x128xf32>
    %c0_286 = arith.constant 0 : index
    %c0_287 = arith.constant 0 : index
    %623 = vector.load %arg10[%c0_286, %c0_287] : memref<8x128xf32, #tpu.memory_space<vmem>>, vector<8x128xf32>
    tpu.vector_store %arg10[%c0_286, %c0_287], %596 {strides = array<i32>} : memref<8x128xf32, #tpu.memory_space<vmem>>, vector<8x128xf32>,
    %c0_288 = arith.constant 0 : index
    %c0_289 = arith.constant 0 : index
    %624 = vector.load %arg11[%c0_288, %c0_289] : memref<8x128xf32, #tpu.memory_space<vmem>>, vector<8x128xf32>
    tpu.vector_store %arg11[%c0_288, %c0_289], %594 {strides = array<i32>} : memref<8x128xf32, #tpu.memory_space<vmem>>, vector<8x128xf32>,
    %c0_290 = arith.constant 0 : index
    %c0_291 = arith.constant 0 : index
    %625 = vector.load %arg12[%c0_290, %c0_291] : memref<8x128xf32, #tpu.memory_space<vmem>>, vector<8x128xf32>
    tpu.vector_store %arg12[%c0_290, %c0_291], %622 {strides = array<i32>} : memref<8x128xf32, #tpu.memory_space<vmem>>, vector<8x128xf32>,
    %c0_292 = arith.constant 0 : index
    %c0_293 = arith.constant 0 : index
    %626 = vector.load %arg13[%c0_292, %c0_293] : memref<8x128xf32, #tpu.memory_space<vmem>>, vector<8x128xf32>
    tpu.vector_store %arg13[%c0_292, %c0_293], %620 {strides = array<i32>} : memref<8x128xf32, #tpu.memory_space<vmem>>, vector<8x128xf32>,
    %627 = arith.index_cast %555 : i32 to index
    %c0_294 = arith.constant 0 : index
    %628 = vector.load %arg9[%627, %c0_294] : memref<64x256xf32, #tpu.memory_space<vmem>>, vector<8x128xf32>
    tpu.vector_store %arg9[%627, %c0_294], %596 {strides = array<i32>} : memref<64x256xf32, #tpu.memory_space<vmem>>, vector<8x128xf32>,
    %629 = arith.index_cast %558 : i32 to index
    %c128_295 = arith.constant 128 : index
    %630 = vector.load %arg9[%629, %c128_295] : memref<64x256xf32, #tpu.memory_space<vmem>>, vector<8x128xf32>
    tpu.vector_store %arg9[%629, %c128_295], %622 {strides = array<i32>} : memref<64x256xf32, #tpu.memory_space<vmem>>, vector<8x128xf32>,
    %c8_i32_296 = arith.constant 8 : i32
    %c0_297 = arith.constant 0 : index
    %c0_298 = arith.constant 0 : index
    %631 = vector.load %arg9[%c0_297, %c0_298] : memref<64x256xf32, #tpu.memory_space<vmem>>, vector<64x256xf32>
    %c0_299 = arith.constant 0 : index
    %c0_300 = arith.constant 0 : index
    %632 = vector.load %arg5[%c0_299, %c0_300] : memref<256x128xf32, #tpu.memory_space<vmem>>, vector<256x128xf32>
    %cst_301 = arith.constant dense<0.000000e+00> : vector<64x128xf32>
    %633 = tpu.matmul %631, %632, %cst_301 {dimension_numbers = #tpu.dot_dimension_numbers<[1], [0], [0], [1], [0, 0, 1, 1], [], []>} : vector<64x256xf32>, vector<256x128xf32>, vector<64x128xf32> -> vector<64x128xf32>
    %c0_302 = arith.constant 0 : index
    %c0_303 = arith.constant 0 : index
    %634 = vector.load %arg6[%c0_302, %c0_303] : memref<1x128xf32, #tpu.memory_space<vmem>>, vector<1x128xf32>
    %635 = vector.broadcast %634 : vector<1x128xf32> to vector<64x128xf32>
    %636 = arith.addf %633, %635 : vector<64x128xf32>
    %c0_304 = arith.constant 0 : index
    %c0_305 = arith.constant 0 : index
    %637 = vector.load %arg7[%c0_304, %c0_305] : memref<64x128xf32, #tpu.memory_space<vmem>>, vector<64x128xf32>
    tpu.vector_store %arg7[%c0_304, %c0_305], %636 {strides = array<i32>} : memref<64x128xf32, #tpu.memory_space<vmem>>, vector<64x128xf32>,
    return
  }
}

</mosaic_0001>

<bundles_post_ra>
// kernel: tpu_custom_call.1
= control target key start
LH: loop header
LB: loop body
LE: loop exit
PB: predicated region body
PF: predicated region fallthrough
CT: control target
= control target key end

     0   :  { %12 = vsyncpa [#allocation9], 0  ;;  %s8166_s0 = inlined_call_operand.vmem [shape: f32[64,32], index: 0, kind: input, shape index: {}]   ;;  %s8167_s1 = inlined_call_operand.hbm [shape: f32[32,1024], index: 1, kind: input, shape index: {}]   ;;  %s8168_s2 = inlined_call_operand.vmem [shape: f32[1,1024], index: 2, kind: input, shape index: {}]   ;;  %s8169_s3 = inlined_call_operand.hbm [shape: f32[128,512], index: 3, kind: input, shape index: {}]   ;;  %s8170_s4 = inlined_call_operand.hbm [shape: f32[128,512], index: 4, kind: input, shape index: {}]   ;;  %s8171_s5 = inlined_call_operand.hbm [shape: f32[256,128], index: 5, kind: input, shape index: {}]   ;;  %s8172_s6 = inlined_call_operand.vmem [shape: f32[1,128], index: 6, kind: input, shape index: {}]   ;;  %s8173_s7 = inlined_call_operand.hbm [shape: f32[64,128], index: 7, kind: output, shape index: {}]  }
   0x1   :  { %13 = vsyncpa [#allocation12], 0 }
   0x2   :  { %14 = vsyncpa [#allocation15], 0 }
   0x3   :  { %15 = vsyncpa [#allocation10], 0  ;;  %s6585_s24 = smov [#allocation11]   ;;  %s6467_s28 = scalar_lea.hbm %s8169_s3, 8192 }
   0x4   :  { %s37_s25 = sshll.u32 %s6585_s24, 4  ;;  %p6468_p0 = scmp.ne.s32.totalorder %s8169_s3, %s6467_s28  ;;  %s38_s25 = int_to_ptr.vmem [resolvable:$true] %s37_s25 }
   0x5   :  { %p6471_p1 = scmp.lt.u32.totalorder %s6467_s28, %s8169_s3 }
   0x7   :  { %p6473_p2 = pnand %p6471_p1, %p6468_p0 }
   0x9   :  { %6476 = shalt.err (!%p6473_p2)
}
   0xa   :  { %s6477_s10 = scalar_lea.vmem %s38_s25, 8192  ;;  %p6482_p4 = scmp.lt.s32.totalorder %s38_s25, %s38_s25 }
   0xb   :  { %p6478_p3 = scmp.ne.s32.totalorder %s38_s25, %s6477_s10  ;;  %p6483_p5 = scmp.lt.s32.totalorder %s6477_s10, %s6477_s10 }
   0xd   :  { %p6484_p6 = por %p6483_p5, %p6482_p4 }
   0xf   :  { %p6485_p7 = pnand %p6484_p6, %p6478_p3 }
  0x11   :  { %6488 = shalt.err (!%p6485_p7)
}
  0x12   :  { %s6586_s11 = smov 512   ;;  %s6587_s12 = smov 32  }
  0x13   :  { %43 = dma.hbm_to_vmem [thread:$0]  %s8169_s3, 8192, %s38_s25, [#allocation12], %s6586_s11, %s6586_s11, %s6587_s12  }
  0x14   :  { %s6588_s15 = smov [#allocation8]   ;;  %s6489_s19 = scalar_lea.hbm %s8167_s1, 4096 }
  0x15   :  { %s23_s16 = sshll.u32 %s6588_s15, 4  ;;  %p6490_p8 = scmp.ne.s32.totalorder %s8167_s1, %s6489_s19  ;;  %s24_s16 = int_to_ptr.vmem [resolvable:$true] %s23_s16 }
  0x16   :  { %p6493_p9 = scmp.lt.u32.totalorder %s6489_s19, %s8167_s1 }
  0x18   :  { %p6495_p10 = pnand %p6493_p9, %p6490_p8 }
  0x1a   :  { %6498 = shalt.err (!%p6495_p10)
}
  0x1b   :  { %s6499_s24 = scalar_lea.vmem %s24_s16, 4096  ;;  %p6504_p12 = scmp.lt.s32.totalorder %s24_s16, %s24_s16 }
  0x1c   :  { %p6500_p11 = scmp.ne.s32.totalorder %s24_s16, %s6499_s24  ;;  %p6505_p13 = scmp.lt.s32.totalorder %s6499_s24, %s6499_s24 }
  0x1e   :  { %p6506_p0 = por %p6505_p13, %p6504_p12 }
  0x20   :  { %p6507_p1 = pnand %p6506_p0, %p6500_p11 }
  0x22   :  { %6510 = shalt.err (!%p6507_p1)
}
  0x23   :  { %s6589_s3 = smov 1024   ;;  %s6590_s25 = smov 64  }
  0x24   :  { %29 = dma.hbm_to_vmem [thread:$0]  %s8167_s1, 4096, %s24_s16, [#allocation9], %s6589_s3, %s6589_s3, %s6590_s25  }
  0x25   :  { %s6591_s28 = smov [#allocation13]   ;;  %s6592_s30 = smov [#allocation14]  }
  0x26   :  { %s49_s29 = sshll.u32 %s6591_s28, 4  ;;  %s61_s8 = sshll.u32 %s6592_s30, 4  ;;  %s50_s29 = int_to_ptr.vmem [resolvable:$true] %s49_s29  ;;  %s6664_s8 = int_to_ptr.vmem [resolvable:$true] %s61_s8 }
  0x27   :  { %s6511_s13 = scalar_lea.hbm %s8170_s4, 8192 }
  0x28   :  { %p6512_p2 = scmp.ne.s32.totalorder %s8170_s4, %s6511_s13  ;;  %p6515_p3 = scmp.lt.u32.totalorder %s6511_s13, %s8170_s4 }
  0x2a   :  { %p6517_p4 = pnand %p6515_p3, %p6512_p2 }
  0x2c   :  { %6520 = shalt.err (!%p6517_p4)
}
  0x2d   :  { %s6521_s1 = scalar_lea.vmem %s50_s29, 8192  ;;  %p6526_p6 = scmp.lt.s32.totalorder %s50_s29, %s50_s29 }
  0x2e   :  { %p6522_p5 = scmp.ne.s32.totalorder %s50_s29, %s6521_s1  ;;  %p6527_p7 = scmp.lt.s32.totalorder %s6521_s1, %s6521_s1 }
  0x30   :  { %p6528_p8 = por %p6527_p7, %p6526_p6 }
  0x32   :  { %p6529_p9 = pnand %p6528_p8, %p6522_p5 }
  0x34   :  { %6532 = shalt.err (!%p6529_p9)
}
  0x35   :  { %55 = dma.hbm_to_vmem [thread:$0]  %s8170_s4, 8192, %s50_s29, [#allocation12], %s6586_s11, %s6586_s11, %s6587_s12  }
  0x36   :  { %s6533_s22 = scalar_lea.hbm %s8171_s5, 4096 }
  0x37   :  { %p6534_p10 = scmp.ne.s32.totalorder %s8171_s5, %s6533_s22  ;;  %p6537_p11 = scmp.lt.u32.totalorder %s6533_s22, %s8171_s5 }
  0x39   :  { %p6539_p12 = pnand %p6537_p11, %p6534_p10 }
  0x3b   :  { %6542 = shalt.err (!%p6539_p12)
}
  0x3c   :  { %s6543_s26 = scalar_lea.vmem %s6664_s8, 4096  ;;  %p6548_p0 = scmp.lt.s32.totalorder %s6664_s8, %s6664_s8 }
  0x3d   :  { %p6544_p13 = scmp.ne.s32.totalorder %s6664_s8, %s6543_s26  ;;  %p6549_p1 = scmp.lt.s32.totalorder %s6543_s26, %s6543_s26 }
  0x3f   :  { %p6550_p2 = por %p6549_p1, %p6548_p0 }
  0x41   :  { %p6551_p3 = pnand %p6550_p2, %p6544_p13 }
  0x43   :  { %6554 = shalt.err (!%p6551_p3)
}
  0x44   :  { %s6593_s4 = smov 128   ;;  %s6594_s11 = smov 8  }
  0x45   :  { %67 = dma.hbm_to_vmem [thread:$0]  %s8171_s5, 4096, %s6664_s8, [#allocation15], %s6593_s4, %s6593_s4, %s6594_s11  }
  0x46   :  { %6577 = dma.done.wait [#allocation9], 4096  }
  0x47   :  { %6578 = vsyncadd [#allocation9], 4294963200 }
  0x48   :  { %6579 = dma.done.wait [#allocation12], 16384  }
  0x49   :  { %6580 = vsyncadd [#allocation12], 4294950912 }
  0x4a   :  { %6581 = dma.done.wait [#allocation15], 4096  }
  0x4b   :  { %6582 = vsyncadd [#allocation15], 4294963200  ;;  %v8174_v0 = vmov 0.0   ;;  %v91_v1 = vld [vmem:[#allocation8 + $0x8] sm:$0xff]  ;;  %v90_v6 = vld [vmem:[#allocation8] sm:$0xff]  ;;  %vm164_vm0 = vcmask 261120  }
  0x4c   :  { %253 = vmatprep.mubr.f32.mxu1 %v8174_v0  ;;  %479 = vmatprep.mubr.f32.mxu0 %v8174_v0  ;;  %v99_v2 = vld [vmem:[#allocation8 + $0x48] sm:$0xff]  ;;  %v98_v7 = vld [vmem:[#allocation8 + $0x40] sm:$0xff]  ;;  %v93_v24 = vld [vmem:[#allocation8 + $0x18] sm:$0xff] }
  0x4d   :  { %v95_v3 = vld [vmem:[#allocation8 + $0x28] sm:$0xff]  ;;  %v4983_v4 = vpack.c.bf16 %v99_v2, %v91_v1  ;;  %v4985_v9 = vpack.c.bf16 %v98_v7, %v90_v6  ;;  %v94_v10 = vld [vmem:[#allocation8 + $0x20] sm:$0xff]  ;;  %v101_v26 = vld [vmem:[#allocation8 + $0x58] sm:$0xff] }
  0x4e   :  { %v103_v5 = vld [vmem:[#allocation8 + $0x68] sm:$0xff]  ;;  %v102_v11 = vld [vmem:[#allocation8 + $0x60] sm:$0xff]  ;;  %v4991_v29 = vpack.c.bf16 %v101_v26, %v93_v24  ;;  %v92_v31 = vld [vmem:[#allocation8 + $0x10] sm:$0xff] }
  0x4f   :  { %v4999_v8 = vpack.c.bf16 %v103_v5, %v95_v3  ;;  %v107_v12 = vld [vmem:[#allocation8 + $0x88] sm:$0xff]  ;;  %4984 = vmatprep.subr.bf16.mxu1 %v4983_v4  ;;  %v5001_v13 = vpack.c.bf16 %v102_v11, %v94_v10  ;;  %v106_v19 = vld [vmem:[#allocation8 + $0x80] sm:$0xff]  ;;  %v100_v32 = vld [vmem:[#allocation8 + $0x50] sm:$0xff] }
  0x50   :  { %v115_v14 = vld [vmem:[#allocation8 + $0xc8] sm:$0xff]  ;;  %4986 = vmatpush1.bf16.msra.mxu1 %v4985_v9  ;;  %v114_v20 = vld [vmem:[#allocation8 + $0xc0] sm:$0xff]  ;;  %v4993_v35 = vpack.c.bf16 %v100_v32, %v92_v31  ;;  %v109_v48 = vld [vmem:[#allocation8 + $0x98] sm:$0xff] }
  0x51   :  { %v111_v15 = vld [vmem:[#allocation8 + $0xa8] sm:$0xff]  ;;  %5000 = vmatprep.subr.bf16.mxu0 %v4999_v8  ;;  %v4987_v17 = vpack.c.bf16 %v115_v14, %v107_v12  ;;  %v110_v21 = vld [vmem:[#allocation8 + $0xa0] sm:$0xff]  ;;  %v4989_v22 = vpack.c.bf16 %v114_v20, %v106_v19  ;;  %v117_v52 = vld [vmem:[#allocation8 + $0xd8] sm:$0xff] }
  0x52   :  { %v119_v16 = vld [vmem:[#allocation8 + $0xe8] sm:$0xff]  ;;  %5002 = vmatpush1.bf16.msra.mxu0 %v5001_v13  ;;  %v118_v23 = vld [vmem:[#allocation8 + $0xe0] sm:$0xff]  ;;  %v4995_v54 = vpack.c.bf16 %v117_v52, %v109_v48  ;;  %v108_v55 = vld [vmem:[#allocation8 + $0x90] sm:$0xff] }
  0x53   :  { %v5003_v18 = vpack.c.bf16 %v119_v16, %v111_v15  ;;  %4988 = vmatprep.subr.bf16.mxu1 %v4987_v17  ;;  %v5005_v25 = vpack.c.bf16 %v118_v23, %v110_v21  ;;  %v718_v27 = vld [vmem:[#allocation11 + $0x8] sm:$0xff]  ;;  %v717_v33 = vld [vmem:[#allocation11] sm:$0xff]  ;;  %v116_v56 = vld [vmem:[#allocation8 + $0xd0] sm:$0xff] }
  0x54   :  { %v722_v28 = vld [vmem:[#allocation11 + $0x28] sm:$0xff]  ;;  %4990 = vmatpush1.bf16.msra.mxu1 %v4989_v22  ;;  %v6708_v34 = vld [vmem:[%s8166_s0] sm:$0xff]  ;;  %v6740_v57 = vld [vmem:[%s8166_s0 + $0x10] sm:$0xff]  ;;  %v4997_v62 = vpack.c.bf16 %v116_v56, %v108_v55 }
  0x55   :  { %5004 = vmatprep.subr.bf16.mxu0 %v5003_v18  ;;  %v6703_v30 = vpack.c.bf16 %v722_v28, %v718_v27  ;;  %v721_v36 = vld [vmem:[#allocation11 + $0x20] sm:$0xff]  ;;  %v726_v37 = vld [vmem:[#allocation11 + $0x48] sm:$0xff]  ;;  %4992 = vmatprep.subr.bf16.mxu1 %v4991_v29  ;;  %v6757_v2 = vld [vmem:[%s8166_s0 + $0x18] sm:$0xff] }
  0x56   :  { %5006 = vmatpush1.bf16.msra.mxu0 %v5005_v25  ;;  %v6710_v38 = vpack.c.bf16 %v721_v36, %v717_v33  ;;  %v730_v39 = vld [vmem:[#allocation11 + $0x68] sm:$0xff]  ;;  %v725_v41 = vld [vmem:[#allocation11 + $0x40] sm:$0xff]  ;;  %v97_v4 = vld [vmem:[#allocation8 + $0x38] sm:$0xff] }
  0x57   :  { %5016 = vmatprep.subr.bf16.mxu0 %v6703_v30  ;;  %v6713_v40 = vpack.c.bf16 %v730_v39, %v726_v37  ;;  %v729_v42 = vld [vmem:[#allocation11 + $0x60] sm:$0xff]  ;;  %4846 = vmatmul.mubr.msk.f32.vlgmr.msra.gmra.mrb[0].mxu1 %vm164_vm0, %v6708_v34  ;;  %v734_v43 = vld [vmem:[#allocation11 + $0x88] sm:$0xff]  ;;  %v105_v5 = vld [vmem:[#allocation8 + $0x78] sm:$0xff] }
  0x58   :  { %v738_v44 = vld [vmem:[#allocation11 + $0xa8] sm:$0xff]  ;;  %4994 = vmatpush1.bf16.msra.mxu1 %v4993_v35  ;;  %259 = vmatprep.mubr.f32.mxu1 %v8174_v0  ;;  %v6726_v46 = vpack.c.bf16 %v729_v42, %v725_v41  ;;  %v733_v47 = vld [vmem:[#allocation11 + $0x80] sm:$0xff]  ;;  %v5007_v9 = vpack.c.bf16 %v105_v5, %v97_v4  ;;  %v6808_v26 = vld [vmem:[%s8166_s0 + $0x30] sm:$0xff] }
  0x59   :  { %4862 = vmatmul.mubr.msk.f32.vlgmr.msra.gmra.mrb[0].mxu0 %vm164_vm0, %v6708_v34  ;;  %v6722_v45 = vld [vmem:[%s8166_s0 + $0x8] sm:$0xff]  ;;  %v6730_v49 = vpack.c.bf16 %v738_v44, %v734_v43  ;;  %v737_v50 = vld [vmem:[#allocation11 + $0xa0] sm:$0xff]  ;;  %4996 = vmatprep.subr.bf16.mxu1 %v4995_v54  ;;  %v6825_v35 = vld [vmem:[%s8166_s0 + $0x38] sm:$0xff] }
  0x5a   :  { %5018 = vmatpush1.bf16.msra.mxu0 %v6710_v38  ;;  %485 = vmatprep.mubr.f32.mxu0 %v8174_v0  ;;  %v742_v51 = vld [vmem:[#allocation11 + $0xc8] sm:$0xff]  ;;  %v6744_v58 = vpack.c.bf16 %v737_v50, %v733_v47  ;;  %v741_v60 = vld [vmem:[#allocation11 + $0xc0] sm:$0xff]  ;;  %v96_v37 = vld [vmem:[#allocation8 + $0x30] sm:$0xff] }
  0x5b   :  { %5020 = vmatprep.subr.bf16.mxu0 %v6713_v40  ;;  %4847 = vmatmul.mubr.msk.f32.gmra.mrb[2].mxu1 %vm164_vm0, %v6722_v45  ;;  %v746_v53 = vld [vmem:[#allocation11 + $0xe8] sm:$0xff]  ;;  %v745_v61 = vld [vmem:[#allocation11 + $0xe0] sm:$0xff]  ;;  %v104_v39 = vld [vmem:[#allocation8 + $0x70] sm:$0xff] }
  0x5c   :  { %265 = vmatprep.mubr.f32.mxu1 %v8174_v0  ;;  %v6747_v59 = vpack.c.bf16 %v746_v53, %v742_v51  ;;  %v750_v63 = vld [vmem:[#allocation11 + $0x108] sm:$0xff]  ;;  %v6761_v3 = vpack.c.bf16 %v745_v61, %v741_v60  ;;  %4998 = vmatpush1.bf16.msra.mxu1 %v4997_v62  ;;  %v749_v7 = vld [vmem:[#allocation11 + $0x100] sm:$0xff]  ;;  %v113_v44 = vld [vmem:[#allocation8 + $0xb8] sm:$0xff]  ;;  %v5009_v51 = vpack.c.bf16 %v104_v39, %v96_v37 }
  0x5d   :  { %4863 = vmatmul.mubr.msk.f32.gmra.mrb[2].mxu0 %vm164_vm0, %v6722_v45  ;;  %v754_v1 = vld [vmem:[#allocation11 + $0x128] sm:$0xff]  ;;  %v753_v8 = vld [vmem:[#allocation11 + $0x120] sm:$0xff]  ;;  %5008 = vmatprep.subr.bf16.mxu1 %v5007_v9  ;;  %v121_v47 = vld [vmem:[#allocation8 + $0xf8] sm:$0xff] }
  0x5e   :  { %5022 = vmatpush1.bf16.msra.mxu0 %v6726_v46  ;;  %491 = vmatprep.mubr.f32.mxu0 %v8174_v0  ;;  %v6764_v6 = vpack.c.bf16 %v754_v1, %v750_v63  ;;  %v758_v10 = vld [vmem:[#allocation11 + $0x148] sm:$0xff]  ;;  %v6774_v12 = vld [vmem:[%s8166_s0 + $0x20] sm:$0xff]  ;;  %v6778_v13 = vpack.c.bf16 %v753_v8, %v749_v7  ;;  %v112_v53 = vld [vmem:[#allocation8 + $0xb0] sm:$0xff]  ;;  %v5011_v56 = vpack.c.bf16 %v121_v47, %v113_v44 }
  0x5f   :  { %5024 = vmatprep.subr.bf16.mxu0 %v6730_v49  ;;  %4848 = vmatmul.mubr.msk.f32.gmra.mrb[4].mxu1 %vm164_vm0, %v6740_v57  ;;  %v762_v11 = vld [vmem:[#allocation11 + $0x168] sm:$0xff]  ;;  %v757_v15 = vld [vmem:[#allocation11 + $0x140] sm:$0xff]  ;;  %v120_v54 = vld [vmem:[#allocation8 + $0xf0] sm:$0xff] }
  0x60   :  { %271 = vmatprep.mubr.f32.mxu1 %v8174_v0  ;;  %v6781_v14 = vpack.c.bf16 %v762_v11, %v758_v10  ;;  %v761_v16 = vld [vmem:[#allocation11 + $0x160] sm:$0xff]  ;;  %v766_v17 = vld [vmem:[#allocation11 + $0x188] sm:$0xff]  ;;  %v720_v62 = vld [vmem:[#allocation11 + $0x18] sm:$0xff]  ;;  %v5013_v5 = vpack.c.bf16 %v120_v54, %v112_v53 }
  0x61   :  { %4864 = vmatmul.mubr.msk.f32.gmra.mrb[4].mxu0 %vm164_vm0, %v6740_v57  ;;  %v770_v18 = vld [vmem:[#allocation11 + $0x1a8] sm:$0xff]  ;;  %v6795_v20 = vpack.c.bf16 %v761_v16, %v757_v15  ;;  %v765_v22 = vld [vmem:[#allocation11 + $0x180] sm:$0xff]  ;;  %v724_v63 = vld [vmem:[#allocation11 + $0x38] sm:$0xff] }
  0x62   :  { %5026 = vmatpush1.bf16.msra.mxu0 %v6744_v58  ;;  %497 = vmatprep.mubr.f32.mxu0 %v8174_v0  ;;  %v6791_v19 = vld [vmem:[%s8166_s0 + $0x28] sm:$0xff]  ;;  %v6798_v21 = vpack.c.bf16 %v770_v18, %v766_v17  ;;  %v769_v23 = vld [vmem:[#allocation11 + $0x1a0] sm:$0xff]  ;;  %v6853_v8 = vpack.c.bf16 %v724_v63, %v720_v62 }
  0x63   :  { %5028 = vmatprep.subr.bf16.mxu0 %v6747_v59  ;;  %4849 = vmatmul.mubr.msk.f32.gmra.mrb[6].mxu1 %vm164_vm0, %v6757_v2  ;;  %v774_v24 = vld [vmem:[#allocation11 + $0x1c8] sm:$0xff]  ;;  %v6812_v27 = vpack.c.bf16 %v769_v23, %v765_v22  ;;  %v773_v29 = vld [vmem:[#allocation11 + $0x1c0] sm:$0xff] }
  0x64   :  { %277 = vmatprep.mubr.f32.mxu1 %v8174_v0  ;;  %v778_v25 = vld [vmem:[#allocation11 + $0x1e8] sm:$0xff]  ;;  %v777_v31 = vld [vmem:[#allocation11 + $0x1e0] sm:$0xff] }
  0x65   :  { %4865 = vmatmul.mubr.msk.f32.gmra.mrb[6].mxu0 %vm164_vm0, %v6757_v2  ;;  %v6815_v28 = vpack.c.bf16 %v778_v25, %v774_v24  ;;  %v936_v32 = vld [vmem:[#allocation13 + $0x8] sm:$0xff]  ;;  %v6829_v36 = vpack.c.bf16 %v777_v31, %v773_v29  ;;  %v935_v42 = vld [vmem:[#allocation13] sm:$0xff] }
  0x66   :  { %5030 = vmatpush1.bf16.msra.mxu0 %v6761_v3  ;;  %503 = vmatprep.mubr.f32.mxu0 %v8174_v0  ;;  %v940_v33 = vld [vmem:[#allocation13 + $0x28] sm:$0xff]  ;;  %v939_v43 = vld [vmem:[#allocation13 + $0x20] sm:$0xff] }
  0x67   :  { %5032 = vmatprep.subr.bf16.mxu0 %v6764_v6  ;;  %4850 = vmatmul.mubr.msk.f32.gmra.mrb[8].mxu1 %vm164_vm0, %v6774_v12  ;;  %v6832_v41 = vpack.c.bf16 %v940_v33, %v936_v32  ;;  %v944_v48 = vld [vmem:[#allocation13 + $0x48] sm:$0xff]  ;;  %v6841_v52 = vpack.c.bf16 %v939_v43, %v935_v42  ;;  %v943_v55 = vld [vmem:[#allocation13 + $0x40] sm:$0xff] }
  0x68   :  { %283 = vmatprep.mubr.f32.mxu1 %v8174_v0  ;;  %v948_v50 = vld [vmem:[#allocation13 + $0x68] sm:$0xff]  ;;  %v947_v61 = vld [vmem:[#allocation13 + $0x60] sm:$0xff] }
  0x69   :  { %4866 = vmatmul.mubr.msk.f32.gmra.mrb[8].mxu0 %vm164_vm0, %v6774_v12  ;;  %v6844_v60 = vpack.c.bf16 %v948_v50, %v944_v48  ;;  %v952_v1 = vld [vmem:[#allocation13 + $0x88] sm:$0xff]  ;;  %v6851_v7 = vpack.c.bf16 %v947_v61, %v943_v55  ;;  %v951_v10 = vld [vmem:[#allocation13 + $0x80] sm:$0xff] }
  0x6a   :  { %5034 = vmatpush1.bf16.msra.mxu0 %v6778_v13  ;;  %509 = vmatprep.mubr.f32.mxu0 %v8174_v0  ;;  %v956_v4 = vld [vmem:[#allocation13 + $0xa8] sm:$0xff]  ;;  %v955_v11 = vld [vmem:[#allocation13 + $0xa0] sm:$0xff] }
  0x6b   :  { %5036 = vmatprep.subr.bf16.mxu0 %v6781_v14  ;;  %4851 = vmatmul.mubr.msk.f32.gmra.mrb[10].mxu1 %vm164_vm0, %v6791_v19  ;;  %v6856_v9 = vpack.c.bf16 %v956_v4, %v952_v1  ;;  %v960_v15 = vld [vmem:[#allocation13 + $0xc8] sm:$0xff]  ;;  %v6863_v17 = vpack.c.bf16 %v955_v11, %v951_v10  ;;  %v959_v22 = vld [vmem:[#allocation13 + $0xc0] sm:$0xff]  ;;  %v723_v10 = vld [vmem:[#allocation11 + $0x30] sm:$0xff] }
  0x6c   :  { %289 = vmatprep.mubr.f32.mxu1 %v8174_v0  ;;  %v964_v16 = vld [vmem:[#allocation13 + $0xe8] sm:$0xff]  ;;  %v963_v23 = vld [vmem:[#allocation13 + $0xe0] sm:$0xff] }
  0x6d   :  { %4867 = vmatmul.mubr.msk.f32.gmra.mrb[10].mxu0 %vm164_vm0, %v6791_v19  ;;  %v6867_v18 = vpack.c.bf16 %v964_v16, %v960_v15  ;;  %v968_v24 = vld [vmem:[#allocation13 + $0x108] sm:$0xff]  ;;  %v6873_v29 = vpack.c.bf16 %v963_v23, %v959_v22  ;;  %v967_v32 = vld [vmem:[#allocation13 + $0x100] sm:$0xff]  ;;  %v728_v15 = vld [vmem:[#allocation11 + $0x58] sm:$0xff] }
  0x6e   :  { %5038 = vmatpush1.bf16.msra.mxu0 %v6795_v20  ;;  %515 = vmatprep.mubr.f32.mxu0 %v8174_v0  ;;  %v972_v25 = vld [vmem:[#allocation13 + $0x128] sm:$0xff]  ;;  %v971_v33 = vld [vmem:[#allocation13 + $0x120] sm:$0xff]  ;;  %v732_v16 = vld [vmem:[#allocation11 + $0x78] sm:$0xff] }
  0x6f   :  { %5040 = vmatprep.subr.bf16.mxu0 %v6798_v21  ;;  %4852 = vmatmul.mubr.msk.f32.gmra.mrb[12].mxu1 %vm164_vm0, %v6808_v26  ;;  %v6876_v31 = vpack.c.bf16 %v972_v25, %v968_v24  ;;  %v976_v37 = vld [vmem:[#allocation13 + $0x148] sm:$0xff]  ;;  %v6882_v42 = vpack.c.bf16 %v971_v33, %v967_v32  ;;  %v975_v44 = vld [vmem:[#allocation13 + $0x140] sm:$0xff]  ;;  %v6917_v23 = vpack.c.bf16 %v732_v16, %v728_v15  ;;  %v727_v24 = vld [vmem:[#allocation11 + $0x50] sm:$0xff] }
  0x70   :  { %295 = vmatprep.mubr.f32.mxu1 %v8174_v0  ;;  %v980_v39 = vld [vmem:[#allocation13 + $0x168] sm:$0xff]  ;;  %v979_v47 = vld [vmem:[#allocation13 + $0x160] sm:$0xff]  ;;  %v731_v25 = vld [vmem:[#allocation11 + $0x70] sm:$0xff] }
  0x71   :  { %4868 = vmatmul.mubr.msk.f32.gmra.mrb[12].mxu0 %vm164_vm0, %v6808_v26  ;;  %v6885_v43 = vpack.c.bf16 %v980_v39, %v976_v37  ;;  %v984_v48 = vld [vmem:[#allocation13 + $0x188] sm:$0xff]  ;;  %v983_v54 = vld [vmem:[#allocation13 + $0x180] sm:$0xff]  ;;  %v736_v32 = vld [vmem:[#allocation11 + $0x98] sm:$0xff]  ;;  %v6925_v37 = vpack.c.bf16 %v731_v25, %v727_v24 }
  0x72   :  { %5042 = vmatpush1.bf16.msra.mxu0 %v6812_v27  ;;  %521 = vmatprep.mubr.f32.mxu0 %v8174_v0  ;;  %v988_v50 = vld [vmem:[#allocation13 + $0x1a8] sm:$0xff]  ;;  %v987_v55 = vld [vmem:[#allocation13 + $0x1a0] sm:$0xff]  ;;  %v740_v33 = vld [vmem:[#allocation11 + $0xb8] sm:$0xff] }
  0x73   :  { %5044 = vmatprep.subr.bf16.mxu0 %v6815_v28  ;;  %4853 = vmatmul.mubr.msk.f32.gmra.mrb[14].mxu1 %vm164_vm0, %v6825_v35  ;;  %v6894_v53 = vpack.c.bf16 %v988_v50, %v984_v48  ;;  %v996_v61 = vld [vmem:[#allocation13 + $0x1e8] sm:$0xff]  ;;  %v6900_v62 = vpack.c.bf16 %v987_v55, %v983_v54  ;;  %v991_v1 = vld [vmem:[#allocation13 + $0x1c0] sm:$0xff]  ;;  %v6928_v39 = vpack.c.bf16 %v740_v33, %v736_v32  ;;  %v744_v48 = vld [vmem:[#allocation11 + $0xd8] sm:$0xff] }
  0x74   :  { %366 = vmatprep.mubr.f32.mxu1 %v8174_v0  ;;  %v995_v4 = vld [vmem:[#allocation13 + $0x1e0] sm:$0xff]  ;;  %v748_v50 = vld [vmem:[#allocation11 + $0xf8] sm:$0xff]  ;;  %v743_v54 = vld [vmem:[#allocation11 + $0xd0] sm:$0xff] }
  0x75   :  { %4869 = vmatmul.mubr.msk.f32.gmra.mrb[14].mxu0 %vm164_vm0, %v6825_v35  ;;  %v6909_v11 = vpack.c.bf16 %v995_v4, %v991_v1  ;;  %v747_v55 = vld [vmem:[#allocation11 + $0xf0] sm:$0xff]  ;;  %v760_v4 = vld [vmem:[#allocation11 + $0x158] sm:$0xff] }
  0x76   :  { %5046 = vmatpush1.bf16.msra.mxu0 %v6829_v36  ;;  %845 = vmatprep.mubr.f32.mxu0 %v8174_v0  ;;  %v755_v1 = vld [vmem:[#allocation11 + $0x130] sm:$0xff]  ;;  %v768_v15 = vld [vmem:[#allocation11 + $0x198] sm:$0xff] }
  0x77   :  { %5080 = vmatprep.subr.bf16.mxu0 %v6832_v41  ;;  %4854 = vmatmul.mubr.msk.f32.vlgmr.msra.gmra.mrb[16].mxu1 %vm164_vm0, %v6708_v34  ;;  %v772_v16 = vld [vmem:[#allocation11 + $0x1b8] sm:$0xff]  ;;  %v771_v24 = vld [vmem:[#allocation11 + $0x1b0] sm:$0xff] }
  0x78   :  { %5010 = vmatpush1.bf16.msra.mxu1 %v5009_v51  ;;  %372 = vmatprep.mubr.f32.mxu1 %v8174_v0  ;;  %v6891_v51 = vpack.c.bf16 %v979_v47, %v975_v44  ;;  %v735_v44 = vld [vmem:[#allocation11 + $0x90] sm:$0xff]  ;;  %v776_v25 = vld [vmem:[#allocation11 + $0x1d8] sm:$0xff] }
  0x79   :  { %846 = vmatmul.mubr.f32.vlgmr.msra.gmra.mrb[16].mxu0 %v8174_v0  ;;  %5012 = vmatprep.subr.bf16.mxu1 %v5011_v56  ;;  %v992_v56 = vld [vmem:[#allocation13 + $0x1c8] sm:$0xff]  ;;  %v739_v47 = vld [vmem:[#allocation11 + $0xb0] sm:$0xff]  ;;  %v780_v32 = vld [vmem:[#allocation11 + $0x1f8] sm:$0xff] }
  0x7a   :  { %5082 = vmatpush1.bf16.msra.mxu0 %v6841_v52  ;;  %1063 = vmatprep.mubr.f32.mxu0 %v8174_v0  ;;  %v6903_v63 = vpack.c.bf16 %v996_v61, %v992_v56  ;;  %v756_v56 = vld [vmem:[#allocation11 + $0x138] sm:$0xff]  ;;  %v751_v61 = vld [vmem:[#allocation11 + $0x110] sm:$0xff] }
  0x7b   :  { %5084 = vmatprep.subr.bf16.mxu0 %v6844_v60  ;;  %4855 = vmatmul.mubr.msk.f32.gmra.mrb[18].mxu1 %vm164_vm0, %v6722_v45  ;;  %v779_v33 = vld [vmem:[#allocation11 + $0x1f0] sm:$0xff] }
  0x7c   :  { %378 = vmatprep.mubr.f32.mxu1 %v8174_v0  ;;  %5014 = vmatpush1.bf16.msra.mxu1 %v5013_v5  ;;  %v719_v5 = vld [vmem:[#allocation11 + $0x10] sm:$0xff] }
  0x7d   :  { %5048 = vmatprep.subr.bf16.mxu1 %v6853_v8  ;;  %v6915_v22 = vpack.c.bf16 %v723_v10, %v719_v5  ;;  %v764_v5 = vld [vmem:[#allocation11 + $0x178] sm:$0xff]  ;;  %v763_v10 = vld [vmem:[#allocation11 + $0x170] sm:$0xff] }
  0x7e   :  { %5086 = vmatpush1.bf16.msra.mxu0 %v6851_v7 }
  0x7f   :  { %5088 = vmatprep.subr.bf16.mxu0 %v6856_v9  ;;  %4856 = vmatmul.mubr.msk.f32.gmra.mrb[20].mxu1 %vm164_vm0, %v6740_v57 }
  0x80   :  { %384 = vmatprep.mubr.f32.mxu1 %v8174_v0 }
  0x82   :  { %5090 = vmatpush1.bf16.msra.mxu0 %v6863_v17 }
  0x83   :  { %5092 = vmatprep.subr.bf16.mxu0 %v6867_v18  ;;  %4857 = vmatmul.mubr.msk.f32.gmra.mrb[22].mxu1 %vm164_vm0, %v6757_v2 }
  0x84   :  { %390 = vmatprep.mubr.f32.mxu1 %v8174_v0 }
  0x86   :  { %5094 = vmatpush1.bf16.msra.mxu0 %v6873_v29 }
  0x87   :  { %5096 = vmatprep.subr.bf16.mxu0 %v6876_v31  ;;  %4858 = vmatmul.mubr.msk.f32.gmra.mrb[24].mxu1 %vm164_vm0, %v6774_v12 }
  0x88   :  { %396 = vmatprep.mubr.f32.mxu1 %v8174_v0 }
  0x8a   :  { %5098 = vmatpush1.bf16.msra.mxu0 %v6882_v42 }
  0x8b   :  { %5100 = vmatprep.subr.bf16.mxu0 %v6885_v43  ;;  %4859 = vmatmul.mubr.msk.f32.gmra.mrb[26].mxu1 %vm164_vm0, %v6791_v19 }
  0x8c   :  { %402 = vmatprep.mubr.f32.mxu1 %v8174_v0 }
  0x8e   :  { %5102 = vmatpush1.bf16.msra.mxu0 %v6891_v51 }
  0x8f   :  { %5104 = vmatprep.subr.bf16.mxu0 %v6894_v53  ;;  %4860 = vmatmul.mubr.msk.f32.gmra.mrb[28].mxu1 %vm164_vm0, %v6808_v26 }
  0x90   :  { %408 = vmatprep.mubr.f32.mxu1 %v8174_v0 }
  0x92   :  { %5106 = vmatpush1.bf16.msra.mxu0 %v6900_v62 }
  0x93   :  { %5108 = vmatprep.subr.bf16.mxu0 %v6903_v63  ;;  %4861 = vmatmul.mubr.msk.f32.gmra.mrb[30].mxu1 %vm164_vm0, %v6825_v35 }
  0x94   :  { %592 = vmatprep.mubr.f32.mxu1 %v8174_v0 }
  0x96   :  { %5110 = vmatpush1.bf16.msra.mxu0 %v6909_v11 }
  0x97   :  { %5144 = vmatprep.subr.bf16.mxu0 %v6703_v30  ;;  %4870 = vmatmul.mubr.msk.f32.vlgmr.msra.gmra.mrb[32].mxu1 %vm164_vm0, %v6708_v34  ;;  %v6938_v30 = vpack.c.bf16 %v739_v47, %v735_v44  ;;  %v6941_v34 = vpack.c.bf16 %v748_v50, %v744_v48  ;;  %v938_v44 = vld [vmem:[#allocation13 + $0x18] sm:$0xff]  ;;  %v941_v48 = vld [vmem:[#allocation13 + $0x30] sm:$0xff] }
  0x98   :  { %5050 = vmatpush1.bf16.msra.mxu1 %v6915_v22  ;;  %598 = vmatprep.mubr.f32.mxu1 %v8174_v0  ;;  %v942_v47 = vld [vmem:[#allocation13 + $0x38] sm:$0xff] }
  0x99   :  { %5052 = vmatprep.subr.bf16.mxu1 %v6917_v23  ;;  %1064 = vmatmul.mubr.f32.vlgmr.msra.gmra.mrb[14].mxu0 %v8174_v0  ;;  %v946_v50 = vld [vmem:[#allocation13 + $0x58] sm:$0xff] }
  0x9a   :  { %5146 = vmatpush1.bf16.msra.mxu0 %v6710_v38  ;;  %1343 = vmatprep.mubr.f32.mxu0 %v8174_v0  ;;  %v752_v38 = vld [vmem:[#allocation11 + $0x118] sm:$0xff] }
  0x9b   :  { %4871 = vmatmul.mubr.msk.f32.gmra.mrb[34].mxu1 %vm164_vm0, %v6722_v45  ;;  %5148 = vmatprep.subr.bf16.mxu0 %v6713_v40  ;;  %v6949_v40 = vpack.c.bf16 %v747_v55, %v743_v54  ;;  %v6952_v45 = vpack.c.bf16 %v756_v56, %v752_v38  ;;  %v950_v54 = vld [vmem:[#allocation13 + $0x78] sm:$0xff]  ;;  %v949_v55 = vld [vmem:[#allocation13 + $0x70] sm:$0xff] }
  0x9c   :  { %5054 = vmatpush1.bf16.msra.mxu1 %v6925_v37  ;;  %604 = vmatprep.mubr.f32.mxu1 %v8174_v0  ;;  %v954_v38 = vld [vmem:[#allocation13 + $0x98] sm:$0xff] }
  0x9d   :  { %5056 = vmatprep.subr.bf16.mxu1 %v6928_v39  ;;  %v958_v56 = vld [vmem:[#allocation13 + $0xb8] sm:$0xff] }
  0x9e   :  { %5150 = vmatpush1.bf16.msra.mxu0 %v6726_v46  ;;  %v6960_v46 = vpack.c.bf16 %v755_v1, %v751_v61  ;;  %v957_v61 = vld [vmem:[#allocation13 + $0xb0] sm:$0xff]  ;;  %v962_v1 = vld [vmem:[#allocation13 + $0xd8] sm:$0xff] }
  0x9f   :  { %4872 = vmatmul.mubr.msk.f32.gmra.mrb[36].mxu1 %vm164_vm0, %v6740_v57  ;;  %5152 = vmatprep.subr.bf16.mxu0 %v6730_v49  ;;  %v6963_v49 = vpack.c.bf16 %v764_v5, %v760_v4  ;;  %v759_v57 = vld [vmem:[#allocation11 + $0x150] sm:$0xff]  ;;  %v966_v4 = vld [vmem:[#allocation13 + $0xf8] sm:$0xff] }
  0xa0   :  { %5058 = vmatpush1.bf16.msra.mxu1 %v6938_v30  ;;  %610 = vmatprep.mubr.f32.mxu1 %v8174_v0  ;;  %v961_v5 = vld [vmem:[#allocation13 + $0xd0] sm:$0xff] }
  0xa1   :  { %5060 = vmatprep.subr.bf16.mxu1 %v6941_v34 }
  0xa2   :  { %5154 = vmatpush1.bf16.msra.mxu0 %v6744_v58  ;;  %v6971_v58 = vpack.c.bf16 %v763_v10, %v759_v57  ;;  %v965_v57 = vld [vmem:[#allocation13 + $0xf0] sm:$0xff]  ;;  %v970_v10 = vld [vmem:[#allocation13 + $0x118] sm:$0xff] }
  0xa3   :  { %4873 = vmatmul.mubr.msk.f32.gmra.mrb[38].mxu1 %vm164_vm0, %v6757_v2  ;;  %5156 = vmatprep.subr.bf16.mxu0 %v6747_v59  ;;  %v6974_v59 = vpack.c.bf16 %v772_v16, %v768_v15  ;;  %v767_v2 = vld [vmem:[#allocation11 + $0x190] sm:$0xff]  ;;  %v974_v15 = vld [vmem:[#allocation13 + $0x138] sm:$0xff]  ;;  %v7026_v16 = vpack.c.bf16 %v965_v57, %v961_v5 }
  0xa4   :  { %5062 = vmatpush1.bf16.msra.mxu1 %v6949_v40  ;;  %616 = vmatprep.mubr.f32.mxu1 %v8174_v0  ;;  %v997_v5 = vld [vmem:[#allocation13 + $0x1f0] sm:$0xff] }
  0xa5   :  { %5064 = vmatprep.subr.bf16.mxu1 %v6952_v45 }
  0xa6   :  { %5158 = vmatpush1.bf16.msra.mxu0 %v6761_v3  ;;  %v6982_v3 = vpack.c.bf16 %v771_v24, %v767_v2  ;;  %v7029_v2 = vpack.c.bf16 %v974_v15, %v970_v10  ;;  %v969_v24 = vld [vmem:[#allocation13 + $0x110] sm:$0xff] }
  0xa7   :  { %4874 = vmatmul.mubr.msk.f32.gmra.mrb[40].mxu1 %vm164_vm0, %v6774_v12  ;;  %5160 = vmatprep.subr.bf16.mxu0 %v6764_v6  ;;  %v6985_v6 = vpack.c.bf16 %v780_v32, %v776_v25  ;;  %v775_v12 = vld [vmem:[#allocation11 + $0x1d0] sm:$0xff]  ;;  %v978_v32 = vld [vmem:[#allocation13 + $0x158] sm:$0xff] }
  0xa8   :  { %5066 = vmatpush1.bf16.msra.mxu1 %v6960_v46  ;;  %622 = vmatprep.mubr.f32.mxu1 %v8174_v0  ;;  %v973_v25 = vld [vmem:[#allocation13 + $0x130] sm:$0xff] }
  0xa9   :  { %5068 = vmatprep.subr.bf16.mxu1 %v6963_v49 }
  0xaa   :  { %5162 = vmatpush1.bf16.msra.mxu0 %v6778_v13  ;;  %v6993_v13 = vpack.c.bf16 %v779_v33, %v775_v12  ;;  %v982_v12 = vld [vmem:[#allocation13 + $0x178] sm:$0xff]  ;;  %v7032_v33 = vpack.c.bf16 %v973_v25, %v969_v24 }
  0xab   :  { %4875 = vmatmul.mubr.msk.f32.gmra.mrb[42].mxu1 %vm164_vm0, %v6791_v19  ;;  %5164 = vmatprep.subr.bf16.mxu0 %v6781_v14  ;;  %v6996_v14 = vpack.c.bf16 %v942_v47, %v938_v44  ;;  %v937_v19 = vld [vmem:[#allocation13 + $0x10] sm:$0xff]  ;;  %v7035_v44 = vpack.c.bf16 %v982_v12, %v978_v32 }
  0xac   :  { %5070 = vmatpush1.bf16.msra.mxu1 %v6971_v58  ;;  %628 = vmatprep.mubr.f32.mxu1 %v8174_v0  ;;  %v977_v47 = vld [vmem:[#allocation13 + $0x150] sm:$0xff] }
  0xad   :  { %5072 = vmatprep.subr.bf16.mxu1 %v6974_v59 }
  0xae   :  { %5166 = vmatpush1.bf16.msra.mxu0 %v6795_v20  ;;  %v7004_v20 = vpack.c.bf16 %v941_v48, %v937_v19  ;;  %v981_v19 = vld [vmem:[#allocation13 + $0x170] sm:$0xff]  ;;  %v986_v48 = vld [vmem:[#allocation13 + $0x198] sm:$0xff] }
  0xaf   :  { %4876 = vmatmul.mubr.msk.f32.gmra.mrb[44].mxu1 %vm164_vm0, %v6808_v26  ;;  %5168 = vmatprep.subr.bf16.mxu0 %v6798_v21  ;;  %v7007_v21 = vpack.c.bf16 %v950_v54, %v946_v50  ;;  %v945_v26 = vld [vmem:[#allocation13 + $0x50] sm:$0xff]  ;;  %v990_v50 = vld [vmem:[#allocation13 + $0x1b8] sm:$0xff]  ;;  %v7038_v54 = vpack.c.bf16 %v981_v19, %v977_v47 }
  0xb0   :  { %5074 = vmatpush1.bf16.msra.mxu1 %v6982_v3  ;;  %634 = vmatprep.mubr.f32.mxu1 %v8174_v0 }
  0xb1   :  { %5076 = vmatprep.subr.bf16.mxu1 %v6985_v6 }
  0xb2   :  { %5170 = vmatpush1.bf16.msra.mxu0 %v6812_v27  ;;  %v7013_v27 = vpack.c.bf16 %v949_v55, %v945_v26  ;;  %v7041_v26 = vpack.c.bf16 %v990_v50, %v986_v48  ;;  %v985_v55 = vld [vmem:[#allocation13 + $0x190] sm:$0xff] }
  0xb3   :  { %4877 = vmatmul.mubr.msk.f32.gmra.mrb[46].mxu1 %vm164_vm0, %v6825_v35  ;;  %5172 = vmatprep.subr.bf16.mxu0 %v6815_v28  ;;  %v7017_v28 = vpack.c.bf16 %v958_v56, %v954_v38  ;;  %v953_v35 = vld [vmem:[#allocation13 + $0x90] sm:$0xff]  ;;  %v994_v56 = vld [vmem:[#allocation13 + $0x1d8] sm:$0xff] }
  0xb4   :  { %5078 = vmatpush1.bf16.msra.mxu1 %v6993_v13  ;;  %916 = vmatprep.mubr.f32.mxu1 %v8174_v0  ;;  %v989_v38 = vld [vmem:[#allocation13 + $0x1b0] sm:$0xff] }
  0xb5   :  { %5112 = vmatprep.subr.bf16.mxu1 %v6996_v14 }
  0xb6   :  { %5174 = vmatpush1.bf16.msra.mxu0 %v6829_v36  ;;  %v7020_v36 = vpack.c.bf16 %v957_v61, %v953_v35  ;;  %v998_v35 = vld [vmem:[#allocation13 + $0x1f8] sm:$0xff]  ;;  %v7044_v61 = vpack.c.bf16 %v989_v38, %v985_v55 }
  0xb7   :  { %917 = vmatmul.mubr.f32.vlgmr.msra.gmra.mrb[16].mxu1 %v8174_v0  ;;  %5208 = vmatprep.subr.bf16.mxu0 %v6832_v41  ;;  %v7023_v41 = vpack.c.bf16 %v966_v4, %v962_v1  ;;  %v7047_v1 = vpack.c.bf16 %v998_v35, %v994_v56  ;;  %v993_v4 = vld [vmem:[#allocation13 + $0x1d0] sm:$0xff] }
  0xb8   :  { %5114 = vmatpush1.bf16.msra.mxu1 %v7004_v20  ;;  %1134 = vmatprep.mubr.f32.mxu1 %v8174_v0  ;;  %v7050_v57 = vpack.c.bf16 %v997_v5, %v993_v4 }
  0xb9   :  { %5116 = vmatprep.subr.bf16.mxu1 %v7007_v21 }
  0xbc   :  { %5118 = vmatpush1.bf16.msra.mxu1 %v7013_v27 }
  0xbd   :  { %5120 = vmatprep.subr.bf16.mxu1 %v7017_v28 }
  0xc0   :  { %5122 = vmatpush1.bf16.msra.mxu1 %v7020_v36 }
  0xc1   :  { %5124 = vmatprep.subr.bf16.mxu1 %v7023_v41 }
  0xc4   :  { %5126 = vmatpush1.bf16.msra.mxu1 %v7026_v16 }
  0xc5   :  { %5128 = vmatprep.subr.bf16.mxu1 %v7029_v2 }
  0xc8   :  { %5130 = vmatpush1.bf16.msra.mxu1 %v7032_v33 }
  0xc9   :  { %5132 = vmatprep.subr.bf16.mxu1 %v7035_v44 }
  0xcc   :  { %5134 = vmatpush1.bf16.msra.mxu1 %v7038_v54 }
  0xcd   :  { %5136 = vmatprep.subr.bf16.mxu1 %v7041_v26 }
  0xd0   :  { %5138 = vmatpush1.bf16.msra.mxu1 %v7044_v61 }
  0xd1   :  { %5140 = vmatprep.subr.bf16.mxu1 %v7047_v1 }
  0xd4   :  { %5142 = vmatpush1.bf16.msra.mxu1 %v7050_v57 }
  0xd5   :  { %5176 = vmatprep.subr.bf16.mxu1 %v6853_v8  ;;  %v124_v8 = vlaneseq }
  0xd7   :  { %1135 = vmatmul.mubr.f32.vlgmr.msra.gmra.mrb[46].mxu1 %v8174_v0 }
  0xd8   :  { %5178 = vmatpush1.bf16.msra.mxu1 %v6915_v22  ;;  %1414 = vmatprep.mubr.f32.mxu1 %v8174_v0  ;;  %v7073_v22 = vshrl.u32 %v124_v8, 7 }
  0xd9   :  { %5180 = vmatprep.subr.bf16.mxu1 %v6917_v23 }
  0xda   :  { %v126_v23 = vsub.s32 0, %v7073_v22 }
  0xdc   :  { %5182 = vmatpush1.bf16.msra.mxu1 %v6925_v37  ;;  %v7079_v37 = vld [vmem:[%s8168_s2] sm:$0xff] }
  0xdd   :  { %5184 = vmatprep.subr.bf16.mxu1 %v6928_v39 }
  0xe0   :  { %5186 = vmatpush1.bf16.msra.mxu1 %v6938_v30  ;;  %v130_v30 = vsub.s32 1, %v7073_v22 }
  0xe1   :  { %5188 = vmatprep.subr.bf16.mxu1 %v6941_v34 }
  0xe4   :  { %5190 = vmatpush1.bf16.msra.mxu1 %v6949_v40  ;;  %v127_v40 = vrot.slane %v7079_v37, %v126_v23 }
  0xe5   :  { %5192 = vmatprep.subr.bf16.mxu1 %v6952_v45  ;;  %v131_v45 = vrot.slane %v7079_v37, %v130_v30 }
  0xe8   :  { %5194 = vmatpush1.bf16.msra.mxu1 %v6960_v46 }
  0xe9   :  { %5196 = vmatprep.subr.bf16.mxu1 %v6963_v49 }
  0xec   :  { %5198 = vmatpush1.bf16.msra.mxu1 %v6971_v58 }
  0xed   :  { %5200 = vmatprep.subr.bf16.mxu1 %v6974_v59 }
  0xf0   :  { %5202 = vmatpush1.bf16.msra.mxu1 %v6982_v3 }
  0xf1   :  { %5204 = vmatprep.subr.bf16.mxu1 %v6985_v6 }
  0xf4   :  { %5206 = vmatpush1.bf16.msra.mxu1 %v6993_v13 }
  0xf5   :  { %5240 = vmatprep.subr.bf16.mxu1 %v6996_v14 }
 0x12a   :  { %v255_v39 = vpop.f32.mrb[0].mxu1 }
 0x12b   :  { %v257_v34 = vpop.f32.mrb[1].mxu1 }
 0x12e   :  { %v261_v46 = vpop.f32.mrb[2].mxu1 }
 0x12f   :  { %v7084_v49 = vadd.f32 %v261_v46, %v127_v40  ;;  %v263_v58 = vpop.f32.mrb[3].mxu1 }
 0x130   :  { %v7086_v59 = vadd.f32 %v263_v58, %v131_v45  ;;  %v256_v58 = vadd.f32 %v255_v39, %v127_v40 }
 0x132   :  { %v267_v3 = vpop.f32.mrb[4].mxu1 }
 0x133   :  { %v7088_v6 = vadd.f32 %v267_v3, %v127_v40  ;;  %v269_v13 = vpop.f32.mrb[5].mxu1  ;;  %v258_v3 = vadd.f32 %v257_v34, %v131_v45 }
 0x134   :  { %v7090_v14 = vadd.f32 %v269_v13, %v131_v45 }
 0x136   :  { %8250 = vst [vmem:[#allocation21_spill] sm:$0xff] %v7090_v14  ;;  %v273_v10 = vpop.f32.mrb[6].mxu1  ;;  %v1950_v14 = vld [vmem:[#allocation13 + $0x98] sm:$0xff] }
 0x137   :  { %v7092_v15 = vadd.f32 %v273_v10, %v127_v40  ;;  %v275_v24 = vpop.f32.mrb[7].mxu1 }
 0x138   :  { %v7094_v25 = vadd.f32 %v275_v24, %v131_v45 }
 0x139   :  { %8251 = vst [vmem:[#allocation22_spill] sm:$0xff] %v7092_v15 }
 0x13a   :  { %8252 = vst [vmem:[#allocation23_spill] sm:$0xff] %v7094_v25  ;;  %v279_v32 = vpop.f32.mrb[8].mxu1 }
 0x13b   :  { %v7096_v12 = vadd.f32 %v279_v32, %v127_v40  ;;  %v281_v47 = vpop.f32.mrb[9].mxu1 }
 0x13c   :  { %v7098_v19 = vadd.f32 %v281_v47, %v131_v45 }
 0x13d   :  { %8253 = vst [vmem:[#allocation24_spill] sm:$0xff] %v7096_v12 }
 0x13e   :  { %8254 = vst [vmem:[#allocation25_spill] sm:$0xff] %v7098_v19  ;;  %v285_v48 = vpop.f32.mrb[10].mxu1 }
 0x13f   :  { %v7100_v50 = vadd.f32 %v285_v48, %v127_v40  ;;  %v287_v55 = vpop.f32.mrb[11].mxu1 }
 0x140   :  { %v7102_v38 = vadd.f32 %v287_v55, %v131_v45 }
 0x141   :  { %8255 = vst [vmem:[#allocation26_spill] sm:$0xff] %v7100_v50 }
 0x142   :  { %8256 = vst [vmem:[#allocation27_spill] sm:$0xff] %v7102_v38  ;;  %v291_v56 = vpop.f32.mrb[12].mxu1 }
 0x143   :  { %v7104_v35 = vadd.f32 %v291_v56, %v127_v40  ;;  %v293_v4 = vpop.f32.mrb[13].mxu1 }
 0x144   :  { %v7106_v5 = vadd.f32 %v293_v4, %v131_v45  ;;  %v134_v4 = vsub.s32 2, %v7073_v22 }
 0x145   :  { %8257 = vst [vmem:[#allocation28_spill] sm:$0xff] %v7104_v35 }
 0x146   :  { %8258 = vst [vmem:[#allocation29_spill] sm:$0xff] %v7106_v5  ;;  %v297_v8 = vpop.f32.mrb[14].mxu1  ;;  %v7115_v39 = vrot.slane %v7079_v37, %v134_v4 }
 0x147   :  { %v7108_v23 = vadd.f32 %v297_v8, %v127_v40  ;;  %v299_v30 = vpop.f32.mrb[15].mxu1  ;;  %v138_v8 = vsub.s32 3, %v7073_v22 }
 0x148   :  { %v7110_v46 = vadd.f32 %v299_v30, %v131_v45  ;;  %8261 = vst [vmem:[#allocation32_spill] sm:$0xff] %v7115_v39  ;;  %v146_v45 = vsub.s32 5, %v7073_v22 }
 0x149   :  { %8259 = vst [vmem:[#allocation30_spill] sm:$0xff] %v7108_v23  ;;  %v7118_v40 = vrot.slane %v7079_v37, %v138_v8 }
 0x14a   :  { %8260 = vst [vmem:[#allocation31_spill] sm:$0xff] %v7110_v46 }
 0x14b   :  { %8262 = vst [vmem:[#allocation33_spill] sm:$0xff] %v7118_v40 }
 0x14c   :  { %v847_v13 = vpop.f32.mrb[16].mxu0 }
 0x14d   :  { %v923_v10 = vadd.f32 %v847_v13, %v256_v58  ;;  %v849_v24 = vpop.f32.mrb[17].mxu0 }
 0x14e   :  { %v924_v32 = vadd.f32 %v849_v24, %v258_v3  ;;  %v142_v3 = vsub.s32 4, %v7073_v22 }
 0x14f   :  { %v4878_v56 = vmul.f32 -1.442695, %v923_v10 }
 0x150   :  { %v4879_v55 = vmul.f32 -1.442695, %v924_v32  ;;  %v7128_v32 = vrot.slane %v7079_v37, %v142_v3 }
 0x152   :  { %6211 = vpow2.f32 %v4879_v55  ;;  %8264 = vst [vmem:[#allocation35_spill] sm:$0xff] %v7128_v32 }
 0x153   :  { %6213 = vpow2.f32 %v4878_v56 }
 0x15c   :  { %v6212_v0 = vpop.eup %6211 }
 0x15d   :  { %v6214_v23 = vpop.eup %6213  ;;  %v1155_v30 = vadd.f32 1.0, %v6212_v0  ;;  %v7125_v0 = vrot.slane %v7079_v37, %v146_v45 }
 0x15e   :  { %v1149_v34 = vadd.f32 1.0, %v6214_v23 }
 0x15f   :  { %6215 = vrcp.f32 %v1155_v30  ;;  %8263 = vst [vmem:[#allocation34_spill] sm:$0xff] %v7125_v0 }
 0x160   :  { %6217 = vrcp.f32 %v1149_v34 }
 0x169   :  { %v6216_v4 = vpop.eup %6215 }
 0x16a   :  { %v6218_v8 = vpop.eup %6217  ;;  %v1165_v46 = vmul.f32 0.0, %v6216_v4 }
 0x16c   :  { %v1065_v47 = vpop.f32.mrb[14].mxu0 }
 0x16d   :  { %v1067_v48 = vpop.f32.mrb[15].mxu0  ;;  %v6133_v56 = vadd.f32 %v1065_v47, %v7128_v32  ;;  %v154_v47 = vsub.s32 7, %v7073_v22 }
 0x16e   :  { %v6134_v55 = vadd.f32 %v1067_v48, %v7125_v0  ;;  %v150_v48 = vsub.s32 6, %v7073_v22 }
 0x16f   :  { %v4881_v34 = vmul.f32 -1.442695, %v6133_v56 }
 0x170   :  { %v4882_v30 = vmul.f32 -1.442695, %v6134_v55  ;;  %v7138_v4 = vrot.slane %v7079_v37, %v150_v48  ;;  %v1723_v48 = vld [vmem:[#allocation11 + $0x50] sm:$0xff] }
 0x18a   :  { %v918_v58 = vpop.f32.mrb[16].mxu1 }
 0x18b   :  { %v6103_v13 = vadd.f32 %v918_v58, %v7115_v39  ;;  %v920_v10 = vpop.f32.mrb[17].mxu1 }
 0x18c   :  { %v6104_v24 = vadd.f32 %v920_v10, %v7118_v40 }
 0x18d   :  { %6219 = vtanh.f32 %v6103_v13 }
 0x18e   :  { %v4880_v23 = vmul.f32 -1.442695, %v6104_v24 }
 0x190   :  { %6221 = vpow2.f32 %v4880_v23 }
 0x191   :  { %6223 = vpow2.f32 %v4882_v30 }
 0x192   :  { %6225 = vpow2.f32 %v4881_v34 }
 0x197   :  { %v6220_v58 = vpop.eup %6219 }
 0x198   :  { %v1166_v10 = vmul.f32 %v6220_v58, %v6218_v8 }
 0x19a   :  { %v6222_v13 = vpop.eup %6221  ;;  %v7132_v45 = vadd.f32 %v1166_v10, %v1165_v46  ;;  %v7141_v46 = vrot.slane %v7079_v37, %v154_v47  ;;  %v8267_v37 = vmov 0.0  }
 0x19b   :  { %v1162_v24 = vadd.f32 1.0, %v6222_v13  ;;  %v6224_v3 = vpop.eup %6223 }
 0x19c   :  { %6227 = vtanh.f32 %v7132_v45  ;;  %v6226_v23 = vpop.eup %6225  ;;  %v1180_v56 = vadd.f32 1.0, %v6224_v3  ;;  %8265 = vst [vmem:[#allocation36_spill] sm:$0xff] %v7141_v46  ;;  %v1727_v3 = vld [vmem:[#allocation11 + $0x70] sm:$0xff] }
 0x19d   :  { %6229 = vrcp.f32 %v1162_v24  ;;  %v1174_v8 = vadd.f32 1.0, %v6226_v23  ;;  %v7209_v47 = vpack.c.bf16 %v1727_v3, %v1723_v48  ;;  %v1730_v23 = vld [vmem:[#allocation11 + $0x88] sm:$0xff]  ;;  %v1747_v3 = vld [vmem:[#allocation11 + $0x110] sm:$0xff] }
 0x19e   :  { %6231 = vrcp.f32 %v1180_v56  ;;  %v1732_v56 = vld [vmem:[#allocation11 + $0x98] sm:$0xff] }
 0x19f   :  { %6233 = vrcp.f32 %v1174_v8 }
 0x1a6   :  { %v6228_v55 = vpop.eup %6227 }
 0x1a7   :  { %v6230_v5 = vpop.eup %6229 }
 0x1a8   :  { %v7143_v30 = vmul.f32 %v6230_v5, %v6228_v55  ;;  %v1734_v55 = vld [vmem:[#allocation11 + $0xa8] sm:$0xff] }
 0x1a9   :  { %v7214_v8 = vpack.c.bf16 %v1734_v55, %v1730_v23  ;;  %v1751_v23 = vld [vmem:[#allocation11 + $0x130] sm:$0xff] }
 0x1aa   :  { %8266 = vst [vmem:[#allocation37_spill] sm:$0xff] %v7143_v30  ;;  %v1136_v58 = vpop.f32.mrb[46].mxu1  ;;  %1344 = vmatmul.mubr.f32.vlgmr.msra.gmra.mrb[18].mxu0 %v7143_v30  ;;  %1415 = vmatmul.mubr.f32.vlgmr.msra.gmra.mrb[18].mxu1 %v7143_v30  ;;  %v7245_v55 = vpack.c.bf16 %v1751_v23, %v1747_v3  ;;  %v1763_v23 = vld [vmem:[#allocation11 + $0x190] sm:$0xff] }
 0x1ab   :  { %v6149_v22 = vadd.f32 %v1136_v58, %v7138_v4  ;;  %v1138_v34 = vpop.f32.mrb[47].mxu1  ;;  %5210 = vmatpush1.bf16.msra.mxu0 %v6841_v52  ;;  %5242 = vmatpush1.bf16.msra.mxu1 %v7004_v20  ;;  %v6232_v52 = vpop.eup %6231  ;;  %v1736_v58 = vld [vmem:[#allocation11 + $0xb8] sm:$0xff] }
 0x1ac   :  { %v6150_v10 = vadd.f32 %v1138_v34, %v7141_v46  ;;  %5212 = vmatprep.subr.bf16.mxu0 %v6844_v60  ;;  %5244 = vmatprep.subr.bf16.mxu1 %v7007_v21  ;;  %v6234_v60 = vpop.eup %6233  ;;  %v1733_v34 = vld [vmem:[#allocation11 + $0xa0] sm:$0xff] }
 0x1ad   :  { %6235 = vtanh.f32 %v6149_v22  ;;  %1561 = vmatprep.mubr.f32.mxu0 %v8267_v37  ;;  %1632 = vmatprep.mubr.f32.mxu1 %v8267_v37  ;;  %v1729_v22 = vld [vmem:[#allocation11 + $0x80] sm:$0xff] }
 0x1ae   :  { %v4883_v5 = vmul.f32 -1.442695, %v6150_v10  ;;  %v7216_v10 = vpack.c.bf16 %v1736_v58, %v1732_v56  ;;  %v1754_v56 = vld [vmem:[#allocation11 + $0x148] sm:$0xff] }
 0x1af   :  { %5214 = vmatpush1.bf16.msra.mxu0 %v6851_v7  ;;  %5246 = vmatpush1.bf16.msra.mxu1 %v7013_v27  ;;  %v1190_v7 = vmul.f32 0.0, %v6232_v52  ;;  %v1731_v52 = vld [vmem:[#allocation11 + $0x90] sm:$0xff]  ;;  %v1758_v58 = vld [vmem:[#allocation11 + $0x168] sm:$0xff] }
 0x1b0   :  { %6237 = vpow2.f32 %v4883_v5  ;;  %5216 = vmatprep.subr.bf16.mxu0 %v6856_v9  ;;  %5248 = vmatprep.subr.bf16.mxu1 %v7017_v28  ;;  %v7218_v5 = vpack.c.bf16 %v1733_v34, %v1729_v22  ;;  %v1756_v22 = vld [vmem:[#allocation11 + $0x158] sm:$0xff]  ;;  %v7250_v34 = vpack.c.bf16 %v1758_v58, %v1754_v56  ;;  %v1767_v56 = vld [vmem:[#allocation11 + $0x1b0] sm:$0xff] }
 0x1b1   :  { %v7269_v58 = vpack.c.bf16 %v1767_v56, %v1763_v23  ;;  %v1932_v23 = vld [vmem:[#allocation13 + $0x8] sm:$0xff] }
 0x1b2   :  { %v1936_v56 = vld [vmem:[#allocation13 + $0x28] sm:$0xff] }
 0x1b3   :  { %5218 = vmatpush1.bf16.msra.mxu0 %v6863_v17  ;;  %5250 = vmatpush1.bf16.msra.mxu1 %v7020_v36 }
 0x1b4   :  { %5220 = vmatprep.subr.bf16.mxu0 %v6867_v18  ;;  %5252 = vmatprep.subr.bf16.mxu1 %v7023_v41  ;;  %v1715_v41 = vld [vmem:[#allocation11 + $0x10] sm:$0xff] }
 0x1b7   :  { %v6236_v20 = vpop.eup %6235  ;;  %5222 = vmatpush1.bf16.msra.mxu0 %v6873_v29  ;;  %5254 = vmatpush1.bf16.msra.mxu1 %v7026_v16  ;;  %v1719_v16 = vld [vmem:[#allocation11 + $0x30] sm:$0xff] }
 0x1b8   :  { %v1191_v21 = vmul.f32 %v6236_v20, %v6234_v60  ;;  %5224 = vmatprep.subr.bf16.mxu0 %v6876_v31  ;;  %5256 = vmatprep.subr.bf16.mxu1 %v7029_v2  ;;  %v7197_v2 = vpack.c.bf16 %v1719_v16, %v1715_v41  ;;  %v1735_v60 = vld [vmem:[#allocation11 + $0xb0] sm:$0xff]  ;;  %v1746_v41 = vld [vmem:[#allocation11 + $0x108] sm:$0xff] }
 0x1b9   :  { %v7221_v20 = vpack.c.bf16 %v1735_v60, %v1731_v52  ;;  %v1750_v16 = vld [vmem:[#allocation11 + $0x128] sm:$0xff]  ;;  %v1760_v52 = vld [vmem:[#allocation11 + $0x178] sm:$0xff]  ;;  %v1753_v60 = vld [vmem:[#allocation11 + $0x140] sm:$0xff] }
 0x1ba   :  { %v6238_v9 = vpop.eup %6237  ;;  %v7167_v17 = vadd.f32 %v1191_v21, %v1190_v7  ;;  %v1738_v7 = vld [vmem:[#allocation11 + $0xc8] sm:$0xff] }
 0x1bb   :  { %v1187_v27 = vadd.f32 1.0, %v6238_v9  ;;  %5226 = vmatpush1.bf16.msra.mxu0 %v6882_v42  ;;  %5258 = vmatpush1.bf16.msra.mxu1 %v7032_v33  ;;  %v1714_v42 = vld [vmem:[#allocation11 + $0x8] sm:$0xff]  ;;  %v1740_v9 = vld [vmem:[#allocation11 + $0xd8] sm:$0xff] }
 0x1bc   :  { %6239 = vtanh.f32 %v7167_v17  ;;  %5228 = vmatprep.subr.bf16.mxu0 %v6885_v43  ;;  %5260 = vmatprep.subr.bf16.mxu1 %v7035_v44  ;;  %v1718_v43 = vld [vmem:[#allocation11 + $0x28] sm:$0xff] }
 0x1bd   :  { %6241 = vrcp.f32 %v1187_v27  ;;  %v1722_v33 = vld [vmem:[#allocation11 + $0x48] sm:$0xff] }
 0x1be   :  { %v1726_v44 = vld [vmem:[#allocation11 + $0x68] sm:$0xff] }
 0x1bf   :  { %5230 = vmatpush1.bf16.msra.mxu0 %v6891_v51  ;;  %5262 = vmatpush1.bf16.msra.mxu1 %v7038_v54  ;;  %v1716_v51 = vld [vmem:[#allocation11 + $0x18] sm:$0xff]  ;;  %v1742_v21 = vld [vmem:[#allocation11 + $0xe8] sm:$0xff] }
 0x1c0   :  { %5232 = vmatprep.subr.bf16.mxu0 %v6894_v53  ;;  %5264 = vmatprep.subr.bf16.mxu1 %v7041_v26  ;;  %v7190_v53 = vpack.c.bf16 %v1718_v43, %v1714_v42  ;;  %v1724_v54 = vld [vmem:[#allocation11 + $0x58] sm:$0xff]  ;;  %v7202_v26 = vpack.c.bf16 %v1726_v44, %v1722_v33  ;;  %v7226_v27 = vpack.c.bf16 %v1742_v21, %v1738_v7  ;;  %v1741_v42 = vld [vmem:[#allocation11 + $0xe0] sm:$0xff] }
 0x1c1   :  { %v1748_v33 = vld [vmem:[#allocation11 + $0x118] sm:$0xff]  ;;  %v7238_v44 = vpack.c.bf16 %v1750_v16, %v1746_v41  ;;  %v1757_v7 = vld [vmem:[#allocation11 + $0x160] sm:$0xff]  ;;  %v7252_v21 = vpack.c.bf16 %v1760_v52, %v1756_v22  ;;  %v1770_v22 = vld [vmem:[#allocation11 + $0x1c8] sm:$0xff] }
 0x1c2   :  { %v1764_v41 = vld [vmem:[#allocation11 + $0x198] sm:$0xff]  ;;  %v1774_v52 = vld [vmem:[#allocation11 + $0x1e8] sm:$0xff] }
 0x1c3   :  { %5234 = vmatpush1.bf16.msra.mxu0 %v6900_v62  ;;  %5266 = vmatpush1.bf16.msra.mxu1 %v7044_v61  ;;  %v1720_v62 = vld [vmem:[#allocation11 + $0x38] sm:$0xff] }
 0x1c4   :  { %5236 = vmatprep.subr.bf16.mxu0 %v6903_v63  ;;  %5268 = vmatprep.subr.bf16.mxu1 %v7047_v1  ;;  %v1713_v63 = vld [vmem:[#allocation11] sm:$0xff]  ;;  %v7192_v28 = vpack.c.bf16 %v1720_v62, %v1716_v51  ;;  %v1728_v61 = vld [vmem:[#allocation11 + $0x78] sm:$0xff]  ;;  %v1739_v62 = vld [vmem:[#allocation11 + $0xd0] sm:$0xff] }
 0x1c5   :  { %v1721_v1 = vld [vmem:[#allocation11 + $0x40] sm:$0xff]  ;;  %v7204_v13 = vpack.c.bf16 %v1728_v61, %v1724_v54  ;;  %v1752_v54 = vld [vmem:[#allocation11 + $0x138] sm:$0xff] }
 0x1c6   :  { %v6240_v18 = vpop.eup %6239  ;;  %v1745_v61 = vld [vmem:[#allocation11 + $0x100] sm:$0xff] }
 0x1c7   :  { %v6242_v29 = vpop.eup %6241  ;;  %5238 = vmatpush1.bf16.msra.mxu0 %v6909_v11  ;;  %5270 = vmatpush1.bf16.msra.mxu1 %v7050_v57  ;;  %v1717_v11 = vld [vmem:[#allocation11 + $0x20] sm:$0xff] }
 0x1c8   :  { %v7184_v31 = vmul.f32 %v6242_v29, %v6240_v18  ;;  %v7194_v36 = vpack.c.bf16 %v1717_v11, %v1713_v63  ;;  %5272 = vmatprep.subr.bf16.mxu0 %v7190_v53  ;;  %5304 = vmatprep.subr.bf16.mxu1 %v7192_v28  ;;  %v1725_v57 = vld [vmem:[#allocation11 + $0x60] sm:$0xff]  ;;  %v1744_v18 = vld [vmem:[#allocation11 + $0xf8] sm:$0xff]  ;;  %v1743_v63 = vld [vmem:[#allocation11 + $0xf0] sm:$0xff] }
 0x1c9   :  { %v7206_v24 = vpack.c.bf16 %v1725_v57, %v1721_v1  ;;  %v1737_v29 = vld [vmem:[#allocation11 + $0xc0] sm:$0xff]  ;;  %v7228_v43 = vpack.c.bf16 %v1744_v18, %v1740_v9  ;;  %v7233_v11 = vpack.c.bf16 %v1743_v63, %v1739_v62  ;;  %v7240_v57 = vpack.c.bf16 %v1752_v54, %v1748_v33  ;;  %v1755_v18 = vld [vmem:[#allocation11 + $0x150] sm:$0xff]  ;;  %v1762_v62 = vld [vmem:[#allocation11 + $0x188] sm:$0xff] }
 0x1ca   :  { %8268 = vst [vmem:[#allocation38_spill] sm:$0xff] %v7184_v31  ;;  %1562 = vmatmul.mubr.f32.vlgmr.msra.gmra.mrb[12].mxu0 %v7184_v31  ;;  %1633 = vmatmul.mubr.f32.vlgmr.msra.gmra.mrb[44].mxu1 %v7184_v31  ;;  %v7230_v51 = vpack.c.bf16 %v1741_v42, %v1737_v29  ;;  %v1749_v1 = vld [vmem:[#allocation11 + $0x120] sm:$0xff]  ;;  %v7254_v9 = vpack.c.bf16 %v1757_v7, %v1753_v60  ;;  %v1759_v29 = vld [vmem:[#allocation11 + $0x170] sm:$0xff]  ;;  %v1766_v63 = vld [vmem:[#allocation11 + $0x1a8] sm:$0xff] }
 0x1cb   :  { %1841 = vmatprep.mubr.f32.mxu0 %v8267_v37  ;;  %1912 = vmatprep.mubr.f32.mxu1 %v8267_v37  ;;  %v7242_v48 = vpack.c.bf16 %v1749_v1, %v1745_v61  ;;  %v7257_v42 = vpack.c.bf16 %v1759_v29, %v1755_v18  ;;  %v7262_v16 = vpack.c.bf16 %v1766_v63, %v1762_v62  ;;  %v1768_v33 = vld [vmem:[#allocation11 + $0x1b8] sm:$0xff]  ;;  %v1761_v54 = vld [vmem:[#allocation11 + $0x180] sm:$0xff] }
 0x1cc   :  { %5274 = vmatpush1.bf16.msra.mxu0 %v7194_v36  ;;  %5306 = vmatpush1.bf16.msra.mxu1 %v7197_v2  ;;  %v1765_v61 = vld [vmem:[#allocation11 + $0x1a0] sm:$0xff]  ;;  %v7264_v1 = vpack.c.bf16 %v1768_v33, %v1764_v41  ;;  %v1772_v60 = vld [vmem:[#allocation11 + $0x1d8] sm:$0xff]  ;;  %v7274_v7 = vpack.c.bf16 %v1774_v52, %v1770_v22  ;;  %v1771_v33 = vld [vmem:[#allocation11 + $0x1d0] sm:$0xff]  ;;  %v7286_v52 = vpack.c.bf16 %v1936_v56, %v1932_v23 }
 0x1cd   :  { %5276 = vmatprep.subr.bf16.mxu0 %v7202_v26  ;;  %5308 = vmatprep.subr.bf16.mxu1 %v7204_v13  ;;  %v7266_v3 = vpack.c.bf16 %v1765_v61, %v1761_v54  ;;  %v1776_v18 = vld [vmem:[#allocation11 + $0x1f8] sm:$0xff]  ;;  %v1769_v29 = vld [vmem:[#allocation11 + $0x1c0] sm:$0xff]  ;;  %v1775_v54 = vld [vmem:[#allocation11 + $0x1f0] sm:$0xff] }
 0x1ce   :  { %v1773_v62 = vld [vmem:[#allocation11 + $0x1e0] sm:$0xff]  ;;  %v7276_v63 = vpack.c.bf16 %v1776_v18, %v1772_v60  ;;  %v7281_v61 = vpack.c.bf16 %v1775_v54, %v1771_v33  ;;  %v1934_v22 = vld [vmem:[#allocation13 + $0x18] sm:$0xff] }
 0x1cf   :  { %v7278_v41 = vpack.c.bf16 %v1773_v62, %v1769_v29  ;;  %v1938_v60 = vld [vmem:[#allocation13 + $0x38] sm:$0xff] }
 0x1d0   :  { %5278 = vmatpush1.bf16.msra.mxu0 %v7206_v24  ;;  %5310 = vmatpush1.bf16.msra.mxu1 %v7209_v47  ;;  %v7288_v18 = vpack.c.bf16 %v1938_v60, %v1934_v22 }
 0x1d1   :  { %5280 = vmatprep.subr.bf16.mxu0 %v7214_v8  ;;  %5312 = vmatprep.subr.bf16.mxu1 %v7216_v10 }
 0x1d4   :  { %5282 = vmatpush1.bf16.msra.mxu0 %v7218_v5  ;;  %5314 = vmatpush1.bf16.msra.mxu1 %v7221_v20 }
 0x1d5   :  { %5284 = vmatprep.subr.bf16.mxu0 %v7226_v27  ;;  %5316 = vmatprep.subr.bf16.mxu1 %v7228_v43 }
 0x1d8   :  { %5286 = vmatpush1.bf16.msra.mxu0 %v7230_v51  ;;  %5318 = vmatpush1.bf16.msra.mxu1 %v7233_v11 }
 0x1d9   :  { %5288 = vmatprep.subr.bf16.mxu0 %v7238_v44  ;;  %5320 = vmatprep.subr.bf16.mxu1 %v7240_v57 }
 0x1dc   :  { %5290 = vmatpush1.bf16.msra.mxu0 %v7242_v48  ;;  %5322 = vmatpush1.bf16.msra.mxu1 %v7245_v55 }
 0x1dd   :  { %5292 = vmatprep.subr.bf16.mxu0 %v7250_v34  ;;  %5324 = vmatprep.subr.bf16.mxu1 %v7252_v21 }
 0x1e0   :  { %5294 = vmatpush1.bf16.msra.mxu0 %v7254_v9  ;;  %5326 = vmatpush1.bf16.msra.mxu1 %v7257_v42 }
 0x1e1   :  { %5296 = vmatprep.subr.bf16.mxu0 %v7262_v16  ;;  %5328 = vmatprep.subr.bf16.mxu1 %v7264_v1 }
 0x1e4   :  { %5298 = vmatpush1.bf16.msra.mxu0 %v7266_v3  ;;  %5330 = vmatpush1.bf16.msra.mxu1 %v7269_v58 }
 0x1e5   :  { %5300 = vmatprep.subr.bf16.mxu0 %v7274_v7  ;;  %5332 = vmatprep.subr.bf16.mxu1 %v7276_v63 }
 0x1e8   :  { %5302 = vmatpush1.bf16.msra.mxu0 %v7278_v41  ;;  %5334 = vmatpush1.bf16.msra.mxu1 %v7281_v61 }
 0x1e9   :  { %5336 = vmatprep.subr.bf16.mxu0 %v7286_v52  ;;  %5368 = vmatprep.subr.bf16.mxu1 %v7288_v18 }
 0x27d   :  { %v1345_v29 = vpop.f32.mrb[18].mxu0  ;;  %v1416_v62 = vpop.f32.mrb[18].mxu1 }
 0x27e   :  { %v1421_v33 = vadd.f32 %v1345_v29, %v7084_v49  ;;  %v1347_v54 = vpop.f32.mrb[19].mxu0  ;;  %v1418_v31 = vpop.f32.mrb[19].mxu1  ;;  %v6105_v22 = vadd.f32 %v1416_v62, %v7115_v39  ;;  %v1948_v39 = vld [vmem:[#allocation13 + $0x88] sm:$0xff] }
 0x27f   :  { %v1422_v30 = vadd.f32 %v1347_v54, %v7086_v59  ;;  %v6106_v23 = vadd.f32 %v1418_v31, %v7118_v40  ;;  %v1952_v40 = vld [vmem:[#allocation13 + $0xa8] sm:$0xff] }
 0x280   :  { %v4884_v35 = vmul.f32 -1.442695, %v1421_v33 }
 0x281   :  { %v4885_v38 = vmul.f32 -1.442695, %v1422_v30  ;;  %v4886_v56 = vmul.f32 -1.442695, %v6106_v23 }
 0x282   :  { %6243 = vpow2.f32 %v4884_v35 }
 0x283   :  { %6245 = vpow2.f32 %v4885_v38 }
 0x284   :  { %6247 = vpow2.f32 %v4886_v56 }
 0x285   :  { %6249 = vtanh.f32 %v6105_v22 }
 0x28c   :  { %v6244_v60 = vpop.eup %6243 }
 0x28d   :  { %v6246_v50 = vpop.eup %6245  ;;  %v1647_v19 = vadd.f32 1.0, %v6244_v60 }
 0x28e   :  { %v1653_v12 = vadd.f32 1.0, %v6246_v50  ;;  %v6248_v49 = vpop.eup %6247 }
 0x28f   :  { %6251 = vrcp.f32 %v1647_v19  ;;  %v6250_v29 = vpop.eup %6249  ;;  %v1660_v35 = vadd.f32 1.0, %v6248_v49  ;;  %v1935_v49 = vld [vmem:[#allocation13 + $0x20] sm:$0xff] }
 0x290   :  { %6253 = vrcp.f32 %v1653_v12 }
 0x291   :  { %6255 = vrcp.f32 %v1660_v35  ;;  %v1942_v35 = vld [vmem:[#allocation13 + $0x58] sm:$0xff] }
 0x299   :  { %v6252_v59 = vpop.eup %6251 }
 0x29a   :  { %v6254_v33 = vpop.eup %6253  ;;  %v1664_v30 = vmul.f32 %v6252_v59, %v6250_v29  ;;  %v1933_v29 = vld [vmem:[#allocation13 + $0x10] sm:$0xff] }
 0x29b   :  { %v1663_v38 = vmul.f32 %v6254_v33, %v7132_v45  ;;  %v1931_v45 = vld [vmem:[#allocation13] sm:$0xff]  ;;  %v1937_v59 = vld [vmem:[#allocation13 + $0x30] sm:$0xff]  ;;  %v1940_v33 = vld [vmem:[#allocation13 + $0x48] sm:$0xff] }
 0x29d   :  { %v7297_v31 = vadd.f32 %v1664_v30, %v1663_v38  ;;  %v1563_v54 = vpop.f32.mrb[12].mxu0  ;;  %v1634_v62 = vpop.f32.mrb[44].mxu1  ;;  %v1944_v30 = vld [vmem:[#allocation13 + $0x68] sm:$0xff]  ;;  %v1946_v38 = vld [vmem:[#allocation13 + $0x78] sm:$0xff] }
 0x29e   :  { %v6131_v23 = vadd.f32 %v1563_v54, %v7128_v32  ;;  %v1565_v56 = vpop.f32.mrb[13].mxu0  ;;  %v1636_v22 = vpop.f32.mrb[45].mxu1  ;;  %v1941_v32 = vld [vmem:[#allocation13 + $0x50] sm:$0xff] }
 0x29f   :  { %8269 = vst [vmem:[#allocation39_spill] sm:$0xff] %v7297_v31  ;;  %v6132_v19 = vadd.f32 %v1565_v56, %v7125_v0  ;;  %6257 = vtanh.f32 %v7297_v31  ;;  %v6148_v60 = vadd.f32 %v1636_v22, %v7141_v46  ;;  %v6256_v54 = vpop.eup %6255  ;;  %v7303_v56 = vpack.c.bf16 %v1935_v49, %v1931_v45  ;;  %v1945_v31 = vld [vmem:[#allocation13 + $0x70] sm:$0xff] }
 0x2a0   :  { %v4887_v12 = vmul.f32 -1.442695, %v6131_v23  ;;  %v7305_v0 = vpack.c.bf16 %v1937_v59, %v1933_v29  ;;  %v1939_v23 = vld [vmem:[#allocation13 + $0x40] sm:$0xff]  ;;  %v7312_v46 = vpack.c.bf16 %v1946_v38, %v1942_v35  ;;  %v7324_v35 = vpack.c.bf16 %v1952_v40, %v1948_v39 }
 0x2a1   :  { %v4888_v50 = vmul.f32 -1.442695, %v6132_v19  ;;  %v4889_v15 = vmul.f32 -1.442695, %v6148_v60  ;;  %8270 = vst [vmem:[#allocation40_spill] sm:$0xff] %v7303_v56  ;;  %v1943_v19 = vld [vmem:[#allocation13 + $0x60] sm:$0xff] }
 0x2a2   :  { %6259 = vpow2.f32 %v4887_v12  ;;  %8271 = vst [vmem:[#allocation41_spill] sm:$0xff] %v7305_v0  ;;  %v6147_v12 = vadd.f32 %v1634_v62, %v7138_v4  ;;  %8274 = vst [vmem:[#allocation44_spill] sm:$0xff] %v7312_v46  ;;  %v1954_v60 = vld [vmem:[#allocation13 + $0xb8] sm:$0xff]  ;;  %v7320_v62 = vpack.c.bf16 %v1945_v31, %v1941_v32  ;;  %v1947_v59 = vld [vmem:[#allocation13 + $0x80] sm:$0xff] }
 0x2a3   :  { %6261 = vpow2.f32 %v4888_v50  ;;  %v7310_v50 = vpack.c.bf16 %v1944_v30, %v1940_v33  ;;  %v1951_v33 = vld [vmem:[#allocation13 + $0xa0] sm:$0xff]  ;;  %8277 = vst [vmem:[#allocation47_spill] sm:$0xff] %v7324_v35  ;;  %v7326_v38 = vpack.c.bf16 %v1954_v60, %v1950_v14  ;;  %v1962_v32 = vld [vmem:[#allocation13 + $0xf8] sm:$0xff] }
 0x2a4   :  { %6263 = vpow2.f32 %v4889_v15  ;;  %8276 = vst [vmem:[#allocation46_spill] sm:$0xff] %v7320_v62  ;;  %v1949_v15 = vld [vmem:[#allocation13 + $0x90] sm:$0xff]  ;;  %v7332_v39 = vpack.c.bf16 %v1951_v33, %v1947_v59  ;;  %v1955_v40 = vld [vmem:[#allocation13 + $0xc0] sm:$0xff] }
 0x2a5   :  { %8273 = vst [vmem:[#allocation43_spill] sm:$0xff] %v7310_v50  ;;  %6265 = vtanh.f32 %v6147_v12  ;;  %8278 = vst [vmem:[#allocation48_spill] sm:$0xff] %v7326_v38  ;;  %v1959_v31 = vld [vmem:[#allocation13 + $0xe0] sm:$0xff] }
 0x2a6   :  { %8279 = vst [vmem:[#allocation49_spill] sm:$0xff] %v7332_v39  ;;  %v7344_v59 = vpack.c.bf16 %v1959_v31, %v1955_v40  ;;  %v1978_v40 = vld [vmem:[#allocation13 + $0x178] sm:$0xff] }
 0x2a8   :  { %8283 = vst [vmem:[#allocation53_spill] sm:$0xff] %v7344_v59 }
 0x2a9   :  { %v6258_v25 = vpop.eup %6257 }
 0x2aa   :  { %v7308_v22 = vmul.f32 %v6258_v25, %v6256_v54  ;;  %v7318_v25 = vpack.c.bf16 %v1943_v19, %v1939_v23  ;;  %v1953_v54 = vld [vmem:[#allocation13 + $0xb0] sm:$0xff]  ;;  %v1960_v23 = vld [vmem:[#allocation13 + $0xe8] sm:$0xff]  ;;  %v1958_v19 = vld [vmem:[#allocation13 + $0xd8] sm:$0xff] }
 0x2ab   :  { %v7334_v14 = vpack.c.bf16 %v1953_v54, %v1949_v15  ;;  %v7340_v60 = vpack.c.bf16 %v1962_v32, %v1958_v19  ;;  %v1963_v15 = vld [vmem:[#allocation13 + $0x100] sm:$0xff]  ;;  %v1965_v19 = vld [vmem:[#allocation13 + $0x110] sm:$0xff] }
 0x2ac   :  { %8272 = vst [vmem:[#allocation42_spill] sm:$0xff] %v7308_v22  ;;  %v6260_v45 = vpop.eup %6259  ;;  %1842 = vmatmul.mubr.f32.vlgmr.msra.gmra.mrb[20].mxu0 %v7308_v22  ;;  %1913 = vmatmul.mubr.f32.vlgmr.msra.gmra.mrb[20].mxu1 %v7308_v22  ;;  %8275 = vst [vmem:[#allocation45_spill] sm:$0xff] %v7318_v25  ;;  %v1968_v22 = vld [vmem:[#allocation13 + $0x128] sm:$0xff]  ;;  %v1967_v54 = vld [vmem:[#allocation13 + $0x120] sm:$0xff] }
 0x2ad   :  { %v6262_v49 = vpop.eup %6261  ;;  %v1672_v29 = vadd.f32 1.0, %v6260_v45  ;;  %5338 = vmatpush1.bf16.msra.mxu0 %v7303_v56  ;;  %5370 = vmatpush1.bf16.msra.mxu1 %v7305_v0  ;;  %v1956_v45 = vld [vmem:[#allocation13 + $0xc8] sm:$0xff]  ;;  %8280 = vst [vmem:[#allocation50_spill] sm:$0xff] %v7334_v14  ;;  %8282 = vst [vmem:[#allocation52_spill] sm:$0xff] %v7340_v60  ;;  %v1969_v32 = vld [vmem:[#allocation13 + $0x130] sm:$0xff] }
 0x2ae   :  { %v1678_v30 = vadd.f32 1.0, %v6262_v49  ;;  %5340 = vmatprep.subr.bf16.mxu0 %v7310_v50  ;;  %5372 = vmatprep.subr.bf16.mxu1 %v7312_v46  ;;  %v7338_v12 = vpack.c.bf16 %v1960_v23, %v1956_v45  ;;  %v1957_v49 = vld [vmem:[#allocation13 + $0xd0] sm:$0xff] }
 0x2af   :  { %6267 = vrcp.f32 %v1672_v29  ;;  %2059 = vmatprep.mubr.f32.mxu0 %v8267_v37  ;;  %2130 = vmatprep.mubr.f32.mxu1 %v8267_v37  ;;  %v1961_v29 = vld [vmem:[#allocation13 + $0xf0] sm:$0xff] }
 0x2b0   :  { %6269 = vrcp.f32 %v1678_v30  ;;  %8281 = vst [vmem:[#allocation51_spill] sm:$0xff] %v7338_v12  ;;  %v1964_v30 = vld [vmem:[#allocation13 + $0x108] sm:$0xff]  ;;  %v7346_v33 = vpack.c.bf16 %v1961_v29, %v1957_v49  ;;  %v7356_v29 = vpack.c.bf16 %v1967_v54, %v1963_v15  ;;  %v1977_v0 = vld [vmem:[#allocation13 + $0x170] sm:$0xff] }
 0x2b1   :  { %5342 = vmatpush1.bf16.msra.mxu0 %v7318_v25  ;;  %5374 = vmatpush1.bf16.msra.mxu1 %v7320_v62  ;;  %v1966_v25 = vld [vmem:[#allocation13 + $0x118] sm:$0xff]  ;;  %v7350_v45 = vpack.c.bf16 %v1968_v22, %v1964_v30  ;;  %v1971_v22 = vld [vmem:[#allocation13 + $0x140] sm:$0xff]  ;;  %v1984_v54 = vld [vmem:[#allocation13 + $0x1a8] sm:$0xff] }
 0x2b2   :  { %5344 = vmatprep.subr.bf16.mxu0 %v7324_v35  ;;  %5376 = vmatprep.subr.bf16.mxu1 %v7326_v38  ;;  %v1970_v62 = vld [vmem:[#allocation13 + $0x138] sm:$0xff]  ;;  %8284 = vst [vmem:[#allocation54_spill] sm:$0xff] %v7346_v33  ;;  %v1972_v38 = vld [vmem:[#allocation13 + $0x148] sm:$0xff] }
 0x2b3   :  { %v7352_v23 = vpack.c.bf16 %v1970_v62, %v1966_v25  ;;  %v1976_v35 = vld [vmem:[#allocation13 + $0x168] sm:$0xff]  ;;  %v1975_v25 = vld [vmem:[#allocation13 + $0x160] sm:$0xff] }
 0x2b4   :  { %v7362_v46 = vpack.c.bf16 %v1976_v35, %v1972_v38  ;;  %v1979_v38 = vld [vmem:[#allocation13 + $0x180] sm:$0xff] }
 0x2b5   :  { %5346 = vmatpush1.bf16.msra.mxu0 %v7332_v39  ;;  %5378 = vmatpush1.bf16.msra.mxu1 %v7334_v14  ;;  %v6264_v39 = vpop.eup %6263  ;;  %v1974_v14 = vld [vmem:[#allocation13 + $0x158] sm:$0xff] }
 0x2b6   :  { %5348 = vmatprep.subr.bf16.mxu0 %v7338_v12  ;;  %5380 = vmatprep.subr.bf16.mxu1 %v7340_v60  ;;  %v6266_v31 = vpop.eup %6265  ;;  %v7358_v60 = vpack.c.bf16 %v1969_v32, %v1965_v19  ;;  %v1685_v12 = vadd.f32 1.0, %v6264_v39  ;;  %v7364_v50 = vpack.c.bf16 %v1978_v40, %v1974_v14  ;;  %v1982_v19 = vld [vmem:[#allocation13 + $0x198] sm:$0xff]  ;;  %v7371_v39 = vpack.c.bf16 %v1975_v25, %v1971_v22  ;;  %v1983_v14 = vld [vmem:[#allocation13 + $0x1a0] sm:$0xff] }
 0x2b7   :  { %v1986_v32 = vld [vmem:[#allocation13 + $0x1b8] sm:$0xff] }
 0x2b8   :  { %6271 = vrcp.f32 %v1685_v12  ;;  %v7379_v40 = vpack.c.bf16 %v1986_v32, %v1982_v19  ;;  %v1994_v22 = vld [vmem:[#allocation13 + $0x1f8] sm:$0xff]  ;;  %v1989_v19 = vld [vmem:[#allocation13 + $0x1d0] sm:$0xff] }
 0x2b9   :  { %v6268_v49 = vpop.eup %6267  ;;  %5350 = vmatpush1.bf16.msra.mxu0 %v7344_v59  ;;  %5382 = vmatpush1.bf16.msra.mxu1 %v7346_v33  ;;  %v1973_v59 = vld [vmem:[#allocation13 + $0x150] sm:$0xff]  ;;  %v1980_v33 = vld [vmem:[#allocation13 + $0x188] sm:$0xff] }
 0x2ba   :  { %v6270_v62 = vpop.eup %6269  ;;  %v1689_v30 = vmul.f32 %v6268_v49, %v6266_v31  ;;  %5352 = vmatprep.subr.bf16.mxu0 %v7350_v45  ;;  %5384 = vmatprep.subr.bf16.mxu1 %v7352_v23  ;;  %v7373_v35 = vpack.c.bf16 %v1977_v0, %v1973_v59  ;;  %v1981_v31 = vld [vmem:[#allocation13 + $0x190] sm:$0xff]  ;;  %v7384_v0 = vpack.c.bf16 %v1983_v14, %v1979_v38  ;;  %v1987_v59 = vld [vmem:[#allocation13 + $0x1c0] sm:$0xff] }
 0x2bb   :  { %v1688_v15 = vmul.f32 %v6270_v62, %v7167_v17  ;;  %v7377_v17 = vpack.c.bf16 %v1984_v54, %v1980_v33  ;;  %v1985_v49 = vld [vmem:[#allocation13 + $0x1b0] sm:$0xff]  ;;  %v1988_v62 = vld [vmem:[#allocation13 + $0x1c8] sm:$0xff]  ;;  %v1991_v54 = vld [vmem:[#allocation13 + $0x1e0] sm:$0xff] }
 0x2bc   :  { %v7386_v12 = vpack.c.bf16 %v1985_v49, %v1981_v31  ;;  %v1993_v32 = vld [vmem:[#allocation13 + $0x1f0] sm:$0xff]  ;;  %v7396_v38 = vpack.c.bf16 %v1991_v54, %v1987_v59 }
 0x2bd   :  { %v7367_v56 = vadd.f32 %v1689_v30, %v1688_v15  ;;  %5354 = vmatpush1.bf16.msra.mxu0 %v7356_v29  ;;  %5386 = vmatpush1.bf16.msra.mxu1 %v7358_v60  ;;  %v1992_v30 = vld [vmem:[#allocation13 + $0x1e8] sm:$0xff]  ;;  %v1990_v15 = vld [vmem:[#allocation13 + $0x1d8] sm:$0xff]  ;;  %v7398_v14 = vpack.c.bf16 %v1993_v32, %v1989_v19 }
 0x2be   :  { %5356 = vmatprep.subr.bf16.mxu0 %v7362_v46  ;;  %5388 = vmatprep.subr.bf16.mxu1 %v7364_v50  ;;  %v7390_v33 = vpack.c.bf16 %v1992_v30, %v1988_v62  ;;  %v7392_v25 = vpack.c.bf16 %v1994_v22, %v1990_v15  ;;  %v8292_v22 = vld [vmem:[#allocation36_spill] sm:$0xff] }
 0x2bf   :  { %6273 = vtanh.f32 %v7367_v56 }
 0x2c1   :  { %5358 = vmatpush1.bf16.msra.mxu0 %v7371_v39  ;;  %5390 = vmatpush1.bf16.msra.mxu1 %v7373_v35 }
 0x2c2   :  { %5360 = vmatprep.subr.bf16.mxu0 %v7377_v17  ;;  %5392 = vmatprep.subr.bf16.mxu1 %v7379_v40  ;;  %v6272_v31 = vpop.eup %6271 }
 0x2c5   :  { %5362 = vmatpush1.bf16.msra.mxu0 %v7384_v0  ;;  %5394 = vmatpush1.bf16.msra.mxu1 %v7386_v12 }
 0x2c6   :  { %5364 = vmatprep.subr.bf16.mxu0 %v7390_v33  ;;  %5396 = vmatprep.subr.bf16.mxu1 %v7392_v25 }
 0x2c9   :  { %v6274_v49 = vpop.eup %6273  ;;  %5366 = vmatpush1.bf16.msra.mxu0 %v7396_v38  ;;  %5398 = vmatpush1.bf16.msra.mxu1 %v7398_v14 }
 0x2ca   :  { %v7404_v62 = vmul.f32 %v6274_v49, %v6272_v31  ;;  %5400 = vmatprep.subr.bf16.mxu0 %v7190_v53  ;;  %5432 = vmatprep.subr.bf16.mxu1 %v7192_v28 }
 0x2cc   :  { %8285 = vst [vmem:[#allocation55_spill] sm:$0xff] %v7404_v62  ;;  %2060 = vmatmul.mubr.f32.vlgmr.msra.gmra.mrb[10].mxu0 %v7404_v62  ;;  %2131 = vmatmul.mubr.f32.vlgmr.msra.gmra.mrb[42].mxu1 %v7404_v62 }
 0x2cd   :  { %5402 = vmatpush1.bf16.msra.mxu0 %v7194_v36  ;;  %5434 = vmatpush1.bf16.msra.mxu1 %v7197_v2 }
 0x2ce   :  { %5404 = vmatprep.subr.bf16.mxu0 %v7202_v26  ;;  %5436 = vmatprep.subr.bf16.mxu1 %v7204_v13  ;;  %v8286_v13 = vld [vmem:[#allocation21_spill] sm:$0xff] }
 0x2cf   :  { %2339 = vmatprep.mubr.f32.mxu0 %v8267_v37  ;;  %2410 = vmatprep.mubr.f32.mxu1 %v8267_v37 }
 0x2d1   :  { %5406 = vmatpush1.bf16.msra.mxu0 %v7206_v24  ;;  %5438 = vmatpush1.bf16.msra.mxu1 %v7209_v47 }
 0x2d2   :  { %5408 = vmatprep.subr.bf16.mxu0 %v7214_v8  ;;  %5440 = vmatprep.subr.bf16.mxu1 %v7216_v10  ;;  %v8287_v10 = vld [vmem:[#allocation33_spill] sm:$0xff] }
 0x2d5   :  { %5410 = vmatpush1.bf16.msra.mxu0 %v7218_v5  ;;  %5442 = vmatpush1.bf16.msra.mxu1 %v7221_v20 }
 0x2d6   :  { %5412 = vmatprep.subr.bf16.mxu0 %v7226_v27  ;;  %5444 = vmatprep.subr.bf16.mxu1 %v7228_v43  ;;  %v8288_v27 = vld [vmem:[#allocation32_spill] sm:$0xff] }
 0x2d9   :  { %5414 = vmatpush1.bf16.msra.mxu0 %v7230_v51  ;;  %5446 = vmatpush1.bf16.msra.mxu1 %v7233_v11 }
 0x2da   :  { %5416 = vmatprep.subr.bf16.mxu0 %v7238_v44  ;;  %5448 = vmatprep.subr.bf16.mxu1 %v7240_v57 }
 0x2dd   :  { %5418 = vmatpush1.bf16.msra.mxu0 %v7242_v48  ;;  %5450 = vmatpush1.bf16.msra.mxu1 %v7245_v55 }
 0x2de   :  { %5420 = vmatprep.subr.bf16.mxu0 %v7250_v34  ;;  %5452 = vmatprep.subr.bf16.mxu1 %v7252_v21 }
 0x2e1   :  { %5422 = vmatpush1.bf16.msra.mxu0 %v7254_v9  ;;  %5454 = vmatpush1.bf16.msra.mxu1 %v7257_v42  ;;  %v8289_v42 = vld [vmem:[#allocation39_spill] sm:$0xff] }
 0x2e2   :  { %5424 = vmatprep.subr.bf16.mxu0 %v7262_v16  ;;  %5456 = vmatprep.subr.bf16.mxu1 %v7264_v1 }
 0x2e5   :  { %5426 = vmatpush1.bf16.msra.mxu0 %v7266_v3  ;;  %5458 = vmatpush1.bf16.msra.mxu1 %v7269_v58 }
 0x2e6   :  { %5428 = vmatprep.subr.bf16.mxu0 %v7274_v7  ;;  %5460 = vmatprep.subr.bf16.mxu1 %v7276_v63  ;;  %v8290_v7 = vld [vmem:[#allocation35_spill] sm:$0xff] }
 0x2e9   :  { %5430 = vmatpush1.bf16.msra.mxu0 %v7278_v41  ;;  %5462 = vmatpush1.bf16.msra.mxu1 %v7281_v61 }
 0x2ea   :  { %5464 = vmatprep.subr.bf16.mxu0 %v7286_v52  ;;  %5496 = vmatprep.subr.bf16.mxu1 %v7288_v18  ;;  %v8291_v52 = vld [vmem:[#allocation34_spill] sm:$0xff] }
 0x37f   :  { %v1843_v53 = vpop.f32.mrb[20].mxu0  ;;  %v1914_v28 = vpop.f32.mrb[20].mxu1 }
 0x380   :  { %v1919_v36 = vadd.f32 %v1843_v53, %v7088_v6  ;;  %v1845_v2 = vpop.f32.mrb[21].mxu0  ;;  %v1916_v26 = vpop.f32.mrb[21].mxu1  ;;  %v6107_v43 = vadd.f32 %v1914_v28, %v8288_v27 }
 0x381   :  { %v1920_v24 = vadd.f32 %v1845_v2, %v8286_v13  ;;  %v6108_v5 = vadd.f32 %v1916_v26, %v8287_v10  ;;  %v8294_v2 = vld [vmem:[#allocation40_spill] sm:$0xff]  ;;  %v8295_v26 = vld [vmem:[#allocation41_spill] sm:$0xff] }
 0x382   :  { %v4890_v47 = vmul.f32 -1.442695, %v1919_v36 }
 0x383   :  { %v4891_v8 = vmul.f32 -1.442695, %v1920_v24  ;;  %v4892_v20 = vmul.f32 -1.442695, %v6108_v5  ;;  %v8296_v24 = vld [vmem:[#allocation43_spill] sm:$0xff]  ;;  %v8299_v5 = vld [vmem:[#allocation46_spill] sm:$0xff] }
 0x384   :  { %6275 = vpow2.f32 %v4890_v47  ;;  %v8297_v47 = vld [vmem:[#allocation44_spill] sm:$0xff] }
 0x385   :  { %6277 = vpow2.f32 %v4891_v8  ;;  %v8298_v8 = vld [vmem:[#allocation45_spill] sm:$0xff] }
 0x386   :  { %6279 = vpow2.f32 %v4892_v20  ;;  %v8300_v20 = vld [vmem:[#allocation47_spill] sm:$0xff] }
 0x387   :  { %6281 = vtanh.f32 %v6107_v43  ;;  %v8301_v43 = vld [vmem:[#allocation48_spill] sm:$0xff] }
 0x38e   :  { %v6276_v51 = vpop.eup %6275 }
 0x38f   :  { %v6278_v11 = vpop.eup %6277  ;;  %v2145_v44 = vadd.f32 1.0, %v6276_v51  ;;  %v8302_v51 = vld [vmem:[#allocation49_spill] sm:$0xff] }
 0x390   :  { %v2151_v57 = vadd.f32 1.0, %v6278_v11  ;;  %v6280_v6 = vpop.eup %6279  ;;  %v8303_v11 = vld [vmem:[#allocation50_spill] sm:$0xff] }
 0x391   :  { %6283 = vrcp.f32 %v2145_v44  ;;  %v6282_v48 = vpop.eup %6281  ;;  %v2158_v9 = vadd.f32 1.0, %v6280_v6  ;;  %v8304_v44 = vld [vmem:[#allocation51_spill] sm:$0xff] }
 0x392   :  { %6285 = vrcp.f32 %v2151_v57  ;;  %v8305_v57 = vld [vmem:[#allocation52_spill] sm:$0xff] }
 0x393   :  { %6287 = vrcp.f32 %v2158_v9 }
 0x39b   :  { %v6284_v55 = vpop.eup %6283 }
 0x39c   :  { %v6286_v34 = vpop.eup %6285  ;;  %v2162_v21 = vmul.f32 %v6284_v55, %v6282_v48 }
 0x39d   :  { %v2161_v16 = vmul.f32 %v6286_v34, %v8289_v42  ;;  %v6288_v54 = vpop.eup %6287  ;;  %v8306_v34 = vld [vmem:[#allocation53_spill] sm:$0xff] }
 0x39f   :  { %v7449_v1 = vadd.f32 %v2162_v21, %v2161_v16  ;;  %v2061_v3 = vpop.f32.mrb[10].mxu0  ;;  %v2132_v58 = vpop.f32.mrb[42].mxu1  ;;  %v8307_v21 = vld [vmem:[#allocation54_spill] sm:$0xff] }
 0x3a0   :  { %v6129_v63 = vadd.f32 %v2061_v3, %v8290_v7  ;;  %v2063_v41 = vpop.f32.mrb[11].mxu0  ;;  %v2134_v61 = vpop.f32.mrb[43].mxu1  ;;  %v6145_v31 = vadd.f32 %v2132_v58, %v7138_v4 }
 0x3a1   :  { %v6130_v18 = vadd.f32 %v2063_v41, %v8291_v52  ;;  %6289 = vtanh.f32 %v7449_v1  ;;  %v6146_v59 = vadd.f32 %v2134_v61, %v8292_v22  ;;  %v2721_v61 = vld [vmem:[#allocation11 + $0x78] sm:$0xff] }
 0x3a2   :  { %v4893_v30 = vmul.f32 -1.442695, %v6129_v63  ;;  %v2717_v63 = vld [vmem:[#allocation11 + $0x58] sm:$0xff] }
 0x3a3   :  { %v4894_v15 = vmul.f32 -1.442695, %v6130_v18  ;;  %v4895_v32 = vmul.f32 -1.442695, %v6146_v59  ;;  %v2714_v18 = vld [vmem:[#allocation11 + $0x40] sm:$0xff] }
 0x3a4   :  { %6291 = vpow2.f32 %v4893_v30  ;;  %v2718_v30 = vld [vmem:[#allocation11 + $0x60] sm:$0xff] }
 0x3a5   :  { %6293 = vpow2.f32 %v4894_v15  ;;  %v7516_v15 = vpack.c.bf16 %v2721_v61, %v2717_v63  ;;  %v7518_v59 = vpack.c.bf16 %v2718_v30, %v2714_v18  ;;  %v2749_v63 = vld [vmem:[#allocation11 + $0x158] sm:$0xff]  ;;  %v2746_v30 = vld [vmem:[#allocation11 + $0x140] sm:$0xff] }
 0x3a6   :  { %6295 = vpow2.f32 %v4895_v32  ;;  %v2753_v18 = vld [vmem:[#allocation11 + $0x178] sm:$0xff] }
 0x3a7   :  { %6297 = vtanh.f32 %v6145_v31  ;;  %v2723_v31 = vld [vmem:[#allocation11 + $0x88] sm:$0xff] }
 0x3ab   :  { %v6290_v19 = vpop.eup %6289 }
 0x3ac   :  { %v7456_v49 = vmul.f32 %v6290_v19, %v6288_v54  ;;  %v2716_v54 = vld [vmem:[#allocation11 + $0x50] sm:$0xff] }
 0x3ad   :  { %v2720_v19 = vld [vmem:[#allocation11 + $0x70] sm:$0xff] }
 0x3ae   :  { %8293 = vst [vmem:[#allocation21_spill] sm:$0xff] %v7456_v49  ;;  %v6292_v53 = vpop.eup %6291  ;;  %2340 = vmatmul.mubr.f32.vlgmr.msra.gmra.mrb[22].mxu0 %v7456_v49  ;;  %2411 = vmatmul.mubr.f32.vlgmr.msra.gmra.mrb[22].mxu1 %v7456_v49  ;;  %v7521_v32 = vpack.c.bf16 %v2720_v19, %v2716_v54  ;;  %v2750_v54 = vld [vmem:[#allocation11 + $0x160] sm:$0xff]  ;;  %v7564_v19 = vpack.c.bf16 %v2753_v18, %v2749_v63  ;;  %v2768_v63 = vld [vmem:[#allocation11 + $0x1f0] sm:$0xff] }
 0x3af   :  { %v6294_v28 = vpop.eup %6293  ;;  %v2170_v36 = vadd.f32 1.0, %v6292_v53  ;;  %5466 = vmatpush1.bf16.msra.mxu0 %v8294_v2  ;;  %5498 = vmatpush1.bf16.msra.mxu1 %v8295_v26  ;;  %v2727_v53 = vld [vmem:[#allocation11 + $0xa8] sm:$0xff]  ;;  %v2729_v2 = vld [vmem:[#allocation11 + $0xb8] sm:$0xff]  ;;  %v2722_v26 = vld [vmem:[#allocation11 + $0x80] sm:$0xff] }
 0x3b0   :  { %v2176_v13 = vadd.f32 1.0, %v6294_v28  ;;  %5468 = vmatprep.subr.bf16.mxu0 %v8296_v24  ;;  %5500 = vmatprep.subr.bf16.mxu1 %v8297_v47  ;;  %v6296_v6 = vpop.eup %6295  ;;  %v2725_v28 = vld [vmem:[#allocation11 + $0x98] sm:$0xff] }
 0x3b1   :  { %6299 = vrcp.f32 %v2170_v36  ;;  %2557 = vmatprep.mubr.f32.mxu0 %v8267_v37  ;;  %2628 = vmatprep.mubr.f32.mxu1 %v8267_v37  ;;  %v6298_v48 = vpop.eup %6297  ;;  %v2183_v16 = vadd.f32 1.0, %v6296_v6  ;;  %v7526_v36 = vpack.c.bf16 %v2727_v53, %v2723_v31  ;;  %v7528_v24 = vpack.c.bf16 %v2729_v2, %v2725_v28  ;;  %v2730_v6 = vld [vmem:[#allocation11 + $0xc0] sm:$0xff]  ;;  %v2748_v53 = vld [vmem:[#allocation11 + $0x150] sm:$0xff] }
 0x3b2   :  { %6301 = vrcp.f32 %v2176_v13  ;;  %v2726_v13 = vld [vmem:[#allocation11 + $0xa0] sm:$0xff]  ;;  %v7566_v31 = vpack.c.bf16 %v2750_v54, %v2746_v30  ;;  %v2752_v28 = vld [vmem:[#allocation11 + $0x170] sm:$0xff]  ;;  %v2922_v30 = vld [vmem:[#allocation13 + $0x8] sm:$0xff] }
 0x3b3   :  { %5470 = vmatpush1.bf16.msra.mxu0 %v8298_v8  ;;  %5502 = vmatpush1.bf16.msra.mxu1 %v8299_v5  ;;  %6303 = vrcp.f32 %v2183_v16  ;;  %v7530_v47 = vpack.c.bf16 %v2726_v13, %v2722_v26  ;;  %v2724_v8 = vld [vmem:[#allocation11 + $0x90] sm:$0xff]  ;;  %v2739_v16 = vld [vmem:[#allocation11 + $0x108] sm:$0xff]  ;;  %v7569_v2 = vpack.c.bf16 %v2752_v28, %v2748_v53  ;;  %v2924_v53 = vld [vmem:[#allocation13 + $0x18] sm:$0xff] }
 0x3b4   :  { %5472 = vmatprep.subr.bf16.mxu0 %v8300_v20  ;;  %5504 = vmatprep.subr.bf16.mxu1 %v8301_v43  ;;  %v2728_v5 = vld [vmem:[#allocation11 + $0xb0] sm:$0xff]  ;;  %v2731_v43 = vld [vmem:[#allocation11 + $0xc8] sm:$0xff] }
 0x3b5   :  { %v7533_v20 = vpack.c.bf16 %v2728_v5, %v2724_v8  ;;  %v2755_v26 = vld [vmem:[#allocation11 + $0x188] sm:$0xff]  ;;  %v2757_v8 = vld [vmem:[#allocation11 + $0x198] sm:$0xff] }
 0x3b6   :  { %v2759_v13 = vld [vmem:[#allocation11 + $0x1a8] sm:$0xff] }
 0x3b7   :  { %5474 = vmatpush1.bf16.msra.mxu0 %v8302_v51  ;;  %5506 = vmatpush1.bf16.msra.mxu1 %v8303_v11  ;;  %v2735_v51 = vld [vmem:[#allocation11 + $0xe8] sm:$0xff]  ;;  %v2733_v11 = vld [vmem:[#allocation11 + $0xd8] sm:$0xff]  ;;  %v7574_v5 = vpack.c.bf16 %v2759_v13, %v2755_v26 }
 0x3b8   :  { %5476 = vmatprep.subr.bf16.mxu0 %v8304_v44  ;;  %5508 = vmatprep.subr.bf16.mxu1 %v8305_v57  ;;  %v7538_v44 = vpack.c.bf16 %v2735_v51, %v2731_v43  ;;  %v2737_v57 = vld [vmem:[#allocation11 + $0xf8] sm:$0xff]  ;;  %v2754_v51 = vld [vmem:[#allocation11 + $0x180] sm:$0xff]  ;;  %v2926_v54 = vld [vmem:[#allocation13 + $0x28] sm:$0xff] }
 0x3b9   :  { %v2761_v43 = vld [vmem:[#allocation11 + $0x1b8] sm:$0xff]  ;;  %v7598_v28 = vpack.c.bf16 %v2926_v54, %v2922_v30 }
 0x3ba   :  { %v2928_v26 = vld [vmem:[#allocation13 + $0x38] sm:$0xff] }
 0x3bb   :  { %v6300_v55 = vpop.eup %6299  ;;  %5478 = vmatpush1.bf16.msra.mxu0 %v8306_v34  ;;  %5510 = vmatpush1.bf16.msra.mxu1 %v8307_v21  ;;  %v2732_v21 = vld [vmem:[#allocation11 + $0xd0] sm:$0xff]  ;;  %v7600_v13 = vpack.c.bf16 %v2928_v26, %v2924_v53 }
 0x3bc   :  { %v6302_v9 = vpop.eup %6301  ;;  %v2187_v42 = vmul.f32 %v6300_v55, %v6298_v48  ;;  %5480 = vmatprep.subr.bf16.mxu0 %v7350_v45  ;;  %5512 = vmatprep.subr.bf16.mxu1 %v7352_v23  ;;  %v2711_v45 = vld [vmem:[#allocation11 + $0x28] sm:$0xff]  ;;  %v2709_v23 = vld [vmem:[#allocation11 + $0x18] sm:$0xff]  ;;  %v2734_v48 = vld [vmem:[#allocation11 + $0xe0] sm:$0xff]  ;;  %v7540_v55 = vpack.c.bf16 %v2737_v57, %v2733_v11  ;;  %v7576_v57 = vpack.c.bf16 %v2761_v43, %v2757_v8 }
 0x3bd   :  { %v2186_v3 = vmul.f32 %v6302_v9, %v7367_v56  ;;  %v7542_v34 = vpack.c.bf16 %v2734_v48, %v2730_v6  ;;  %v2736_v9 = vld [vmem:[#allocation11 + $0xf0] sm:$0xff]  ;;  %v2758_v11 = vld [vmem:[#allocation11 + $0x1a0] sm:$0xff] }
 0x3be   :  { %v7578_v6 = vpack.c.bf16 %v2758_v11, %v2754_v51  ;;  %v2756_v48 = vld [vmem:[#allocation11 + $0x190] sm:$0xff]  ;;  %v8309_v51 = vld [vmem:[#allocation22_spill] sm:$0xff] }
 0x3bf   :  { %v7479_v58 = vadd.f32 %v2187_v42, %v2186_v3  ;;  %5482 = vmatpush1.bf16.msra.mxu0 %v7356_v29  ;;  %5514 = vmatpush1.bf16.msra.mxu1 %v7358_v60  ;;  %v2707_v60 = vld [vmem:[#allocation11 + $0x8] sm:$0xff]  ;;  %v7545_v42 = vpack.c.bf16 %v2736_v9, %v2732_v21  ;;  %v2760_v21 = vld [vmem:[#allocation11 + $0x1b0] sm:$0xff] }
 0x3c0   :  { %5484 = vmatprep.subr.bf16.mxu0 %v7362_v46  ;;  %5516 = vmatprep.subr.bf16.mxu1 %v7364_v50  ;;  %v6304_v46 = vpop.eup %6303  ;;  %v7502_v29 = vpack.c.bf16 %v2711_v45, %v2707_v60  ;;  %v2743_v3 = vld [vmem:[#allocation11 + $0x128] sm:$0xff]  ;;  %v2745_v60 = vld [vmem:[#allocation11 + $0x138] sm:$0xff]  ;;  %v2738_v45 = vld [vmem:[#allocation11 + $0x100] sm:$0xff]  ;;  %v7581_v9 = vpack.c.bf16 %v2760_v21, %v2756_v48 }
 0x3c1   :  { %6305 = vtanh.f32 %v7479_v58 }
 0x3c3   :  { %5486 = vmatpush1.bf16.msra.mxu0 %v7371_v39  ;;  %5518 = vmatpush1.bf16.msra.mxu1 %v7373_v35  ;;  %v2713_v39 = vld [vmem:[#allocation11 + $0x38] sm:$0xff]  ;;  %v2706_v35 = vld [vmem:[#allocation11] sm:$0xff] }
 0x3c4   :  { %5488 = vmatprep.subr.bf16.mxu0 %v7377_v17  ;;  %5520 = vmatprep.subr.bf16.mxu1 %v7379_v40  ;;  %v2710_v17 = vld [vmem:[#allocation11 + $0x20] sm:$0xff]  ;;  %v7504_v40 = vpack.c.bf16 %v2713_v39, %v2709_v23 }
 0x3c5   :  { %v2742_v23 = vld [vmem:[#allocation11 + $0x120] sm:$0xff] }
 0x3c7   :  { %5490 = vmatpush1.bf16.msra.mxu0 %v7384_v0  ;;  %5522 = vmatpush1.bf16.msra.mxu1 %v7386_v12  ;;  %v7506_v0 = vpack.c.bf16 %v2710_v17, %v2706_v35  ;;  %v2708_v12 = vld [vmem:[#allocation11 + $0x10] sm:$0xff]  ;;  %v7554_v35 = vpack.c.bf16 %v2742_v23, %v2738_v45  ;;  %v2769_v45 = vld [vmem:[#allocation11 + $0x1f8] sm:$0xff]  ;;  %v2762_v23 = vld [vmem:[#allocation11 + $0x1c0] sm:$0xff] }
 0x3c8   :  { %5492 = vmatprep.subr.bf16.mxu0 %v7390_v33  ;;  %5524 = vmatprep.subr.bf16.mxu1 %v7392_v25  ;;  %v2712_v33 = vld [vmem:[#allocation11 + $0x30] sm:$0xff] }
 0x3c9   :  { %v7509_v25 = vpack.c.bf16 %v2712_v33, %v2708_v12  ;;  %v2740_v17 = vld [vmem:[#allocation11 + $0x110] sm:$0xff] }
 0x3ca   :  { %v2744_v12 = vld [vmem:[#allocation11 + $0x130] sm:$0xff] }
 0x3cb   :  { %v6306_v56 = vpop.eup %6305  ;;  %5494 = vmatpush1.bf16.msra.mxu0 %v7396_v38  ;;  %5526 = vmatpush1.bf16.msra.mxu1 %v7398_v14  ;;  %v2715_v38 = vld [vmem:[#allocation11 + $0x48] sm:$0xff]  ;;  %v7557_v33 = vpack.c.bf16 %v2744_v12, %v2740_v17  ;;  %v2766_v17 = vld [vmem:[#allocation11 + $0x1e0] sm:$0xff] }
 0x3cc   :  { %v7496_v50 = vmul.f32 %v6306_v56, %v6304_v46  ;;  %5528 = vmatprep.subr.bf16.mxu0 %v7502_v29  ;;  %5560 = vmatprep.subr.bf16.mxu1 %v7504_v40  ;;  %v2719_v14 = vld [vmem:[#allocation11 + $0x68] sm:$0xff]  ;;  %v2741_v46 = vld [vmem:[#allocation11 + $0x118] sm:$0xff]  ;;  %v7550_v56 = vpack.c.bf16 %v2743_v3, %v2739_v16 }
 0x3cd   :  { %v7514_v41 = vpack.c.bf16 %v2719_v14, %v2715_v38  ;;  %v7552_v39 = vpack.c.bf16 %v2745_v60, %v2741_v46  ;;  %v2747_v38 = vld [vmem:[#allocation11 + $0x148] sm:$0xff]  ;;  %v2765_v46 = vld [vmem:[#allocation11 + $0x1d8] sm:$0xff] }
 0x3ce   :  { %8308 = vst [vmem:[#allocation33_spill] sm:$0xff] %v7496_v50  ;;  %2558 = vmatmul.mubr.f32.vlgmr.msra.gmra.mrb[8].mxu0 %v7496_v50  ;;  %2629 = vmatmul.mubr.f32.vlgmr.msra.gmra.mrb[40].mxu1 %v7496_v50  ;;  %v2751_v14 = vld [vmem:[#allocation11 + $0x168] sm:$0xff]  ;;  %v7588_v12 = vpack.c.bf16 %v2769_v45, %v2765_v46 }
 0x3cf   :  { %2834 = vmatprep.mubr.f32.mxu0 %v8267_v37  ;;  %2905 = vmatprep.mubr.f32.mxu1 %v8267_v37  ;;  %v7562_v61 = vpack.c.bf16 %v2751_v14, %v2747_v38  ;;  %v2763_v16 = vld [vmem:[#allocation11 + $0x1c8] sm:$0xff]  ;;  %v7590_v38 = vpack.c.bf16 %v2766_v17, %v2762_v23  ;;  %v2764_v14 = vld [vmem:[#allocation11 + $0x1d0] sm:$0xff] }
 0x3d0   :  { %5530 = vmatpush1.bf16.msra.mxu0 %v7506_v0  ;;  %5562 = vmatpush1.bf16.msra.mxu1 %v7509_v25  ;;  %v2767_v3 = vld [vmem:[#allocation11 + $0x1e8] sm:$0xff]  ;;  %v7593_v18 = vpack.c.bf16 %v2768_v63, %v2764_v14 }
 0x3d1   :  { %5532 = vmatprep.subr.bf16.mxu0 %v7514_v41  ;;  %5564 = vmatprep.subr.bf16.mxu1 %v7516_v15  ;;  %v7586_v60 = vpack.c.bf16 %v2767_v3, %v2763_v16  ;;  %v8310_v16 = vld [vmem:[#allocation23_spill] sm:$0xff] }
 0x3d4   :  { %5534 = vmatpush1.bf16.msra.mxu0 %v7518_v59  ;;  %5566 = vmatpush1.bf16.msra.mxu1 %v7521_v32 }
 0x3d5   :  { %5536 = vmatprep.subr.bf16.mxu0 %v7526_v36  ;;  %5568 = vmatprep.subr.bf16.mxu1 %v7528_v24 }
 0x3d8   :  { %5538 = vmatpush1.bf16.msra.mxu0 %v7530_v47  ;;  %5570 = vmatpush1.bf16.msra.mxu1 %v7533_v20 }
 0x3d9   :  { %5540 = vmatprep.subr.bf16.mxu0 %v7538_v44  ;;  %5572 = vmatprep.subr.bf16.mxu1 %v7540_v55 }
 0x3dc   :  { %5542 = vmatpush1.bf16.msra.mxu0 %v7542_v34  ;;  %5574 = vmatpush1.bf16.msra.mxu1 %v7545_v42 }
 0x3dd   :  { %5544 = vmatprep.subr.bf16.mxu0 %v7550_v56  ;;  %5576 = vmatprep.subr.bf16.mxu1 %v7552_v39 }
 0x3e0   :  { %5546 = vmatpush1.bf16.msra.mxu0 %v7554_v35  ;;  %5578 = vmatpush1.bf16.msra.mxu1 %v7557_v33 }
 0x3e1   :  { %5548 = vmatprep.subr.bf16.mxu0 %v7562_v61  ;;  %5580 = vmatprep.subr.bf16.mxu1 %v7564_v19 }
 0x3e4   :  { %5550 = vmatpush1.bf16.msra.mxu0 %v7566_v31  ;;  %5582 = vmatpush1.bf16.msra.mxu1 %v7569_v2 }
 0x3e5   :  { %5552 = vmatprep.subr.bf16.mxu0 %v7574_v5  ;;  %5584 = vmatprep.subr.bf16.mxu1 %v7576_v57 }
 0x3e8   :  { %5554 = vmatpush1.bf16.msra.mxu0 %v7578_v6  ;;  %5586 = vmatpush1.bf16.msra.mxu1 %v7581_v9 }
 0x3e9   :  { %5556 = vmatprep.subr.bf16.mxu0 %v7586_v60  ;;  %5588 = vmatprep.subr.bf16.mxu1 %v7588_v12 }
 0x3ec   :  { %5558 = vmatpush1.bf16.msra.mxu0 %v7590_v38  ;;  %5590 = vmatpush1.bf16.msra.mxu1 %v7593_v18 }
 0x3ed   :  { %5592 = vmatprep.subr.bf16.mxu0 %v7598_v28  ;;  %5624 = vmatprep.subr.bf16.mxu1 %v7600_v13 }
 0x481   :  { %v2341_v8 = vpop.f32.mrb[22].mxu0  ;;  %v2412_v43 = vpop.f32.mrb[22].mxu1 }
 0x482   :  { %v2417_v11 = vadd.f32 %v2341_v8, %v8309_v51  ;;  %v2343_v48 = vpop.f32.mrb[23].mxu0  ;;  %v2414_v21 = vpop.f32.mrb[23].mxu1  ;;  %v6109_v14 = vadd.f32 %v2412_v43, %v8288_v27  ;;  %v2940_v27 = vld [vmem:[#allocation13 + $0x98] sm:$0xff] }
 0x483   :  { %v2418_v3 = vadd.f32 %v2343_v48, %v8310_v16  ;;  %v6110_v23 = vadd.f32 %v2414_v21, %v8287_v10 }
 0x484   :  { %v4896_v46 = vmul.f32 -1.442695, %v2417_v11 }
 0x485   :  { %v4897_v45 = vmul.f32 -1.442695, %v2418_v3  ;;  %v4898_v17 = vmul.f32 -1.442695, %v6110_v23 }
 0x486   :  { %6307 = vpow2.f32 %v4896_v46 }
 0x487   :  { %6309 = vpow2.f32 %v4897_v45 }
 0x488   :  { %6311 = vpow2.f32 %v4898_v17 }
 0x489   :  { %6313 = vtanh.f32 %v6109_v14 }
 0x490   :  { %v6308_v63 = vpop.eup %6307 }
 0x491   :  { %v6310_v30 = vpop.eup %6309  ;;  %v2643_v54 = vadd.f32 1.0, %v6308_v63 }
 0x492   :  { %v2649_v53 = vadd.f32 1.0, %v6310_v30  ;;  %v6312_v26 = vpop.eup %6311 }
 0x493   :  { %6315 = vrcp.f32 %v2643_v54  ;;  %v6314_v8 = vpop.eup %6313  ;;  %v2656_v16 = vadd.f32 1.0, %v6312_v26  ;;  %v2923_v26 = vld [vmem:[#allocation13 + $0x10] sm:$0xff] }
 0x494   :  { %6317 = vrcp.f32 %v2649_v53  ;;  %v2925_v53 = vld [vmem:[#allocation13 + $0x20] sm:$0xff] }
 0x495   :  { %6319 = vrcp.f32 %v2656_v16  ;;  %v2936_v16 = vld [vmem:[#allocation13 + $0x78] sm:$0xff] }
 0x49d   :  { %v6316_v51 = vpop.eup %6315 }
 0x49e   :  { %v6318_v11 = vpop.eup %6317  ;;  %v2660_v48 = vmul.f32 %v6316_v51, %v6314_v8  ;;  %v2927_v8 = vld [vmem:[#allocation13 + $0x30] sm:$0xff]  ;;  %v2930_v51 = vld [vmem:[#allocation13 + $0x48] sm:$0xff] }
 0x49f   :  { %v2659_v3 = vmul.f32 %v6318_v11, %v7449_v1  ;;  %v2921_v1 = vld [vmem:[#allocation13] sm:$0xff]  ;;  %v2934_v11 = vld [vmem:[#allocation13 + $0x68] sm:$0xff]  ;;  %v7617_v50 = vpack.c.bf16 %v2927_v8, %v2923_v26 }
 0x4a1   :  { %v7609_v21 = vadd.f32 %v2660_v48, %v2659_v3  ;;  %v2559_v46 = vpop.f32.mrb[8].mxu0  ;;  %v2630_v43 = vpop.f32.mrb[40].mxu1  ;;  %v2932_v48 = vld [vmem:[#allocation13 + $0x58] sm:$0xff]  ;;  %8313 = vst [vmem:[#allocation41_spill] sm:$0xff] %v7617_v50 }
 0x4a2   :  { %v6127_v45 = vadd.f32 %v2559_v46, %v8290_v7  ;;  %v2561_v23 = vpop.f32.mrb[9].mxu0  ;;  %v2632_v17 = vpop.f32.mrb[41].mxu1  ;;  %v7624_v49 = vpack.c.bf16 %v2936_v16, %v2932_v48  ;;  %v2938_v7 = vld [vmem:[#allocation13 + $0x88] sm:$0xff] }
 0x4a3   :  { %8311 = vst [vmem:[#allocation39_spill] sm:$0xff] %v7609_v21  ;;  %v6128_v14 = vadd.f32 %v2561_v23, %v8291_v52  ;;  %6321 = vtanh.f32 %v7609_v21  ;;  %v6144_v54 = vadd.f32 %v2632_v17, %v8292_v22  ;;  %v6320_v3 = vpop.eup %6319  ;;  %v7615_v23 = vpack.c.bf16 %v2925_v53, %v2921_v1  ;;  %v2931_v22 = vld [vmem:[#allocation13 + $0x50] sm:$0xff]  ;;  %v2942_v21 = vld [vmem:[#allocation13 + $0xa8] sm:$0xff] }
 0x4a4   :  { %v4899_v63 = vmul.f32 -1.442695, %v6127_v45  ;;  %v2929_v45 = vld [vmem:[#allocation13 + $0x40] sm:$0xff]  ;;  %8316 = vst [vmem:[#allocation45_spill] sm:$0xff] %v7624_v49  ;;  %v2935_v52 = vld [vmem:[#allocation13 + $0x70] sm:$0xff]  ;;  %v7636_v16 = vpack.c.bf16 %v2942_v21, %v2938_v7 }
 0x4a5   :  { %v4900_v30 = vmul.f32 -1.442695, %v6128_v14  ;;  %v4901_v62 = vmul.f32 -1.442695, %v6144_v54  ;;  %8312 = vst [vmem:[#allocation40_spill] sm:$0xff] %v7615_v23  ;;  %v2933_v14 = vld [vmem:[#allocation13 + $0x60] sm:$0xff]  ;;  %v7632_v8 = vpack.c.bf16 %v2935_v52, %v2931_v22 }
 0x4a6   :  { %6323 = vpow2.f32 %v4899_v63  ;;  %v6143_v63 = vadd.f32 %v2630_v43, %v7138_v4  ;;  %v2944_v54 = vld [vmem:[#allocation13 + $0xb8] sm:$0xff]  ;;  %v7630_v43 = vpack.c.bf16 %v2933_v14, %v2929_v45  ;;  %8319 = vst [vmem:[#allocation48_spill] sm:$0xff] %v7636_v16  ;;  %v2950_v45 = vld [vmem:[#allocation13 + $0xe8] sm:$0xff]  ;;  %v2945_v22 = vld [vmem:[#allocation13 + $0xc0] sm:$0xff] }
 0x4a7   :  { %6325 = vpow2.f32 %v4900_v30  ;;  %v7622_v30 = vpack.c.bf16 %v2934_v11, %v2930_v51  ;;  %8318 = vst [vmem:[#allocation47_spill] sm:$0xff] %v7632_v8  ;;  %v2937_v51 = vld [vmem:[#allocation13 + $0x80] sm:$0xff]  ;;  %v2948_v14 = vld [vmem:[#allocation13 + $0xd8] sm:$0xff] }
 0x4a8   :  { %6327 = vpow2.f32 %v4901_v62  ;;  %8317 = vst [vmem:[#allocation46_spill] sm:$0xff] %v7630_v43  ;;  %v2941_v11 = vld [vmem:[#allocation13 + $0xa0] sm:$0xff]  ;;  %v2939_v62 = vld [vmem:[#allocation13 + $0x90] sm:$0xff]  ;;  %v2952_v52 = vld [vmem:[#allocation13 + $0xf8] sm:$0xff] }
 0x4a9   :  { %8315 = vst [vmem:[#allocation44_spill] sm:$0xff] %v7622_v30  ;;  %6329 = vtanh.f32 %v6143_v63  ;;  %v7644_v7 = vpack.c.bf16 %v2941_v11, %v2937_v51  ;;  %v2949_v21 = vld [vmem:[#allocation13 + $0xe0] sm:$0xff] }
 0x4aa   :  { %v7656_v51 = vpack.c.bf16 %v2949_v21, %v2945_v22  ;;  %v2968_v22 = vld [vmem:[#allocation13 + $0x178] sm:$0xff] }
 0x4ab   :  { %8321 = vst [vmem:[#allocation50_spill] sm:$0xff] %v7644_v7 }
 0x4ac   :  { %8325 = vst [vmem:[#allocation54_spill] sm:$0xff] %v7656_v51 }
 0x4ad   :  { %v6322_v46 = vpop.eup %6321 }
 0x4ae   :  { %v7620_v17 = vmul.f32 %v6322_v46, %v6320_v3  ;;  %v7638_v3 = vpack.c.bf16 %v2944_v54, %v2940_v27  ;;  %v2943_v46 = vld [vmem:[#allocation13 + $0xb0] sm:$0xff]  ;;  %v7652_v54 = vpack.c.bf16 %v2952_v52, %v2948_v14 }
 0x4af   :  { %v7646_v27 = vpack.c.bf16 %v2943_v46, %v2939_v62  ;;  %v2953_v62 = vld [vmem:[#allocation13 + $0x100] sm:$0xff]  ;;  %v2955_v14 = vld [vmem:[#allocation13 + $0x110] sm:$0xff] }
 0x4b0   :  { %8314 = vst [vmem:[#allocation43_spill] sm:$0xff] %v7620_v17  ;;  %v6324_v1 = vpop.eup %6323  ;;  %2835 = vmatmul.mubr.f32.vlgmr.msra.gmra.mrb[24].mxu0 %v7620_v17  ;;  %2906 = vmatmul.mubr.f32.vlgmr.msra.gmra.mrb[24].mxu1 %v7620_v17  ;;  %8320 = vst [vmem:[#allocation49_spill] sm:$0xff] %v7638_v3  ;;  %v2958_v17 = vld [vmem:[#allocation13 + $0x128] sm:$0xff]  ;;  %v2957_v46 = vld [vmem:[#allocation13 + $0x120] sm:$0xff] }
 0x4b1   :  { %v6326_v53 = vpop.eup %6325  ;;  %v2668_v26 = vadd.f32 1.0, %v6324_v1  ;;  %5594 = vmatpush1.bf16.msra.mxu0 %v7615_v23  ;;  %5626 = vmatpush1.bf16.msra.mxu1 %v7617_v50  ;;  %v2946_v1 = vld [vmem:[#allocation13 + $0xc8] sm:$0xff]  ;;  %8322 = vst [vmem:[#allocation51_spill] sm:$0xff] %v7646_v27  ;;  %8324 = vst [vmem:[#allocation53_spill] sm:$0xff] %v7652_v54  ;;  %v2959_v52 = vld [vmem:[#allocation13 + $0x130] sm:$0xff] }
 0x4b2   :  { %v2674_v48 = vadd.f32 1.0, %v6326_v53  ;;  %5596 = vmatprep.subr.bf16.mxu0 %v7622_v30  ;;  %5628 = vmatprep.subr.bf16.mxu1 %v7624_v49  ;;  %v7650_v63 = vpack.c.bf16 %v2950_v45, %v2946_v1  ;;  %v2947_v53 = vld [vmem:[#allocation13 + $0xd0] sm:$0xff] }
 0x4b3   :  { %6331 = vrcp.f32 %v2668_v26  ;;  %3049 = vmatprep.mubr.f32.mxu0 %v8267_v37  ;;  %3120 = vmatprep.mubr.f32.mxu1 %v8267_v37  ;;  %v2951_v26 = vld [vmem:[#allocation13 + $0xf0] sm:$0xff] }
 0x4b4   :  { %6333 = vrcp.f32 %v2674_v48  ;;  %8323 = vst [vmem:[#allocation52_spill] sm:$0xff] %v7650_v63  ;;  %v2954_v48 = vld [vmem:[#allocation13 + $0x108] sm:$0xff]  ;;  %v7658_v11 = vpack.c.bf16 %v2951_v26, %v2947_v53  ;;  %v7668_v26 = vpack.c.bf16 %v2957_v46, %v2953_v62  ;;  %v2967_v50 = vld [vmem:[#allocation13 + $0x170] sm:$0xff] }
 0x4b5   :  { %5598 = vmatpush1.bf16.msra.mxu0 %v7630_v43  ;;  %5630 = vmatpush1.bf16.msra.mxu1 %v7632_v8  ;;  %v2956_v43 = vld [vmem:[#allocation13 + $0x118] sm:$0xff]  ;;  %v7662_v1 = vpack.c.bf16 %v2958_v17, %v2954_v48  ;;  %v2961_v17 = vld [vmem:[#allocation13 + $0x140] sm:$0xff]  ;;  %v2974_v46 = vld [vmem:[#allocation13 + $0x1a8] sm:$0xff] }
 0x4b6   :  { %5600 = vmatprep.subr.bf16.mxu0 %v7636_v16  ;;  %5632 = vmatprep.subr.bf16.mxu1 %v7638_v3  ;;  %v2960_v8 = vld [vmem:[#allocation13 + $0x138] sm:$0xff]  ;;  %8326 = vst [vmem:[#allocation22_spill] sm:$0xff] %v7658_v11  ;;  %v2962_v3 = vld [vmem:[#allocation13 + $0x148] sm:$0xff] }
 0x4b7   :  { %v7664_v45 = vpack.c.bf16 %v2960_v8, %v2956_v43  ;;  %v2966_v16 = vld [vmem:[#allocation13 + $0x168] sm:$0xff]  ;;  %v2965_v43 = vld [vmem:[#allocation13 + $0x160] sm:$0xff] }
 0x4b8   :  { %v7674_v49 = vpack.c.bf16 %v2966_v16, %v2962_v3  ;;  %v2969_v3 = vld [vmem:[#allocation13 + $0x180] sm:$0xff] }
 0x4b9   :  { %5602 = vmatpush1.bf16.msra.mxu0 %v7644_v7  ;;  %5634 = vmatpush1.bf16.msra.mxu1 %v7646_v27  ;;  %v6328_v7 = vpop.eup %6327  ;;  %v2964_v27 = vld [vmem:[#allocation13 + $0x158] sm:$0xff] }
 0x4ba   :  { %5604 = vmatprep.subr.bf16.mxu0 %v7650_v63  ;;  %5636 = vmatprep.subr.bf16.mxu1 %v7652_v54  ;;  %v6330_v21 = vpop.eup %6329  ;;  %v7670_v54 = vpack.c.bf16 %v2959_v52, %v2955_v14  ;;  %v2681_v63 = vadd.f32 1.0, %v6328_v7  ;;  %v7676_v30 = vpack.c.bf16 %v2968_v22, %v2964_v27  ;;  %v2972_v14 = vld [vmem:[#allocation13 + $0x198] sm:$0xff]  ;;  %v7683_v7 = vpack.c.bf16 %v2965_v43, %v2961_v17  ;;  %v2973_v27 = vld [vmem:[#allocation13 + $0x1a0] sm:$0xff] }
 0x4bb   :  { %v2976_v52 = vld [vmem:[#allocation13 + $0x1b8] sm:$0xff] }
 0x4bc   :  { %6335 = vrcp.f32 %v2681_v63  ;;  %v7691_v22 = vpack.c.bf16 %v2976_v52, %v2972_v14  ;;  %v2984_v17 = vld [vmem:[#allocation13 + $0x1f8] sm:$0xff]  ;;  %v2979_v14 = vld [vmem:[#allocation13 + $0x1d0] sm:$0xff] }
 0x4bd   :  { %v6332_v53 = vpop.eup %6331  ;;  %5606 = vmatpush1.bf16.msra.mxu0 %v7656_v51  ;;  %5638 = vmatpush1.bf16.msra.mxu1 %v7658_v11  ;;  %v2963_v51 = vld [vmem:[#allocation13 + $0x150] sm:$0xff]  ;;  %v2970_v11 = vld [vmem:[#allocation13 + $0x188] sm:$0xff] }
 0x4be   :  { %v6334_v8 = vpop.eup %6333  ;;  %v2685_v48 = vmul.f32 %v6332_v53, %v6330_v21  ;;  %5608 = vmatprep.subr.bf16.mxu0 %v7662_v1  ;;  %5640 = vmatprep.subr.bf16.mxu1 %v7664_v45  ;;  %v7685_v16 = vpack.c.bf16 %v2967_v50, %v2963_v51  ;;  %v2971_v21 = vld [vmem:[#allocation13 + $0x190] sm:$0xff]  ;;  %v7696_v50 = vpack.c.bf16 %v2973_v27, %v2969_v3  ;;  %v2977_v51 = vld [vmem:[#allocation13 + $0x1c0] sm:$0xff] }
 0x4bf   :  { %v2684_v62 = vmul.f32 %v6334_v8, %v7479_v58  ;;  %v7689_v58 = vpack.c.bf16 %v2974_v46, %v2970_v11  ;;  %v2975_v53 = vld [vmem:[#allocation13 + $0x1b0] sm:$0xff]  ;;  %v2978_v8 = vld [vmem:[#allocation13 + $0x1c8] sm:$0xff]  ;;  %v2981_v46 = vld [vmem:[#allocation13 + $0x1e0] sm:$0xff] }
 0x4c0   :  { %v7698_v63 = vpack.c.bf16 %v2975_v53, %v2971_v21  ;;  %v2983_v52 = vld [vmem:[#allocation13 + $0x1f0] sm:$0xff]  ;;  %v7708_v3 = vpack.c.bf16 %v2981_v46, %v2977_v51  ;;  %v8334_v51 = vld [vmem:[#allocation36_spill] sm:$0xff] }
 0x4c1   :  { %v7679_v23 = vadd.f32 %v2685_v48, %v2684_v62  ;;  %5610 = vmatpush1.bf16.msra.mxu0 %v7668_v26  ;;  %5642 = vmatpush1.bf16.msra.mxu1 %v7670_v54  ;;  %v2982_v48 = vld [vmem:[#allocation13 + $0x1e8] sm:$0xff]  ;;  %v2980_v62 = vld [vmem:[#allocation13 + $0x1d8] sm:$0xff]  ;;  %v7710_v27 = vpack.c.bf16 %v2983_v52, %v2979_v14 }
 0x4c2   :  { %5612 = vmatprep.subr.bf16.mxu0 %v7674_v49  ;;  %5644 = vmatprep.subr.bf16.mxu1 %v7676_v30  ;;  %v7702_v11 = vpack.c.bf16 %v2982_v48, %v2978_v8  ;;  %v7704_v43 = vpack.c.bf16 %v2984_v17, %v2980_v62 }
 0x4c3   :  { %6337 = vtanh.f32 %v7679_v23 }
 0x4c5   :  { %5614 = vmatpush1.bf16.msra.mxu0 %v7683_v7  ;;  %5646 = vmatpush1.bf16.msra.mxu1 %v7685_v16 }
 0x4c6   :  { %5616 = vmatprep.subr.bf16.mxu0 %v7689_v58  ;;  %5648 = vmatprep.subr.bf16.mxu1 %v7691_v22  ;;  %v6336_v21 = vpop.eup %6335 }
 0x4c9   :  { %5618 = vmatpush1.bf16.msra.mxu0 %v7696_v50  ;;  %5650 = vmatpush1.bf16.msra.mxu1 %v7698_v63 }
 0x4ca   :  { %5620 = vmatprep.subr.bf16.mxu0 %v7702_v11  ;;  %5652 = vmatprep.subr.bf16.mxu1 %v7704_v43 }
 0x4cd   :  { %v6338_v53 = vpop.eup %6337  ;;  %5622 = vmatpush1.bf16.msra.mxu0 %v7708_v3  ;;  %5654 = vmatpush1.bf16.msra.mxu1 %v7710_v27 }
 0x4ce   :  { %v7716_v8 = vmul.f32 %v6338_v53, %v6336_v21  ;;  %5656 = vmatprep.subr.bf16.mxu0 %v7502_v29  ;;  %5688 = vmatprep.subr.bf16.mxu1 %v7504_v40 }
 0x4d0   :  { %8327 = vst [vmem:[#allocation23_spill] sm:$0xff] %v7716_v8  ;;  %3050 = vmatmul.mubr.f32.vlgmr.msra.gmra.mrb[6].mxu0 %v7716_v8  ;;  %3121 = vmatmul.mubr.f32.vlgmr.msra.gmra.mrb[38].mxu1 %v7716_v8 }
 0x4d1   :  { %5658 = vmatpush1.bf16.msra.mxu0 %v7506_v0  ;;  %5690 = vmatpush1.bf16.msra.mxu1 %v7509_v25  ;;  %v8328_v0 = vld [vmem:[#allocation24_spill] sm:$0xff] }
 0x4d2   :  { %5660 = vmatprep.subr.bf16.mxu0 %v7514_v41  ;;  %5692 = vmatprep.subr.bf16.mxu1 %v7516_v15 }
 0x4d3   :  { %3320 = vmatprep.mubr.f32.mxu0 %v8267_v37  ;;  %3391 = vmatprep.mubr.f32.mxu1 %v8267_v37 }
 0x4d5   :  { %5662 = vmatpush1.bf16.msra.mxu0 %v7518_v59  ;;  %5694 = vmatpush1.bf16.msra.mxu1 %v7521_v32  ;;  %v8329_v59 = vld [vmem:[#allocation25_spill] sm:$0xff] }
 0x4d6   :  { %5664 = vmatprep.subr.bf16.mxu0 %v7526_v36  ;;  %5696 = vmatprep.subr.bf16.mxu1 %v7528_v24 }
 0x4d9   :  { %5666 = vmatpush1.bf16.msra.mxu0 %v7530_v47  ;;  %5698 = vmatpush1.bf16.msra.mxu1 %v7533_v20 }
 0x4da   :  { %5668 = vmatprep.subr.bf16.mxu0 %v7538_v44  ;;  %5700 = vmatprep.subr.bf16.mxu1 %v7540_v55  ;;  %v8330_v44 = vld [vmem:[#allocation32_spill] sm:$0xff] }
 0x4dd   :  { %5670 = vmatpush1.bf16.msra.mxu0 %v7542_v34  ;;  %5702 = vmatpush1.bf16.msra.mxu1 %v7545_v42 }
 0x4de   :  { %5672 = vmatprep.subr.bf16.mxu0 %v7550_v56  ;;  %5704 = vmatprep.subr.bf16.mxu1 %v7552_v39 }
 0x4e1   :  { %5674 = vmatpush1.bf16.msra.mxu0 %v7554_v35  ;;  %5706 = vmatpush1.bf16.msra.mxu1 %v7557_v33 }
 0x4e2   :  { %5676 = vmatprep.subr.bf16.mxu0 %v7562_v61  ;;  %5708 = vmatprep.subr.bf16.mxu1 %v7564_v19 }
 0x4e5   :  { %5678 = vmatpush1.bf16.msra.mxu0 %v7566_v31  ;;  %5710 = vmatpush1.bf16.msra.mxu1 %v7569_v2 }
 0x4e6   :  { %5680 = vmatprep.subr.bf16.mxu0 %v7574_v5  ;;  %5712 = vmatprep.subr.bf16.mxu1 %v7576_v57  ;;  %v8331_v5 = vld [vmem:[#allocation39_spill] sm:$0xff] }
 0x4e9   :  { %5682 = vmatpush1.bf16.msra.mxu0 %v7578_v6  ;;  %5714 = vmatpush1.bf16.msra.mxu1 %v7581_v9 }
 0x4ea   :  { %5684 = vmatprep.subr.bf16.mxu0 %v7586_v60  ;;  %5716 = vmatprep.subr.bf16.mxu1 %v7588_v12  ;;  %v8332_v12 = vld [vmem:[#allocation35_spill] sm:$0xff] }
 0x4ed   :  { %5686 = vmatpush1.bf16.msra.mxu0 %v7590_v38  ;;  %5718 = vmatpush1.bf16.msra.mxu1 %v7593_v18 }
 0x4ee   :  { %5720 = vmatprep.subr.bf16.mxu0 %v7598_v28  ;;  %5752 = vmatprep.subr.bf16.mxu1 %v7600_v13  ;;  %v8333_v13 = vld [vmem:[#allocation34_spill] sm:$0xff] }
 0x583   :  { %v2836_v29 = vpop.f32.mrb[24].mxu0  ;;  %v2907_v40 = vpop.f32.mrb[24].mxu1 }
 0x584   :  { %v2912_v25 = vadd.f32 %v2836_v29, %v8328_v0  ;;  %v2838_v41 = vpop.f32.mrb[25].mxu0  ;;  %v2909_v15 = vpop.f32.mrb[25].mxu1  ;;  %v6111_v55 = vadd.f32 %v2907_v40, %v8330_v44 }
 0x585   :  { %v2913_v32 = vadd.f32 %v2838_v41, %v8329_v59  ;;  %v6112_v47 = vadd.f32 %v2909_v15, %v8287_v10  ;;  %v8336_v41 = vld [vmem:[#allocation40_spill] sm:$0xff]  ;;  %v8337_v15 = vld [vmem:[#allocation41_spill] sm:$0xff] }
 0x586   :  { %v4902_v36 = vmul.f32 -1.442695, %v2912_v25 }
 0x587   :  { %v4903_v24 = vmul.f32 -1.442695, %v2913_v32  ;;  %v4904_v20 = vmul.f32 -1.442695, %v6112_v47  ;;  %v8338_v32 = vld [vmem:[#allocation44_spill] sm:$0xff]  ;;  %v8341_v47 = vld [vmem:[#allocation47_spill] sm:$0xff] }
 0x588   :  { %6339 = vpow2.f32 %v4902_v36  ;;  %v8339_v36 = vld [vmem:[#allocation45_spill] sm:$0xff] }
 0x589   :  { %6341 = vpow2.f32 %v4903_v24  ;;  %v8340_v24 = vld [vmem:[#allocation46_spill] sm:$0xff] }
 0x58a   :  { %6343 = vpow2.f32 %v4904_v20  ;;  %v8342_v20 = vld [vmem:[#allocation48_spill] sm:$0xff] }
 0x58b   :  { %6345 = vtanh.f32 %v6111_v55  ;;  %v8343_v55 = vld [vmem:[#allocation49_spill] sm:$0xff] }
 0x592   :  { %v6340_v34 = vpop.eup %6339 }
 0x593   :  { %v6342_v42 = vpop.eup %6341  ;;  %v3135_v56 = vadd.f32 1.0, %v6340_v34  ;;  %v8344_v34 = vld [vmem:[#allocation50_spill] sm:$0xff] }
 0x594   :  { %v3141_v39 = vadd.f32 1.0, %v6342_v42  ;;  %v6344_v35 = vpop.eup %6343  ;;  %v8345_v42 = vld [vmem:[#allocation51_spill] sm:$0xff] }
 0x595   :  { %6347 = vrcp.f32 %v3135_v56  ;;  %v6346_v33 = vpop.eup %6345  ;;  %v3148_v2 = vadd.f32 1.0, %v6344_v35  ;;  %v8346_v56 = vld [vmem:[#allocation52_spill] sm:$0xff] }
 0x596   :  { %6349 = vrcp.f32 %v3141_v39  ;;  %v8347_v39 = vld [vmem:[#allocation53_spill] sm:$0xff] }
 0x597   :  { %6351 = vrcp.f32 %v3148_v2 }
 0x59f   :  { %v6348_v61 = vpop.eup %6347 }
 0x5a0   :  { %v6350_v19 = vpop.eup %6349  ;;  %v3152_v31 = vmul.f32 %v6348_v61, %v6346_v33 }
 0x5a1   :  { %v3151_v57 = vmul.f32 %v6350_v19, %v8331_v5  ;;  %v6352_v14 = vpop.eup %6351  ;;  %v8348_v19 = vld [vmem:[#allocation54_spill] sm:$0xff] }
 0x5a3   :  { %v7761_v6 = vadd.f32 %v3152_v31, %v3151_v57  ;;  %v3051_v9 = vpop.f32.mrb[6].mxu0  ;;  %v3122_v60 = vpop.f32.mrb[38].mxu1  ;;  %v8349_v31 = vld [vmem:[#allocation22_spill] sm:$0xff] }
 0x5a4   :  { %v6125_v38 = vadd.f32 %v3051_v9, %v8332_v12  ;;  %v3053_v18 = vpop.f32.mrb[7].mxu0  ;;  %v3124_v28 = vpop.f32.mrb[39].mxu1  ;;  %v6141_v53 = vadd.f32 %v3122_v60, %v7138_v4 }
 0x5a5   :  { %v6126_v48 = vadd.f32 %v3053_v18, %v8333_v13  ;;  %6353 = vtanh.f32 %v7761_v6  ;;  %v6142_v46 = vadd.f32 %v3124_v28, %v8334_v51  ;;  %v3693_v28 = vld [vmem:[#allocation11 + $0x78] sm:$0xff] }
 0x5a6   :  { %v4905_v62 = vmul.f32 -1.442695, %v6125_v38  ;;  %v3689_v38 = vld [vmem:[#allocation11 + $0x58] sm:$0xff] }
 0x5a7   :  { %v4906_v17 = vmul.f32 -1.442695, %v6126_v48  ;;  %v4907_v21 = vmul.f32 -1.442695, %v6142_v46  ;;  %v3686_v48 = vld [vmem:[#allocation11 + $0x40] sm:$0xff] }
 0x5a8   :  { %6355 = vpow2.f32 %v4905_v62  ;;  %v3690_v62 = vld [vmem:[#allocation11 + $0x60] sm:$0xff] }
 0x5a9   :  { %6357 = vpow2.f32 %v4906_v17  ;;  %v7828_v17 = vpack.c.bf16 %v3693_v28, %v3689_v38  ;;  %v7830_v46 = vpack.c.bf16 %v3690_v62, %v3686_v48  ;;  %v3721_v38 = vld [vmem:[#allocation11 + $0x158] sm:$0xff]  ;;  %v3718_v62 = vld [vmem:[#allocation11 + $0x140] sm:$0xff] }
 0x5aa   :  { %6359 = vpow2.f32 %v4907_v21  ;;  %v3725_v48 = vld [vmem:[#allocation11 + $0x178] sm:$0xff] }
 0x5ab   :  { %6361 = vtanh.f32 %v6141_v53  ;;  %v3695_v53 = vld [vmem:[#allocation11 + $0x88] sm:$0xff] }
 0x5af   :  { %v6354_v52 = vpop.eup %6353 }
 0x5b0   :  { %v7768_v29 = vmul.f32 %v6354_v52, %v6352_v14  ;;  %v3688_v14 = vld [vmem:[#allocation11 + $0x50] sm:$0xff] }
 0x5b1   :  { %v3692_v52 = vld [vmem:[#allocation11 + $0x70] sm:$0xff] }
 0x5b2   :  { %8335 = vst [vmem:[#allocation24_spill] sm:$0xff] %v7768_v29  ;;  %v6356_v40 = vpop.eup %6355  ;;  %3321 = vmatmul.mubr.f32.vlgmr.msra.gmra.mrb[26].mxu0 %v7768_v29  ;;  %3392 = vmatmul.mubr.f32.vlgmr.msra.gmra.mrb[26].mxu1 %v7768_v29  ;;  %v7833_v21 = vpack.c.bf16 %v3692_v52, %v3688_v14  ;;  %v3722_v14 = vld [vmem:[#allocation11 + $0x160] sm:$0xff]  ;;  %v7876_v52 = vpack.c.bf16 %v3725_v48, %v3721_v38  ;;  %v3740_v38 = vld [vmem:[#allocation11 + $0x1f0] sm:$0xff] }
 0x5b3   :  { %v6358_v0 = vpop.eup %6357  ;;  %v3160_v25 = vadd.f32 1.0, %v6356_v40  ;;  %5722 = vmatpush1.bf16.msra.mxu0 %v8336_v41  ;;  %5754 = vmatpush1.bf16.msra.mxu1 %v8337_v15  ;;  %v3699_v40 = vld [vmem:[#allocation11 + $0xa8] sm:$0xff]  ;;  %v3701_v41 = vld [vmem:[#allocation11 + $0xb8] sm:$0xff]  ;;  %v3694_v15 = vld [vmem:[#allocation11 + $0x80] sm:$0xff] }
 0x5b4   :  { %v3166_v59 = vadd.f32 1.0, %v6358_v0  ;;  %5724 = vmatprep.subr.bf16.mxu0 %v8338_v32  ;;  %5756 = vmatprep.subr.bf16.mxu1 %v8339_v36  ;;  %v6360_v35 = vpop.eup %6359  ;;  %v3697_v0 = vld [vmem:[#allocation11 + $0x98] sm:$0xff] }
 0x5b5   :  { %6363 = vrcp.f32 %v3160_v25  ;;  %3535 = vmatprep.mubr.f32.mxu0 %v8267_v37  ;;  %3606 = vmatprep.mubr.f32.mxu1 %v8267_v37  ;;  %v6362_v33 = vpop.eup %6361  ;;  %v3173_v57 = vadd.f32 1.0, %v6360_v35  ;;  %v7838_v25 = vpack.c.bf16 %v3699_v40, %v3695_v53  ;;  %v7840_v32 = vpack.c.bf16 %v3701_v41, %v3697_v0  ;;  %v3702_v35 = vld [vmem:[#allocation11 + $0xc0] sm:$0xff]  ;;  %v3720_v40 = vld [vmem:[#allocation11 + $0x150] sm:$0xff] }
 0x5b6   :  { %6365 = vrcp.f32 %v3166_v59  ;;  %v3698_v59 = vld [vmem:[#allocation11 + $0xa0] sm:$0xff]  ;;  %v7878_v53 = vpack.c.bf16 %v3722_v14, %v3718_v62  ;;  %v3724_v0 = vld [vmem:[#allocation11 + $0x170] sm:$0xff]  ;;  %v3894_v62 = vld [vmem:[#allocation13 + $0x8] sm:$0xff] }
 0x5b7   :  { %5726 = vmatpush1.bf16.msra.mxu0 %v8340_v24  ;;  %5758 = vmatpush1.bf16.msra.mxu1 %v8341_v47  ;;  %6367 = vrcp.f32 %v3173_v57  ;;  %v7842_v36 = vpack.c.bf16 %v3698_v59, %v3694_v15  ;;  %v3696_v24 = vld [vmem:[#allocation11 + $0x90] sm:$0xff]  ;;  %v3711_v57 = vld [vmem:[#allocation11 + $0x108] sm:$0xff]  ;;  %v7881_v41 = vpack.c.bf16 %v3724_v0, %v3720_v40  ;;  %v3896_v40 = vld [vmem:[#allocation13 + $0x18] sm:$0xff] }
 0x5b8   :  { %5728 = vmatprep.subr.bf16.mxu0 %v8342_v20  ;;  %5760 = vmatprep.subr.bf16.mxu1 %v8343_v55  ;;  %v3700_v47 = vld [vmem:[#allocation11 + $0xb0] sm:$0xff]  ;;  %v3703_v55 = vld [vmem:[#allocation11 + $0xc8] sm:$0xff] }
 0x5b9   :  { %v7845_v20 = vpack.c.bf16 %v3700_v47, %v3696_v24  ;;  %v3727_v15 = vld [vmem:[#allocation11 + $0x188] sm:$0xff]  ;;  %v3729_v24 = vld [vmem:[#allocation11 + $0x198] sm:$0xff] }
 0x5ba   :  { %v3731_v59 = vld [vmem:[#allocation11 + $0x1a8] sm:$0xff] }
 0x5bb   :  { %5730 = vmatpush1.bf16.msra.mxu0 %v8344_v34  ;;  %5762 = vmatpush1.bf16.msra.mxu1 %v8345_v42  ;;  %v3707_v34 = vld [vmem:[#allocation11 + $0xe8] sm:$0xff]  ;;  %v3705_v42 = vld [vmem:[#allocation11 + $0xd8] sm:$0xff]  ;;  %v7886_v47 = vpack.c.bf16 %v3731_v59, %v3727_v15 }
 0x5bc   :  { %5732 = vmatprep.subr.bf16.mxu0 %v8346_v56  ;;  %5764 = vmatprep.subr.bf16.mxu1 %v8347_v39  ;;  %v7850_v56 = vpack.c.bf16 %v3707_v34, %v3703_v55  ;;  %v3709_v39 = vld [vmem:[#allocation11 + $0xf8] sm:$0xff]  ;;  %v3726_v34 = vld [vmem:[#allocation11 + $0x180] sm:$0xff]  ;;  %v3898_v14 = vld [vmem:[#allocation13 + $0x28] sm:$0xff] }
 0x5bd   :  { %v3733_v55 = vld [vmem:[#allocation11 + $0x1b8] sm:$0xff]  ;;  %v7910_v0 = vpack.c.bf16 %v3898_v14, %v3894_v62 }
 0x5be   :  { %v3900_v15 = vld [vmem:[#allocation13 + $0x38] sm:$0xff] }
 0x5bf   :  { %v6364_v61 = vpop.eup %6363  ;;  %5734 = vmatpush1.bf16.msra.mxu0 %v8348_v19  ;;  %5766 = vmatpush1.bf16.msra.mxu1 %v8349_v31  ;;  %v3704_v31 = vld [vmem:[#allocation11 + $0xd0] sm:$0xff]  ;;  %v7912_v59 = vpack.c.bf16 %v3900_v15, %v3896_v40 }
 0x5c0   :  { %v6366_v2 = vpop.eup %6365  ;;  %v3177_v5 = vmul.f32 %v6364_v61, %v6362_v33  ;;  %5736 = vmatprep.subr.bf16.mxu0 %v7662_v1  ;;  %5768 = vmatprep.subr.bf16.mxu1 %v7664_v45  ;;  %v3683_v1 = vld [vmem:[#allocation11 + $0x28] sm:$0xff]  ;;  %v3681_v45 = vld [vmem:[#allocation11 + $0x18] sm:$0xff]  ;;  %v3706_v33 = vld [vmem:[#allocation11 + $0xe0] sm:$0xff]  ;;  %v7852_v61 = vpack.c.bf16 %v3709_v39, %v3705_v42  ;;  %v7888_v39 = vpack.c.bf16 %v3733_v55, %v3729_v24 }
 0x5c1   :  { %v3176_v9 = vmul.f32 %v6366_v2, %v7679_v23  ;;  %v7854_v19 = vpack.c.bf16 %v3706_v33, %v3702_v35  ;;  %v3708_v2 = vld [vmem:[#allocation11 + $0xf0] sm:$0xff]  ;;  %v3730_v42 = vld [vmem:[#allocation11 + $0x1a0] sm:$0xff] }
 0x5c2   :  { %v7890_v35 = vpack.c.bf16 %v3730_v42, %v3726_v34  ;;  %v3728_v33 = vld [vmem:[#allocation11 + $0x190] sm:$0xff]  ;;  %v8351_v34 = vld [vmem:[#allocation26_spill] sm:$0xff] }
 0x5c3   :  { %v7791_v60 = vadd.f32 %v3177_v5, %v3176_v9  ;;  %5738 = vmatpush1.bf16.msra.mxu0 %v7668_v26  ;;  %5770 = vmatpush1.bf16.msra.mxu1 %v7670_v54  ;;  %v3679_v54 = vld [vmem:[#allocation11 + $0x8] sm:$0xff]  ;;  %v7857_v5 = vpack.c.bf16 %v3708_v2, %v3704_v31  ;;  %v3732_v31 = vld [vmem:[#allocation11 + $0x1b0] sm:$0xff] }
 0x5c4   :  { %5740 = vmatprep.subr.bf16.mxu0 %v7674_v49  ;;  %5772 = vmatprep.subr.bf16.mxu1 %v7676_v30  ;;  %v6368_v49 = vpop.eup %6367  ;;  %v7814_v26 = vpack.c.bf16 %v3683_v1, %v3679_v54  ;;  %v3715_v9 = vld [vmem:[#allocation11 + $0x128] sm:$0xff]  ;;  %v3717_v54 = vld [vmem:[#allocation11 + $0x138] sm:$0xff]  ;;  %v3710_v1 = vld [vmem:[#allocation11 + $0x100] sm:$0xff]  ;;  %v7893_v2 = vpack.c.bf16 %v3732_v31, %v3728_v33 }
 0x5c5   :  { %6369 = vtanh.f32 %v7791_v60 }
 0x5c7   :  { %5742 = vmatpush1.bf16.msra.mxu0 %v7683_v7  ;;  %5774 = vmatpush1.bf16.msra.mxu1 %v7685_v16  ;;  %v3685_v7 = vld [vmem:[#allocation11 + $0x38] sm:$0xff]  ;;  %v3678_v16 = vld [vmem:[#allocation11] sm:$0xff] }
 0x5c8   :  { %5744 = vmatprep.subr.bf16.mxu0 %v7689_v58  ;;  %5776 = vmatprep.subr.bf16.mxu1 %v7691_v22  ;;  %v3682_v58 = vld [vmem:[#allocation11 + $0x20] sm:$0xff]  ;;  %v7816_v22 = vpack.c.bf16 %v3685_v7, %v3681_v45 }
 0x5c9   :  { %v3714_v45 = vld [vmem:[#allocation11 + $0x120] sm:$0xff] }
 0x5cb   :  { %5746 = vmatpush1.bf16.msra.mxu0 %v7696_v50  ;;  %5778 = vmatpush1.bf16.msra.mxu1 %v7698_v63  ;;  %v7818_v50 = vpack.c.bf16 %v3682_v58, %v3678_v16  ;;  %v3680_v63 = vld [vmem:[#allocation11 + $0x10] sm:$0xff]  ;;  %v7866_v16 = vpack.c.bf16 %v3714_v45, %v3710_v1  ;;  %v3741_v1 = vld [vmem:[#allocation11 + $0x1f8] sm:$0xff]  ;;  %v3734_v45 = vld [vmem:[#allocation11 + $0x1c0] sm:$0xff] }
 0x5cc   :  { %5748 = vmatprep.subr.bf16.mxu0 %v7702_v11  ;;  %5780 = vmatprep.subr.bf16.mxu1 %v7704_v43  ;;  %v3684_v11 = vld [vmem:[#allocation11 + $0x30] sm:$0xff] }
 0x5cd   :  { %v7821_v43 = vpack.c.bf16 %v3684_v11, %v3680_v63  ;;  %v3712_v58 = vld [vmem:[#allocation11 + $0x110] sm:$0xff] }
 0x5ce   :  { %v3716_v63 = vld [vmem:[#allocation11 + $0x130] sm:$0xff] }
 0x5cf   :  { %v6370_v23 = vpop.eup %6369  ;;  %5750 = vmatpush1.bf16.msra.mxu0 %v7708_v3  ;;  %5782 = vmatpush1.bf16.msra.mxu1 %v7710_v27  ;;  %v3687_v3 = vld [vmem:[#allocation11 + $0x48] sm:$0xff]  ;;  %v7869_v11 = vpack.c.bf16 %v3716_v63, %v3712_v58  ;;  %v3738_v58 = vld [vmem:[#allocation11 + $0x1e0] sm:$0xff] }
 0x5d0   :  { %v7808_v30 = vmul.f32 %v6370_v23, %v6368_v49  ;;  %5784 = vmatprep.subr.bf16.mxu0 %v7814_v26  ;;  %5816 = vmatprep.subr.bf16.mxu1 %v7816_v22  ;;  %v3691_v27 = vld [vmem:[#allocation11 + $0x68] sm:$0xff]  ;;  %v3713_v49 = vld [vmem:[#allocation11 + $0x118] sm:$0xff]  ;;  %v7862_v23 = vpack.c.bf16 %v3715_v9, %v3711_v57 }
 0x5d1   :  { %v7826_v18 = vpack.c.bf16 %v3691_v27, %v3687_v3  ;;  %v7864_v7 = vpack.c.bf16 %v3717_v54, %v3713_v49  ;;  %v3719_v3 = vld [vmem:[#allocation11 + $0x148] sm:$0xff]  ;;  %v3737_v49 = vld [vmem:[#allocation11 + $0x1d8] sm:$0xff] }
 0x5d2   :  { %8350 = vst [vmem:[#allocation25_spill] sm:$0xff] %v7808_v30  ;;  %3536 = vmatmul.mubr.f32.vlgmr.msra.gmra.mrb[4].mxu0 %v7808_v30  ;;  %3607 = vmatmul.mubr.f32.vlgmr.msra.gmra.mrb[36].mxu1 %v7808_v30  ;;  %v3723_v27 = vld [vmem:[#allocation11 + $0x168] sm:$0xff]  ;;  %v7900_v63 = vpack.c.bf16 %v3741_v1, %v3737_v49 }
 0x5d3   :  { %3806 = vmatprep.mubr.f32.mxu0 %v8267_v37  ;;  %3877 = vmatprep.mubr.f32.mxu1 %v8267_v37  ;;  %v7874_v28 = vpack.c.bf16 %v3723_v27, %v3719_v3  ;;  %v3735_v57 = vld [vmem:[#allocation11 + $0x1c8] sm:$0xff]  ;;  %v7902_v3 = vpack.c.bf16 %v3738_v58, %v3734_v45  ;;  %v3736_v27 = vld [vmem:[#allocation11 + $0x1d0] sm:$0xff] }
 0x5d4   :  { %5786 = vmatpush1.bf16.msra.mxu0 %v7818_v50  ;;  %5818 = vmatpush1.bf16.msra.mxu1 %v7821_v43  ;;  %v3739_v9 = vld [vmem:[#allocation11 + $0x1e8] sm:$0xff]  ;;  %v7905_v48 = vpack.c.bf16 %v3740_v38, %v3736_v27 }
 0x5d5   :  { %5788 = vmatprep.subr.bf16.mxu0 %v7826_v18  ;;  %5820 = vmatprep.subr.bf16.mxu1 %v7828_v17  ;;  %v7898_v54 = vpack.c.bf16 %v3739_v9, %v3735_v57  ;;  %v8352_v57 = vld [vmem:[#allocation27_spill] sm:$0xff] }
 0x5d8   :  { %5790 = vmatpush1.bf16.msra.mxu0 %v7830_v46  ;;  %5822 = vmatpush1.bf16.msra.mxu1 %v7833_v21 }
 0x5d9   :  { %5792 = vmatprep.subr.bf16.mxu0 %v7838_v25  ;;  %5824 = vmatprep.subr.bf16.mxu1 %v7840_v32 }
 0x5dc   :  { %5794 = vmatpush1.bf16.msra.mxu0 %v7842_v36  ;;  %5826 = vmatpush1.bf16.msra.mxu1 %v7845_v20 }
 0x5dd   :  { %5796 = vmatprep.subr.bf16.mxu0 %v7850_v56  ;;  %5828 = vmatprep.subr.bf16.mxu1 %v7852_v61 }
 0x5e0   :  { %5798 = vmatpush1.bf16.msra.mxu0 %v7854_v19  ;;  %5830 = vmatpush1.bf16.msra.mxu1 %v7857_v5 }
 0x5e1   :  { %5800 = vmatprep.subr.bf16.mxu0 %v7862_v23  ;;  %5832 = vmatprep.subr.bf16.mxu1 %v7864_v7 }
 0x5e4   :  { %5802 = vmatpush1.bf16.msra.mxu0 %v7866_v16  ;;  %5834 = vmatpush1.bf16.msra.mxu1 %v7869_v11 }
 0x5e5   :  { %5804 = vmatprep.subr.bf16.mxu0 %v7874_v28  ;;  %5836 = vmatprep.subr.bf16.mxu1 %v7876_v52 }
 0x5e8   :  { %5806 = vmatpush1.bf16.msra.mxu0 %v7878_v53  ;;  %5838 = vmatpush1.bf16.msra.mxu1 %v7881_v41 }
 0x5e9   :  { %5808 = vmatprep.subr.bf16.mxu0 %v7886_v47  ;;  %5840 = vmatprep.subr.bf16.mxu1 %v7888_v39 }
 0x5ec   :  { %5810 = vmatpush1.bf16.msra.mxu0 %v7890_v35  ;;  %5842 = vmatpush1.bf16.msra.mxu1 %v7893_v2 }
 0x5ed   :  { %5812 = vmatprep.subr.bf16.mxu0 %v7898_v54  ;;  %5844 = vmatprep.subr.bf16.mxu1 %v7900_v63 }
 0x5f0   :  { %5814 = vmatpush1.bf16.msra.mxu0 %v7902_v3  ;;  %5846 = vmatpush1.bf16.msra.mxu1 %v7905_v48 }
 0x5f1   :  { %5848 = vmatprep.subr.bf16.mxu0 %v7910_v0  ;;  %5880 = vmatprep.subr.bf16.mxu1 %v7912_v59 }
 0x685   :  { %v3322_v24 = vpop.f32.mrb[26].mxu0  ;;  %v3393_v55 = vpop.f32.mrb[26].mxu1 }
 0x686   :  { %v3398_v42 = vadd.f32 %v3322_v24, %v8351_v34  ;;  %v3324_v33 = vpop.f32.mrb[27].mxu0  ;;  %v3395_v31 = vpop.f32.mrb[27].mxu1  ;;  %v6113_v27 = vadd.f32 %v3393_v55, %v8330_v44  ;;  %v3912_v44 = vld [vmem:[#allocation13 + $0x98] sm:$0xff] }
 0x687   :  { %v3399_v9 = vadd.f32 %v3324_v33, %v8352_v57  ;;  %v6114_v45 = vadd.f32 %v3395_v31, %v8287_v10 }
 0x688   :  { %v4908_v49 = vmul.f32 -1.442695, %v3398_v42 }
 0x689   :  { %v4909_v1 = vmul.f32 -1.442695, %v3399_v9  ;;  %v4910_v58 = vmul.f32 -1.442695, %v6114_v45 }
 0x68a   :  { %6371 = vpow2.f32 %v4908_v49 }
 0x68b   :  { %6373 = vpow2.f32 %v4909_v1 }
 0x68c   :  { %6375 = vpow2.f32 %v4910_v58 }
 0x68d   :  { %6377 = vtanh.f32 %v6113_v27 }
 0x694   :  { %v6372_v38 = vpop.eup %6371 }
 0x695   :  { %v6374_v62 = vpop.eup %6373  ;;  %v3621_v14 = vadd.f32 1.0, %v6372_v38 }
 0x696   :  { %v3627_v40 = vadd.f32 1.0, %v6374_v62  ;;  %v6376_v15 = vpop.eup %6375 }
 0x697   :  { %6379 = vrcp.f32 %v3621_v14  ;;  %v6378_v24 = vpop.eup %6377  ;;  %v3634_v57 = vadd.f32 1.0, %v6376_v15  ;;  %v3895_v15 = vld [vmem:[#allocation13 + $0x10] sm:$0xff] }
 0x698   :  { %6381 = vrcp.f32 %v3627_v40  ;;  %v3897_v40 = vld [vmem:[#allocation13 + $0x20] sm:$0xff] }
 0x699   :  { %6383 = vrcp.f32 %v3634_v57  ;;  %v3908_v57 = vld [vmem:[#allocation13 + $0x78] sm:$0xff] }
 0x6a1   :  { %v6380_v34 = vpop.eup %6379 }
 0x6a2   :  { %v6382_v42 = vpop.eup %6381  ;;  %v3638_v33 = vmul.f32 %v6380_v34, %v6378_v24  ;;  %v3899_v24 = vld [vmem:[#allocation13 + $0x30] sm:$0xff]  ;;  %v3902_v34 = vld [vmem:[#allocation13 + $0x48] sm:$0xff] }
 0x6a3   :  { %v3637_v9 = vmul.f32 %v6382_v42, %v7761_v6  ;;  %v3893_v6 = vld [vmem:[#allocation13] sm:$0xff]  ;;  %v3906_v42 = vld [vmem:[#allocation13 + $0x68] sm:$0xff]  ;;  %v7929_v8 = vpack.c.bf16 %v3899_v24, %v3895_v15 }
 0x6a5   :  { %v7921_v31 = vadd.f32 %v3638_v33, %v3637_v9  ;;  %v3537_v49 = vpop.f32.mrb[4].mxu0  ;;  %v3608_v55 = vpop.f32.mrb[36].mxu1  ;;  %v3904_v33 = vld [vmem:[#allocation13 + $0x58] sm:$0xff]  ;;  %8355 = vst [vmem:[#allocation41_spill] sm:$0xff] %v7929_v8 }
 0x6a6   :  { %v6123_v1 = vadd.f32 %v3537_v49, %v8332_v12  ;;  %v3539_v45 = vpop.f32.mrb[5].mxu0  ;;  %v3610_v58 = vpop.f32.mrb[37].mxu1  ;;  %v7936_v30 = vpack.c.bf16 %v3908_v57, %v3904_v33  ;;  %v3910_v12 = vld [vmem:[#allocation13 + $0x88] sm:$0xff] }
 0x6a7   :  { %8353 = vst [vmem:[#allocation39_spill] sm:$0xff] %v7921_v31  ;;  %v6124_v27 = vadd.f32 %v3539_v45, %v8333_v13  ;;  %6385 = vtanh.f32 %v7921_v31  ;;  %v6140_v14 = vadd.f32 %v3610_v58, %v8334_v51  ;;  %v6384_v9 = vpop.eup %6383  ;;  %v7927_v45 = vpack.c.bf16 %v3897_v40, %v3893_v6  ;;  %v3903_v51 = vld [vmem:[#allocation13 + $0x50] sm:$0xff]  ;;  %v3914_v31 = vld [vmem:[#allocation13 + $0xa8] sm:$0xff] }
 0x6a8   :  { %v4911_v38 = vmul.f32 -1.442695, %v6123_v1  ;;  %v3901_v1 = vld [vmem:[#allocation13 + $0x40] sm:$0xff]  ;;  %8358 = vst [vmem:[#allocation46_spill] sm:$0xff] %v7936_v30  ;;  %v3907_v13 = vld [vmem:[#allocation13 + $0x70] sm:$0xff]  ;;  %v7948_v57 = vpack.c.bf16 %v3914_v31, %v3910_v12 }
 0x6a9   :  { %v4912_v62 = vmul.f32 -1.442695, %v6124_v27  ;;  %v4913_v29 = vmul.f32 -1.442695, %v6140_v14  ;;  %8354 = vst [vmem:[#allocation40_spill] sm:$0xff] %v7927_v45  ;;  %v3905_v27 = vld [vmem:[#allocation13 + $0x60] sm:$0xff]  ;;  %v7944_v24 = vpack.c.bf16 %v3907_v13, %v3903_v51 }
 0x6aa   :  { %6387 = vpow2.f32 %v4911_v38  ;;  %v6139_v38 = vadd.f32 %v3608_v55, %v7138_v4  ;;  %v3916_v14 = vld [vmem:[#allocation13 + $0xb8] sm:$0xff]  ;;  %v7942_v55 = vpack.c.bf16 %v3905_v27, %v3901_v1  ;;  %8361 = vst [vmem:[#allocation49_spill] sm:$0xff] %v7948_v57  ;;  %v3922_v1 = vld [vmem:[#allocation13 + $0xe8] sm:$0xff]  ;;  %v3917_v51 = vld [vmem:[#allocation13 + $0xc0] sm:$0xff] }
 0x6ab   :  { %6389 = vpow2.f32 %v4912_v62  ;;  %v7934_v62 = vpack.c.bf16 %v3906_v42, %v3902_v34  ;;  %8360 = vst [vmem:[#allocation48_spill] sm:$0xff] %v7944_v24  ;;  %v3909_v34 = vld [vmem:[#allocation13 + $0x80] sm:$0xff]  ;;  %v3920_v27 = vld [vmem:[#allocation13 + $0xd8] sm:$0xff] }
 0x6ac   :  { %6391 = vpow2.f32 %v4913_v29  ;;  %8359 = vst [vmem:[#allocation47_spill] sm:$0xff] %v7942_v55  ;;  %v3913_v42 = vld [vmem:[#allocation13 + $0xa0] sm:$0xff]  ;;  %v3911_v29 = vld [vmem:[#allocation13 + $0x90] sm:$0xff]  ;;  %v3924_v13 = vld [vmem:[#allocation13 + $0xf8] sm:$0xff] }
 0x6ad   :  { %8357 = vst [vmem:[#allocation45_spill] sm:$0xff] %v7934_v62  ;;  %6393 = vtanh.f32 %v6139_v38  ;;  %v7956_v12 = vpack.c.bf16 %v3913_v42, %v3909_v34  ;;  %v3921_v31 = vld [vmem:[#allocation13 + $0xe0] sm:$0xff] }
 0x6ae   :  { %v7968_v34 = vpack.c.bf16 %v3921_v31, %v3917_v51  ;;  %v3940_v51 = vld [vmem:[#allocation13 + $0x178] sm:$0xff] }
 0x6af   :  { %8363 = vst [vmem:[#allocation51_spill] sm:$0xff] %v7956_v12 }
 0x6b0   :  { %8367 = vst [vmem:[#allocation22_spill] sm:$0xff] %v7968_v34 }
 0x6b1   :  { %v6386_v49 = vpop.eup %6385 }
 0x6b2   :  { %v7932_v58 = vmul.f32 %v6386_v49, %v6384_v9  ;;  %v7950_v9 = vpack.c.bf16 %v3916_v14, %v3912_v44  ;;  %v3915_v49 = vld [vmem:[#allocation13 + $0xb0] sm:$0xff]  ;;  %v7964_v14 = vpack.c.bf16 %v3924_v13, %v3920_v27 }
 0x6b3   :  { %v7958_v44 = vpack.c.bf16 %v3915_v49, %v3911_v29  ;;  %v3925_v29 = vld [vmem:[#allocation13 + $0x100] sm:$0xff]  ;;  %v3927_v27 = vld [vmem:[#allocation13 + $0x110] sm:$0xff] }
 0x6b4   :  { %8356 = vst [vmem:[#allocation44_spill] sm:$0xff] %v7932_v58  ;;  %v6388_v6 = vpop.eup %6387  ;;  %3807 = vmatmul.mubr.f32.vlgmr.msra.gmra.mrb[28].mxu0 %v7932_v58  ;;  %3878 = vmatmul.mubr.f32.vlgmr.msra.gmra.mrb[28].mxu1 %v7932_v58  ;;  %8362 = vst [vmem:[#allocation50_spill] sm:$0xff] %v7950_v9  ;;  %v3930_v58 = vld [vmem:[#allocation13 + $0x128] sm:$0xff]  ;;  %v3929_v49 = vld [vmem:[#allocation13 + $0x120] sm:$0xff] }
 0x6b5   :  { %v6390_v40 = vpop.eup %6389  ;;  %v3646_v15 = vadd.f32 1.0, %v6388_v6  ;;  %5850 = vmatpush1.bf16.msra.mxu0 %v7927_v45  ;;  %5882 = vmatpush1.bf16.msra.mxu1 %v7929_v8  ;;  %v3918_v6 = vld [vmem:[#allocation13 + $0xc8] sm:$0xff]  ;;  %8364 = vst [vmem:[#allocation52_spill] sm:$0xff] %v7958_v44  ;;  %8366 = vst [vmem:[#allocation54_spill] sm:$0xff] %v7964_v14  ;;  %v3931_v13 = vld [vmem:[#allocation13 + $0x130] sm:$0xff] }
 0x6b6   :  { %v3652_v33 = vadd.f32 1.0, %v6390_v40  ;;  %5852 = vmatprep.subr.bf16.mxu0 %v7934_v62  ;;  %5884 = vmatprep.subr.bf16.mxu1 %v7936_v30  ;;  %v7962_v38 = vpack.c.bf16 %v3922_v1, %v3918_v6  ;;  %v3919_v40 = vld [vmem:[#allocation13 + $0xd0] sm:$0xff] }
 0x6b7   :  { %6395 = vrcp.f32 %v3646_v15  ;;  %4021 = vmatprep.mubr.f32.mxu0 %v8267_v37  ;;  %4092 = vmatprep.mubr.f32.mxu1 %v8267_v37  ;;  %v3923_v15 = vld [vmem:[#allocation13 + $0xf0] sm:$0xff] }
 0x6b8   :  { %6397 = vrcp.f32 %v3652_v33  ;;  %8365 = vst [vmem:[#allocation53_spill] sm:$0xff] %v7962_v38  ;;  %v3926_v33 = vld [vmem:[#allocation13 + $0x108] sm:$0xff]  ;;  %v7970_v42 = vpack.c.bf16 %v3923_v15, %v3919_v40  ;;  %v7980_v15 = vpack.c.bf16 %v3929_v49, %v3925_v29  ;;  %v3939_v8 = vld [vmem:[#allocation13 + $0x170] sm:$0xff] }
 0x6b9   :  { %5854 = vmatpush1.bf16.msra.mxu0 %v7942_v55  ;;  %5886 = vmatpush1.bf16.msra.mxu1 %v7944_v24  ;;  %v3928_v55 = vld [vmem:[#allocation13 + $0x118] sm:$0xff]  ;;  %v7974_v6 = vpack.c.bf16 %v3930_v58, %v3926_v33  ;;  %v3933_v58 = vld [vmem:[#allocation13 + $0x140] sm:$0xff]  ;;  %v3946_v49 = vld [vmem:[#allocation13 + $0x1a8] sm:$0xff] }
 0x6ba   :  { %5856 = vmatprep.subr.bf16.mxu0 %v7948_v57  ;;  %5888 = vmatprep.subr.bf16.mxu1 %v7950_v9  ;;  %v3932_v24 = vld [vmem:[#allocation13 + $0x138] sm:$0xff]  ;;  %8368 = vst [vmem:[#allocation26_spill] sm:$0xff] %v7970_v42  ;;  %v3934_v9 = vld [vmem:[#allocation13 + $0x148] sm:$0xff] }
 0x6bb   :  { %v7976_v1 = vpack.c.bf16 %v3932_v24, %v3928_v55  ;;  %v3938_v57 = vld [vmem:[#allocation13 + $0x168] sm:$0xff]  ;;  %v3937_v55 = vld [vmem:[#allocation13 + $0x160] sm:$0xff] }
 0x6bc   :  { %v7986_v30 = vpack.c.bf16 %v3938_v57, %v3934_v9  ;;  %v3941_v9 = vld [vmem:[#allocation13 + $0x180] sm:$0xff] }
 0x6bd   :  { %5858 = vmatpush1.bf16.msra.mxu0 %v7956_v12  ;;  %5890 = vmatpush1.bf16.msra.mxu1 %v7958_v44  ;;  %v6392_v12 = vpop.eup %6391  ;;  %v3936_v44 = vld [vmem:[#allocation13 + $0x158] sm:$0xff] }
 0x6be   :  { %5860 = vmatprep.subr.bf16.mxu0 %v7962_v38  ;;  %5892 = vmatprep.subr.bf16.mxu1 %v7964_v14  ;;  %v6394_v31 = vpop.eup %6393  ;;  %v7982_v14 = vpack.c.bf16 %v3931_v13, %v3927_v27  ;;  %v3659_v38 = vadd.f32 1.0, %v6392_v12  ;;  %v7988_v62 = vpack.c.bf16 %v3940_v51, %v3936_v44  ;;  %v3944_v27 = vld [vmem:[#allocation13 + $0x198] sm:$0xff]  ;;  %v7995_v12 = vpack.c.bf16 %v3937_v55, %v3933_v58  ;;  %v3945_v44 = vld [vmem:[#allocation13 + $0x1a0] sm:$0xff] }
 0x6bf   :  { %v3948_v13 = vld [vmem:[#allocation13 + $0x1b8] sm:$0xff] }
 0x6c0   :  { %6399 = vrcp.f32 %v3659_v38  ;;  %v8003_v51 = vpack.c.bf16 %v3948_v13, %v3944_v27  ;;  %v3956_v58 = vld [vmem:[#allocation13 + $0x1f8] sm:$0xff]  ;;  %v3951_v27 = vld [vmem:[#allocation13 + $0x1d0] sm:$0xff] }
 0x6c1   :  { %v6396_v40 = vpop.eup %6395  ;;  %5862 = vmatpush1.bf16.msra.mxu0 %v7968_v34  ;;  %5894 = vmatpush1.bf16.msra.mxu1 %v7970_v42  ;;  %v3935_v34 = vld [vmem:[#allocation13 + $0x150] sm:$0xff]  ;;  %v3942_v42 = vld [vmem:[#allocation13 + $0x188] sm:$0xff] }
 0x6c2   :  { %v6398_v24 = vpop.eup %6397  ;;  %v3663_v33 = vmul.f32 %v6396_v40, %v6394_v31  ;;  %5864 = vmatprep.subr.bf16.mxu0 %v7974_v6  ;;  %5896 = vmatprep.subr.bf16.mxu1 %v7976_v1  ;;  %v7997_v57 = vpack.c.bf16 %v3939_v8, %v3935_v34  ;;  %v3943_v31 = vld [vmem:[#allocation13 + $0x190] sm:$0xff]  ;;  %v8008_v8 = vpack.c.bf16 %v3945_v44, %v3941_v9  ;;  %v3949_v34 = vld [vmem:[#allocation13 + $0x1c0] sm:$0xff] }
 0x6c3   :  { %v3662_v29 = vmul.f32 %v6398_v24, %v7791_v60  ;;  %v8001_v60 = vpack.c.bf16 %v3946_v49, %v3942_v42  ;;  %v3947_v40 = vld [vmem:[#allocation13 + $0x1b0] sm:$0xff]  ;;  %v3950_v24 = vld [vmem:[#allocation13 + $0x1c8] sm:$0xff]  ;;  %v3953_v49 = vld [vmem:[#allocation13 + $0x1e0] sm:$0xff] }
 0x6c4   :  { %v8010_v38 = vpack.c.bf16 %v3947_v40, %v3943_v31  ;;  %v3955_v13 = vld [vmem:[#allocation13 + $0x1f0] sm:$0xff]  ;;  %v8020_v9 = vpack.c.bf16 %v3953_v49, %v3949_v34  ;;  %v8375_v34 = vld [vmem:[#allocation36_spill] sm:$0xff] }
 0x6c5   :  { %v7991_v45 = vadd.f32 %v3663_v33, %v3662_v29  ;;  %5866 = vmatpush1.bf16.msra.mxu0 %v7980_v15  ;;  %5898 = vmatpush1.bf16.msra.mxu1 %v7982_v14  ;;  %v3954_v33 = vld [vmem:[#allocation13 + $0x1e8] sm:$0xff]  ;;  %v3952_v29 = vld [vmem:[#allocation13 + $0x1d8] sm:$0xff]  ;;  %v8022_v44 = vpack.c.bf16 %v3955_v13, %v3951_v27 }
 0x6c6   :  { %5868 = vmatprep.subr.bf16.mxu0 %v7986_v30  ;;  %5900 = vmatprep.subr.bf16.mxu1 %v7988_v62  ;;  %v8014_v42 = vpack.c.bf16 %v3954_v33, %v3950_v24  ;;  %v8016_v55 = vpack.c.bf16 %v3956_v58, %v3952_v29 }
 0x6c7   :  { %6401 = vtanh.f32 %v7991_v45 }
 0x6c9   :  { %5870 = vmatpush1.bf16.msra.mxu0 %v7995_v12  ;;  %5902 = vmatpush1.bf16.msra.mxu1 %v7997_v57 }
 0x6ca   :  { %5872 = vmatprep.subr.bf16.mxu0 %v8001_v60  ;;  %5904 = vmatprep.subr.bf16.mxu1 %v8003_v51  ;;  %v6400_v31 = vpop.eup %6399 }
 0x6cd   :  { %5874 = vmatpush1.bf16.msra.mxu0 %v8008_v8  ;;  %5906 = vmatpush1.bf16.msra.mxu1 %v8010_v38 }
 0x6ce   :  { %5876 = vmatprep.subr.bf16.mxu0 %v8014_v42  ;;  %5908 = vmatprep.subr.bf16.mxu1 %v8016_v55 }
 0x6d1   :  { %v6402_v40 = vpop.eup %6401  ;;  %5878 = vmatpush1.bf16.msra.mxu0 %v8020_v9  ;;  %5910 = vmatpush1.bf16.msra.mxu1 %v8022_v44 }
 0x6d2   :  { %v8028_v24 = vmul.f32 %v6402_v40, %v6400_v31  ;;  %5912 = vmatprep.subr.bf16.mxu0 %v7814_v26  ;;  %5944 = vmatprep.subr.bf16.mxu1 %v7816_v22 }
 0x6d4   :  { %4022 = vmatmul.mubr.f32.vlgmr.msra.gmra.mrb[2].mxu0 %v8028_v24  ;;  %4093 = vmatmul.mubr.f32.vlgmr.msra.gmra.mrb[34].mxu1 %v8028_v24 }
 0x6d5   :  { %5914 = vmatpush1.bf16.msra.mxu0 %v7818_v50  ;;  %5946 = vmatpush1.bf16.msra.mxu1 %v7821_v43  ;;  %v8369_v50 = vld [vmem:[#allocation28_spill] sm:$0xff] }
 0x6d6   :  { %5916 = vmatprep.subr.bf16.mxu0 %v7826_v18  ;;  %5948 = vmatprep.subr.bf16.mxu1 %v7828_v17 }
 0x6d7   :  { %4292 = vmatprep.mubr.f32.mxu0 %v8267_v37  ;;  %4363 = vmatprep.mubr.f32.mxu1 %v8267_v37 }
 0x6d9   :  { %5918 = vmatpush1.bf16.msra.mxu0 %v7830_v46  ;;  %5950 = vmatpush1.bf16.msra.mxu1 %v7833_v21  ;;  %v8370_v46 = vld [vmem:[#allocation29_spill] sm:$0xff] }
 0x6da   :  { %5920 = vmatprep.subr.bf16.mxu0 %v7838_v25  ;;  %5952 = vmatprep.subr.bf16.mxu1 %v7840_v32 }
 0x6dd   :  { %5922 = vmatpush1.bf16.msra.mxu0 %v7842_v36  ;;  %5954 = vmatpush1.bf16.msra.mxu1 %v7845_v20 }
 0x6de   :  { %5924 = vmatprep.subr.bf16.mxu0 %v7850_v56  ;;  %5956 = vmatprep.subr.bf16.mxu1 %v7852_v61  ;;  %v8371_v56 = vld [vmem:[#allocation32_spill] sm:$0xff] }
 0x6e1   :  { %5926 = vmatpush1.bf16.msra.mxu0 %v7854_v19  ;;  %5958 = vmatpush1.bf16.msra.mxu1 %v7857_v5 }
 0x6e2   :  { %5928 = vmatprep.subr.bf16.mxu0 %v7862_v23  ;;  %5960 = vmatprep.subr.bf16.mxu1 %v7864_v7 }
 0x6e5   :  { %5930 = vmatpush1.bf16.msra.mxu0 %v7866_v16  ;;  %5962 = vmatpush1.bf16.msra.mxu1 %v7869_v11 }
 0x6e6   :  { %5932 = vmatprep.subr.bf16.mxu0 %v7874_v28  ;;  %5964 = vmatprep.subr.bf16.mxu1 %v7876_v52 }
 0x6e9   :  { %5934 = vmatpush1.bf16.msra.mxu0 %v7878_v53  ;;  %5966 = vmatpush1.bf16.msra.mxu1 %v7881_v41 }
 0x6ea   :  { %5936 = vmatprep.subr.bf16.mxu0 %v7886_v47  ;;  %5968 = vmatprep.subr.bf16.mxu1 %v7888_v39  ;;  %v8372_v47 = vld [vmem:[#allocation39_spill] sm:$0xff] }
 0x6ed   :  { %5938 = vmatpush1.bf16.msra.mxu0 %v7890_v35  ;;  %5970 = vmatpush1.bf16.msra.mxu1 %v7893_v2 }
 0x6ee   :  { %5940 = vmatprep.subr.bf16.mxu0 %v7898_v54  ;;  %5972 = vmatprep.subr.bf16.mxu1 %v7900_v63  ;;  %v8373_v63 = vld [vmem:[#allocation35_spill] sm:$0xff] }
 0x6f1   :  { %5942 = vmatpush1.bf16.msra.mxu0 %v7902_v3  ;;  %5974 = vmatpush1.bf16.msra.mxu1 %v7905_v48 }
 0x6f2   :  { %5976 = vmatprep.subr.bf16.mxu0 %v7910_v0  ;;  %6008 = vmatprep.subr.bf16.mxu1 %v7912_v59  ;;  %v8374_v59 = vld [vmem:[#allocation34_spill] sm:$0xff] }
 0x787   :  { %v3808_v26 = vpop.f32.mrb[28].mxu0  ;;  %v3879_v22 = vpop.f32.mrb[28].mxu1 }
 0x788   :  { %v3884_v43 = vadd.f32 %v3808_v26, %v8369_v50  ;;  %v3810_v18 = vpop.f32.mrb[29].mxu0  ;;  %v3881_v17 = vpop.f32.mrb[29].mxu1  ;;  %v6115_v61 = vadd.f32 %v3879_v22, %v8371_v56 }
 0x789   :  { %v3885_v21 = vadd.f32 %v3810_v18, %v8370_v46  ;;  %v6116_v36 = vadd.f32 %v3881_v17, %v8287_v10  ;;  %v8376_v18 = vld [vmem:[#allocation40_spill] sm:$0xff]  ;;  %v8377_v17 = vld [vmem:[#allocation41_spill] sm:$0xff] }
 0x78a   :  { %v4914_v25 = vmul.f32 -1.442695, %v3884_v43 }
 0x78b   :  { %v4915_v32 = vmul.f32 -1.442695, %v3885_v21  ;;  %v4916_v20 = vmul.f32 -1.442695, %v6116_v36  ;;  %v8378_v21 = vld [vmem:[#allocation45_spill] sm:$0xff]  ;;  %v8381_v36 = vld [vmem:[#allocation48_spill] sm:$0xff] }
 0x78c   :  { %6403 = vpow2.f32 %v4914_v25  ;;  %v8379_v25 = vld [vmem:[#allocation46_spill] sm:$0xff] }
 0x78d   :  { %6405 = vpow2.f32 %v4915_v32  ;;  %v8380_v32 = vld [vmem:[#allocation47_spill] sm:$0xff] }
 0x78e   :  { %6407 = vpow2.f32 %v4916_v20  ;;  %v8382_v20 = vld [vmem:[#allocation49_spill] sm:$0xff] }
 0x78f   :  { %6409 = vtanh.f32 %v6115_v61  ;;  %v8383_v61 = vld [vmem:[#allocation50_spill] sm:$0xff] }
 0x796   :  { %v6404_v19 = vpop.eup %6403 }
 0x797   :  { %v6406_v5 = vpop.eup %6405  ;;  %v4107_v23 = vadd.f32 1.0, %v6404_v19  ;;  %v8384_v19 = vld [vmem:[#allocation51_spill] sm:$0xff] }
 0x798   :  { %v4113_v7 = vadd.f32 1.0, %v6406_v5  ;;  %v6408_v16 = vpop.eup %6407  ;;  %v8385_v5 = vld [vmem:[#allocation52_spill] sm:$0xff] }
 0x799   :  { %6411 = vrcp.f32 %v4107_v23  ;;  %v6410_v11 = vpop.eup %6409  ;;  %v4120_v41 = vadd.f32 1.0, %v6408_v16  ;;  %v8386_v23 = vld [vmem:[#allocation53_spill] sm:$0xff] }
 0x79a   :  { %6413 = vrcp.f32 %v4113_v7  ;;  %v8387_v7 = vld [vmem:[#allocation54_spill] sm:$0xff] }
 0x79b   :  { %6415 = vrcp.f32 %v4120_v41 }
 0x7a3   :  { %v6412_v28 = vpop.eup %6411 }
 0x7a4   :  { %v6414_v52 = vpop.eup %6413  ;;  %v4124_v53 = vmul.f32 %v6412_v28, %v6410_v11  ;;  %v8388_v28 = vld [vmem:[#allocation22_spill] sm:$0xff] }
 0x7a5   :  { %v4123_v39 = vmul.f32 %v6414_v52, %v8372_v47  ;;  %v6416_v27 = vpop.eup %6415  ;;  %v8389_v52 = vld [vmem:[#allocation26_spill] sm:$0xff] }
 0x7a7   :  { %v8073_v35 = vadd.f32 %v4124_v53, %v4123_v39  ;;  %v4023_v2 = vpop.f32.mrb[2].mxu0  ;;  %v4094_v54 = vpop.f32.mrb[34].mxu1 }
 0x7a8   :  { %v6121_v3 = vadd.f32 %v4023_v2, %v8373_v63  ;;  %v4025_v48 = vpop.f32.mrb[3].mxu0  ;;  %v4096_v0 = vpop.f32.mrb[35].mxu1  ;;  %v6137_v40 = vadd.f32 %v4094_v54, %v7138_v4 }
 0x7a9   :  { %v6122_v33 = vadd.f32 %v4025_v48, %v8374_v59  ;;  %6417 = vtanh.f32 %v8073_v35  ;;  %v6138_v49 = vadd.f32 %v4096_v0, %v8375_v34  ;;  %v4666_v48 = vld [vmem:[#allocation14 + $0x28] sm:$0xff] }
 0x7aa   :  { %v4917_v29 = vmul.f32 -1.442695, %v6121_v3  ;;  %v4665_v3 = vld [vmem:[#allocation14 + $0x20] sm:$0xff] }
 0x7ab   :  { %v4918_v58 = vmul.f32 -1.442695, %v6122_v33  ;;  %v4919_v31 = vmul.f32 -1.442695, %v6138_v49  ;;  %v6049_v0 = vpack.c.bf16 %v4666_v48, %v4665_v3  ;;  %v4683_v33 = vld [vmem:[#allocation14 + $0xb0] sm:$0xff] }
 0x7ac   :  { %6419 = vpow2.f32 %v4917_v29  ;;  %v4684_v29 = vld [vmem:[#allocation14 + $0xb8] sm:$0xff]  ;;  %v4667_v49 = vld [vmem:[#allocation14 + $0x30] sm:$0xff] }
 0x7ad   :  { %6421 = vpow2.f32 %v4918_v58  ;;  %v6051_v58 = vpack.c.bf16 %v4684_v29, %v4683_v33 }
 0x7ae   :  { %6423 = vpow2.f32 %v4919_v31  ;;  %v4685_v31 = vld [vmem:[#allocation14 + $0xc0] sm:$0xff] }
 0x7af   :  { %6425 = vtanh.f32 %v6137_v40  ;;  %v4686_v40 = vld [vmem:[#allocation14 + $0xc8] sm:$0xff] }
 0x7b3   :  { %v6418_v13 = vpop.eup %6417 }
 0x7b4   :  { %v8080_v26 = vmul.f32 %v6418_v13, %v6416_v27  ;;  %v4668_v27 = vld [vmem:[#allocation14 + $0x38] sm:$0xff] }
 0x7b5   :  { %v6053_v13 = vpack.c.bf16 %v4668_v27, %v4667_v49 }
 0x7b6   :  { %v6420_v22 = vpop.eup %6419  ;;  %4293 = vmatmul.mubr.f32.vlgmr.msra.gmra.mrb[30].mxu0 %v8080_v26  ;;  %4364 = vmatmul.mubr.f32.vlgmr.msra.gmra.mrb[30].mxu1 %v8080_v26 }
 0x7b7   :  { %v6422_v50 = vpop.eup %6421  ;;  %v4132_v43 = vadd.f32 1.0, %v6420_v22  ;;  %5978 = vmatpush1.bf16.msra.mxu0 %v8376_v18  ;;  %6010 = vmatpush1.bf16.msra.mxu1 %v8377_v17  ;;  %v4669_v22 = vld [vmem:[#allocation14 + $0x40] sm:$0xff]  ;;  %v4687_v18 = vld [vmem:[#allocation14 + $0xd0] sm:$0xff]  ;;  %v4688_v17 = vld [vmem:[#allocation14 + $0xd8] sm:$0xff] }
 0x7b8   :  { %v4138_v46 = vadd.f32 1.0, %v6422_v50  ;;  %5980 = vmatprep.subr.bf16.mxu0 %v8378_v21  ;;  %6012 = vmatprep.subr.bf16.mxu1 %v8379_v25  ;;  %v6424_v16 = vpop.eup %6423  ;;  %v6055_v50 = vpack.c.bf16 %v4686_v40, %v4685_v31  ;;  %v6059_v21 = vpack.c.bf16 %v4688_v17, %v4687_v18  ;;  %v4671_v25 = vld [vmem:[#allocation14 + $0x50] sm:$0xff] }
 0x7b9   :  { %6427 = vrcp.f32 %v4132_v43  ;;  %4507 = vmatprep.mubr.f32.mxu0 %v8267_v37  ;;  %4578 = vmatprep.mubr.f32.mxu1 %v8267_v37  ;;  %v6426_v11 = vpop.eup %6425  ;;  %v4145_v47 = vadd.f32 1.0, %v6424_v16  ;;  %v4670_v43 = vld [vmem:[#allocation14 + $0x48] sm:$0xff]  ;;  %v4692_v16 = vld [vmem:[#allocation14 + $0xf8] sm:$0xff] }
 0x7ba   :  { %6429 = vrcp.f32 %v4138_v46  ;;  %v6057_v46 = vpack.c.bf16 %v4670_v43, %v4669_v22 }
 0x7bb   :  { %5982 = vmatpush1.bf16.msra.mxu0 %v8380_v32  ;;  %6014 = vmatpush1.bf16.msra.mxu1 %v8381_v36  ;;  %6431 = vrcp.f32 %v4145_v47  ;;  %v4672_v32 = vld [vmem:[#allocation14 + $0x58] sm:$0xff]  ;;  %v4689_v36 = vld [vmem:[#allocation14 + $0xe0] sm:$0xff] }
 0x7bc   :  { %5984 = vmatprep.subr.bf16.mxu0 %v8382_v20  ;;  %6016 = vmatprep.subr.bf16.mxu1 %v8383_v61  ;;  %v4690_v20 = vld [vmem:[#allocation14 + $0xe8] sm:$0xff]  ;;  %v6061_v61 = vpack.c.bf16 %v4672_v32, %v4671_v25 }
 0x7bf   :  { %5986 = vmatpush1.bf16.msra.mxu0 %v8384_v19  ;;  %6018 = vmatpush1.bf16.msra.mxu1 %v8385_v5  ;;  %v6063_v19 = vpack.c.bf16 %v4690_v20, %v4689_v36  ;;  %v4673_v5 = vld [vmem:[#allocation14 + $0x60] sm:$0xff] }
 0x7c0   :  { %5988 = vmatprep.subr.bf16.mxu0 %v8386_v23  ;;  %6020 = vmatprep.subr.bf16.mxu1 %v8387_v7  ;;  %v4674_v23 = vld [vmem:[#allocation14 + $0x68] sm:$0xff]  ;;  %v4691_v7 = vld [vmem:[#allocation14 + $0xf0] sm:$0xff] }
 0x7c3   :  { %v6428_v37 = vpop.eup %6427  ;;  %5990 = vmatpush1.bf16.msra.mxu0 %v8388_v28  ;;  %6022 = vmatpush1.bf16.msra.mxu1 %v8389_v52  ;;  %v4675_v28 = vld [vmem:[#allocation14 + $0x70] sm:$0xff]  ;;  %v4676_v52 = vld [vmem:[#allocation14 + $0x78] sm:$0xff] }
 0x7c4   :  { %v6430_v53 = vpop.eup %6429  ;;  %v4149_v41 = vmul.f32 %v6428_v37, %v6426_v11  ;;  %5992 = vmatprep.subr.bf16.mxu0 %v7974_v6  ;;  %6024 = vmatprep.subr.bf16.mxu1 %v7976_v1  ;;  %v4678_v6 = vld [vmem:[#allocation14 + $0x88] sm:$0xff]  ;;  %v6065_v11 = vpack.c.bf16 %v4674_v23, %v4673_v5  ;;  %v6067_v37 = vpack.c.bf16 %v4692_v16, %v4691_v7  ;;  %v8392_v16 = vld [vmem:[#allocation37_spill] sm:$0xff] }
 0x7c5   :  { %v4148_v39 = vmul.f32 %v6430_v53, %v7991_v45  ;;  %v6069_v53 = vpack.c.bf16 %v4676_v52, %v4675_v28  ;;  %v8395_v28 = vld [vmem:[#allocation25_spill] sm:$0xff]  ;;  %v8397_v52 = vld [vmem:[#allocation23_spill] sm:$0xff] }
 0x7c7   :  { %v8103_v2 = vadd.f32 %v4149_v41, %v4148_v39  ;;  %5994 = vmatpush1.bf16.msra.mxu0 %v7980_v15  ;;  %6026 = vmatpush1.bf16.msra.mxu1 %v7982_v14  ;;  %v4677_v14 = vld [vmem:[#allocation14 + $0x80] sm:$0xff]  ;;  %v8390_v39 = vld [vmem:[#allocation30_spill] sm:$0xff] }
 0x7c8   :  { %5996 = vmatprep.subr.bf16.mxu0 %v7986_v30  ;;  %6028 = vmatprep.subr.bf16.mxu1 %v7988_v62  ;;  %v6432_v30 = vpop.eup %6431  ;;  %v6039_v1 = vpack.c.bf16 %v4678_v6, %v4677_v14  ;;  %v4661_v15 = vld [vmem:[#allocation14] sm:$0xff]  ;;  %v8391_v6 = vld [vmem:[#allocation31_spill] sm:$0xff] }
 0x7c9   :  { %6433 = vtanh.f32 %v8103_v2 }
 0x7cb   :  { %5998 = vmatpush1.bf16.msra.mxu0 %v7995_v12  ;;  %6030 = vmatpush1.bf16.msra.mxu1 %v7997_v57  ;;  %v4662_v12 = vld [vmem:[#allocation14 + $0x8] sm:$0xff] }
 0x7cc   :  { %6000 = vmatprep.subr.bf16.mxu0 %v8001_v60  ;;  %6032 = vmatprep.subr.bf16.mxu1 %v8003_v51  ;;  %v6041_v57 = vpack.c.bf16 %v4662_v12, %v4661_v15  ;;  %v4679_v60 = vld [vmem:[#allocation14 + $0x90] sm:$0xff]  ;;  %v4680_v51 = vld [vmem:[#allocation14 + $0x98] sm:$0xff] }
 0x7cf   :  { %6002 = vmatpush1.bf16.msra.mxu0 %v8008_v8  ;;  %6034 = vmatpush1.bf16.msra.mxu1 %v8010_v38  ;;  %v6043_v8 = vpack.c.bf16 %v4680_v51, %v4679_v60  ;;  %v4663_v38 = vld [vmem:[#allocation14 + $0x10] sm:$0xff] }
 0x7d0   :  { %6004 = vmatprep.subr.bf16.mxu0 %v8014_v42  ;;  %6036 = vmatprep.subr.bf16.mxu1 %v8016_v55  ;;  %v4664_v42 = vld [vmem:[#allocation14 + $0x18] sm:$0xff] }
 0x7d1   :  { %v6045_v55 = vpack.c.bf16 %v4664_v42, %v4663_v38 }
 0x7d3   :  { %v6434_v45 = vpop.eup %6433  ;;  %6006 = vmatpush1.bf16.msra.mxu0 %v8020_v9  ;;  %6038 = vmatpush1.bf16.msra.mxu1 %v8022_v44  ;;  %v4681_v9 = vld [vmem:[#allocation14 + $0xa0] sm:$0xff]  ;;  %v4682_v44 = vld [vmem:[#allocation14 + $0xa8] sm:$0xff] }
 0x7d4   :  { %v8120_v62 = vmul.f32 %v6434_v45, %v6432_v30  ;;  %6040 = vmatprep.subr.bf16.mxu0 %v6039_v1  ;;  %v6047_v54 = vpack.c.bf16 %v4682_v44, %v4681_v9 }
 0x7d6   :  { %4508 = vmatmul.mubr.f32.vlgmr.msra.gmra.mrb[0].mxu0 %v8120_v62  ;;  %4579 = vmatmul.mubr.f32.vlgmr.msra.gmra.mrb[32].mxu1 %v8120_v62 }
 0x7d7   :  { %6042 = vmatpush3.bf16.msra.mxu0 %v6041_v57 }
 0x7d8   :  { %6044 = vmatprep.subr.bf16.mxu0 %v6043_v8 }
 0x7db   :  { %6046 = vmatpush3.bf16.msra.mxu0 %v6045_v55 }
 0x7dc   :  { %6048 = vmatprep.subr.bf16.mxu0 %v6047_v54 }
 0x7df   :  { %6050 = vmatpush3.bf16.msra.mxu0 %v6049_v0 }
 0x7e0   :  { %6052 = vmatprep.subr.bf16.mxu0 %v6051_v58 }
 0x7e3   :  { %6054 = vmatpush3.bf16.msra.mxu0 %v6053_v13 }
 0x7e4   :  { %6056 = vmatprep.subr.bf16.mxu0 %v6055_v50 }
 0x7e7   :  { %6058 = vmatpush3.bf16.msra.mxu0 %v6057_v46 }
 0x7e8   :  { %6060 = vmatprep.subr.bf16.mxu0 %v6059_v21 }
 0x7eb   :  { %6062 = vmatpush3.bf16.msra.mxu0 %v6061_v61 }
 0x7ec   :  { %6064 = vmatprep.subr.bf16.mxu0 %v6063_v19 }
 0x7ef   :  { %6066 = vmatpush3.bf16.msra.mxu0 %v6065_v11  ;;  %v8393_v11 = vld [vmem:[#allocation42_spill] sm:$0xff] }
 0x7f0   :  { %6068 = vmatprep.subr.bf16.mxu0 %v6067_v37  ;;  %v8394_v37 = vld [vmem:[#allocation21_spill] sm:$0xff] }
 0x7f3   :  { %6070 = vmatpush3.bf16.msra.mxu0 %v6069_v53  ;;  %v8398_v53 = vld [vmem:[#allocation24_spill] sm:$0xff] }
 0x889   :  { %v4294_v41 = vpop.f32.mrb[30].mxu0  ;;  %v4365_v47 = vpop.f32.mrb[30].mxu1 }
 0x88a   :  { %v4370_v30 = vadd.f32 %v4294_v41, %v8390_v39  ;;  %v4296_v45 = vpop.f32.mrb[31].mxu0  ;;  %v4367_v14 = vpop.f32.mrb[31].mxu1  ;;  %v6117_v51 = vadd.f32 %v4365_v47, %v8371_v56  ;;  %v8399_v41 = vld [vmem:[#allocation33_spill] sm:$0xff]  ;;  %v8400_v47 = vld [vmem:[#allocation44_spill] sm:$0xff]  ;;  %v8401_v39 = vld [vmem:[#allocation55_spill] sm:$0xff] }
 0x88b   :  { %v4371_v1 = vadd.f32 %v4296_v45, %v8391_v6  ;;  %v6118_v57 = vadd.f32 %v4367_v14, %v8287_v10 }
 0x88c   :  { %v4920_v15 = vmul.f32 -1.442695, %v4370_v30  ;;  %v4926_v30 = vld [vmem:[%s8172_s6] ss:$0 sm:$0xff]  ;;  %s6596_s6 = smov [#allocation16]  }
 0x88d   :  { %v4921_v12 = vmul.f32 -1.442695, %v4371_v1  ;;  %v4922_v60 = vmul.f32 -1.442695, %v6118_v57  ;;  %s4818_s23 = sshll.u32 %s6596_s6, 4  ;;  %s4819_s23 = int_to_ptr.vmem [resolvable:$true] %s4818_s23 }
 0x88e   :  { %6435 = vpow2.f32 %v4920_v15  ;;  %s6555_s24 = scalar_lea.vmem %s4819_s23, 1024  ;;  %p6560_p5 = scmp.lt.s32.totalorder %s4819_s23, %s4819_s23 }
 0x88f   :  { %6437 = vpow2.f32 %v4921_v12  ;;  %p6556_p4 = scmp.ne.s32.totalorder %s4819_s23, %s6555_s24  ;;  %p6561_p6 = scmp.lt.s32.totalorder %s6555_s24, %s6555_s24 }
 0x890   :  { %6439 = vpow2.f32 %v4922_v60 }
 0x891   :  { %6441 = vtanh.f32 %v6117_v51  ;;  %p6562_p7 = por %p6561_p6, %p6560_p5 }
 0x893   :  { %p6563_p8 = pnand %p6562_p7, %p6556_p4 }
 0x898   :  { %v6436_v8 = vpop.eup %6435 }
 0x899   :  { %v6438_v38 = vpop.eup %6437  ;;  %v4593_v42 = vadd.f32 1.0, %v6436_v8 }
 0x89a   :  { %v4599_v55 = vadd.f32 1.0, %v6438_v38  ;;  %v6440_v9 = vpop.eup %6439 }
 0x89b   :  { %6443 = vrcp.f32 %v4593_v42  ;;  %v6442_v44 = vpop.eup %6441  ;;  %v4606_v0 = vadd.f32 1.0, %v6440_v9 }
 0x89c   :  { %6445 = vrcp.f32 %v4599_v55 }
 0x89d   :  { %6447 = vrcp.f32 %v4606_v0 }
 0x8a5   :  { %v6444_v54 = vpop.eup %6443 }
 0x8a6   :  { %v6446_v3 = vpop.eup %6445  ;;  %v4610_v48 = vmul.f32 %v6444_v54, %v6442_v44 }
 0x8a7   :  { %v4609_v33 = vmul.f32 %v6446_v3, %v8073_v35  ;;  %v6448_v50 = vpop.eup %6447 }
 0x8a9   :  { %v4509_v10 = vpop.f32.mrb[0].mxu0  ;;  %v4580_v29 = vpop.f32.mrb[32].mxu1  ;;  %v4611_v58 = vadd.f32 %v4610_v48, %v4609_v33 }
 0x8aa   :  { %v6119_v56 = vadd.f32 %v4509_v10, %v8373_v63  ;;  %v4511_v49 = vpop.f32.mrb[1].mxu0  ;;  %v4582_v27 = vpop.f32.mrb[33].mxu1  ;;  %v6135_v18 = vadd.f32 %v4580_v29, %v7138_v4 }
 0x8ab   :  { %v6120_v13 = vadd.f32 %v4511_v49, %v8374_v59  ;;  %6449 = vtanh.f32 %v4611_v58  ;;  %v6136_v22 = vadd.f32 %v4582_v27, %v8375_v34 }
 0x8ac   :  { %v4923_v31 = vmul.f32 -1.442695, %v6119_v56 }
 0x8ad   :  { %v4924_v40 = vmul.f32 -1.442695, %v6120_v13  ;;  %v4925_v35 = vmul.f32 -1.442695, %v6136_v22 }
 0x8ae   :  { %6451 = vpow2.f32 %v4923_v31 }
 0x8af   :  { %6453 = vpow2.f32 %v4924_v40 }
 0x8b0   :  { %6455 = vpow2.f32 %v4925_v35 }
 0x8b1   :  { %6457 = vtanh.f32 %v6135_v18 }
 0x8b5   :  { %v6450_v43 = vpop.eup %6449 }
 0x8b6   :  { %v4613_v17 = vmul.f32 %v6450_v43, %v6448_v50 }
 0x8b8   :  { %v6452_v46 = vpop.eup %6451 }
 0x8b9   :  { %v6454_v21 = vpop.eup %6453  ;;  %v4618_v63 = vadd.f32 1.0, %v6452_v46 }
 0x8ba   :  { %v4624_v25 = vadd.f32 1.0, %v6454_v21  ;;  %v6456_v59 = vpop.eup %6455 }
 0x8bb   :  { %6459 = vrcp.f32 %v4618_v63  ;;  %v6458_v32 = vpop.eup %6457  ;;  %v4631_v34 = vadd.f32 1.0, %v6456_v59 }
 0x8bc   :  { %6461 = vrcp.f32 %v4624_v25 }
 0x8bd   :  { %6463 = vrcp.f32 %v4631_v34 }
 0x8c5   :  { %v6460_v36 = vpop.eup %6459 }
 0x8c6   :  { %v6462_v20 = vpop.eup %6461  ;;  %v4635_v61 = vmul.f32 %v6460_v36, %v6458_v32 }
 0x8c7   :  { %v4634_v19 = vmul.f32 %v6462_v20, %v8103_v2  ;;  %v6464_v4 = vpop.eup %6463  ;;  %v8396_v2 = vld [vmem:[#allocation43_spill] sm:$0xff] }
 0x8c9   :  { %v4636_v5 = vadd.f32 %v4635_v61, %v4634_v19 }
 0x8cb   :  { %6465 = vtanh.f32 %v4636_v5 }
 0x8d5   :  { %v6466_v23 = vpop.eup %6465 }
 0x8d6   :  { %v4638_v7 = vmul.f32 %v6466_v23, %v6464_v4 }
 0x8d8   :  { %4764 = vmatprep.mubr.f32.mxu0 %v4638_v7 }
 0x8d9   :  { %4765 = vmatmul.mubr.f32.vlgmr.msra.gmra.mrb[32].mxu0 %v8392_v16 }
 0x8da   :  { %4769 = vmatprep.mubr.f32.mxu0 %v8120_v62  ;;  %v8402_v62 = vld [vmem:[#allocation38_spill] sm:$0xff] }
 0x8dd   :  { %4770 = vmatmul.mubr.f32.gmra.mrb[34].mxu0 %v8393_v11 }
 0x8de   :  { %4774 = vmatprep.mubr.f32.mxu0 %v8028_v24 }
 0x8e1   :  { %4775 = vmatmul.mubr.f32.gmra.mrb[36].mxu0 %v8394_v37 }
 0x8e2   :  { %4779 = vmatprep.mubr.f32.mxu0 %v8395_v28 }
 0x8e5   :  { %4780 = vmatmul.mubr.f32.gmra.mrb[38].mxu0 %v8396_v2 }
 0x8e6   :  { %4784 = vmatprep.mubr.f32.mxu0 %v8397_v52 }
 0x8e9   :  { %4785 = vmatmul.mubr.f32.gmra.mrb[40].mxu0 %v8398_v53 }
 0x8ea   :  { %4789 = vmatprep.mubr.f32.mxu0 %v8399_v41 }
 0x8ed   :  { %4790 = vmatmul.mubr.f32.gmra.mrb[42].mxu0 %v8400_v47 }
 0x8ee   :  { %4794 = vmatprep.mubr.f32.mxu0 %v8401_v39 }
 0x8f1   :  { %4795 = vmatmul.mubr.f32.gmra.mrb[44].mxu0 %v8080_v26 }
 0x8f2   :  { %4799 = vmatprep.mubr.f32.mxu0 %v8402_v62 }
 0x8f5   :  { %4800 = vmatmul.mubr.f32.gmra.mrb[46].mxu0 %v4613_v17 }
 0x9ac   :  { %v4959_v24 = vpop.f32.mrb[32].mxu0 }
 0x9ad   :  { %v4960_v45 = vpop.f32.mrb[33].mxu0 }
 0x9ae   :  { %v4961_v14 = vadd.f32 %v4960_v45, %v4959_v24 }
 0x9b0   :  { %v4767_v6 = vadd.f32 %v4961_v14, %v4926_v30  ;;  %v4962_v1 = vpop.f32.mrb[34].mxu0 }
 0x9b1   :  { %v4963_v15 = vpop.f32.mrb[35].mxu0 }
 0x9b2   :  { %4805 = vst [vmem:[#allocation16] sm:$0xff] %v4767_v6  ;;  %v4964_v12 = vadd.f32 %v4963_v15, %v4962_v1 }
 0x9b4   :  { %v4772_v57 = vadd.f32 %v4964_v12, %v4926_v30  ;;  %v4965_v60 = vpop.f32.mrb[36].mxu0 }
 0x9b5   :  { %v4966_v51 = vpop.f32.mrb[37].mxu0 }
 0x9b6   :  { %4806 = vst [vmem:[#allocation16 + $0x8] sm:$0xff] %v4772_v57  ;;  %v4967_v26 = vadd.f32 %v4966_v51, %v4965_v60 }
 0x9b8   :  { %v4777_v8 = vadd.f32 %v4967_v26, %v4926_v30  ;;  %v4968_v38 = vpop.f32.mrb[38].mxu0 }
 0x9b9   :  { %v4969_v42 = vpop.f32.mrb[39].mxu0 }
 0x9ba   :  { %4807 = vst [vmem:[#allocation16 + $0x10] sm:$0xff] %v4777_v8  ;;  %v4970_v55 = vadd.f32 %v4969_v42, %v4968_v38 }
 0x9bc   :  { %v4782_v9 = vadd.f32 %v4970_v55, %v4926_v30  ;;  %v4971_v44 = vpop.f32.mrb[40].mxu0 }
 0x9bd   :  { %v4972_v54 = vpop.f32.mrb[41].mxu0 }
 0x9be   :  { %4808 = vst [vmem:[#allocation16 + $0x18] sm:$0xff] %v4782_v9  ;;  %v4973_v3 = vadd.f32 %v4972_v54, %v4971_v44 }
 0x9c0   :  { %v4787_v48 = vadd.f32 %v4973_v3, %v4926_v30  ;;  %v4974_v0 = vpop.f32.mrb[42].mxu0 }
 0x9c1   :  { %v4975_v33 = vpop.f32.mrb[43].mxu0 }
 0x9c2   :  { %4809 = vst [vmem:[#allocation16 + $0x20] sm:$0xff] %v4787_v48  ;;  %v4976_v10 = vadd.f32 %v4975_v33, %v4974_v0 }
 0x9c4   :  { %v4792_v29 = vadd.f32 %v4976_v10, %v4926_v30  ;;  %v4977_v58 = vpop.f32.mrb[44].mxu0 }
 0x9c5   :  { %v4978_v56 = vpop.f32.mrb[45].mxu0 }
 0x9c6   :  { %4810 = vst [vmem:[#allocation16 + $0x28] sm:$0xff] %v4792_v29  ;;  %v4979_v49 = vadd.f32 %v4978_v56, %v4977_v58 }
 0x9c8   :  { %v4797_v27 = vadd.f32 %v4979_v49, %v4926_v30  ;;  %v4980_v13 = vpop.f32.mrb[46].mxu0 }
 0x9c9   :  { %v4981_v31 = vpop.f32.mrb[47].mxu0 }
 0x9ca   :  { %4811 = vst [vmem:[#allocation16 + $0x30] sm:$0xff] %v4797_v27  ;;  %v4982_v40 = vadd.f32 %v4981_v31, %v4980_v13 }
 0x9cc   :  { %v4802_v22 = vadd.f32 %v4982_v40, %v4926_v30 }
 0x9ce   :  { %4812 = vst [vmem:[#allocation16 + $0x38] sm:$0xff] %v4802_v22 }
 0x9cf   :  { %6566 = shalt.err (!%p6563_p8)
}
 0x9d0   :  { %s6567_s26 = scalar_lea.hbm %s8173_s7, 1024 }
 0x9d1   :  { %p6568_p9 = scmp.ne.s32.totalorder %s8173_s7, %s6567_s26  ;;  %p6571_p10 = scmp.lt.u32.totalorder %s6567_s26, %s8173_s7 }
 0x9d3   :  { %p6573_p11 = pnand %p6571_p10, %p6568_p9 }
 0x9d5   :  { %6576 = shalt.err (!%p6573_p11)
}
 0x9d6   :  { %4824 = dma.vmem_to_hbm [thread:$0]  %s4819_s23, 1024, %s8173_s7, [#allocation10], %s6593_s4, %s6593_s4, %s6594_s11  }
 0x9d7   :  { %6583 = dma.done.wait [#allocation10], 1024  }
 0x9d8   :  { %6584 = vsyncadd [#allocation10], 4294966272 }
 0x9d9   :  { %4828 = vsyncpa [#allocation9], 1 }
 0x9da   :  { %4829 = vsyncpa [#allocation12], 1 }
 0x9db   :  { %4830 = vsyncpa [#allocation15], 1 }
 0x9dc   :  { %4831 = vsyncpa [#allocation10], 1 }

</bundles_post_ra>
